<compile_context>
chip_gen: v5e
topology: v5e:2x2
jax: 0.10.0
libtpu: 0.0.40
codegen_flags: <defaults>
</compile_context>

<pallas_src>
import numpy as np

import jax
import jax.numpy as jnp
from jax.experimental import pallas as pl
from jax.experimental.pallas import tpu as pltpu

# Static geometry fixed by the module (MNIST 28x28, 3x3 convs, pool 2).
_H = 28               # input spatial size
_C1 = 32              # conv1 out channels
_C2 = 10              # conv2 out channels
_H1 = 26              # conv1 spatial size
_HP = 13              # pooled spatial size (= rows per sample everywhere below)
_H2 = 11              # conv2 spatial size
_KIN = 4 * _H         # 112: slab row width (image rows 2k..2k+3 stacked on lanes)
_L1 = _H1 * _C1       # 832: conv1 row width, lane = x*32 + c
_ODD = 896            # 128-aligned lane offset of the "odd conv1 row" half
_N1 = _ODD + _L1      # 1728: conv1 matmul output width
_LP = 800             # pooled row width holding the x-pool candidates
_L2 = _H2 * _C2       # 110: conv2 valid row width, lane = x*10 + c
_L2P = 128            # conv2 row width padded to one lane group
_F = _HP * _L2P       # 1664: padded flattened feature width (1210 real features)
_NCLS = 10
_NPAD = 128           # padded classifier width (lane-dense output)
_EPS = 1e-5


# --------------------------------------------------------------------------
# Kernel A: conv1 + ReLU + maxpool(2) + conv2 + ReLU + partial BN statistics
# --------------------------------------------------------------------------
def _feature_kernel(slab_ref, w1_ref, b1_ref, w2_ref, b2_ref, sel_ref,
                    feat_ref, stat_ref):
    rows_n = slab_ref.shape[0]                              # tile*13 (static)
    lhs = slab_ref[...].astype(jnp.bfloat16)                # (R, 112)

    # conv1: even and odd output row of every pool pair in ONE MXU dot.
    acc1 = jnp.dot(lhs, w1_ref[...], preferred_element_type=jnp.float32)
    # 2x2 pool over y (max of the two halves), then bias + ReLU
    # (max / +bias / ReLU commute, both halves share the bias layout).
    pooled_y = jnp.maximum(acc1[:, 0:_L1], acc1[:, _ODD:_ODD + _L1])
    rows = jnp.maximum(pooled_y + b1_ref[...], 0.0)         # (R, 832)
    # 2x2 pool over x: the partner of lane (x*32+c) is lane (x*32+c)+32; the
    # pooled values land on lanes 64*x + c, junk lanes have zero weight in W2.
    mx = jnp.maximum(rows[:, 0:_LP], rows[:, _C1:_C1 + _LP])
    mx = mx.astype(jnp.bfloat16)                            # (R, 800)

    # conv2: the three dy bands share one dot (N = 3*128); the dy row shifts
    # are sublane rolls (XLU).  Per-sample rows 11,12 of `out` pick up rows of
    # the next sample via the wrap -- they are pad rows that get
    # gamma = beta = linear-weight = 0 downstream, so they never reach logits.
    res = jnp.dot(mx, w2_ref[...], preferred_element_type=jnp.float32)  # (R,384)
    out = (res[:, 0:_L2P]
           + pltpu.roll(res[:, _L2P:2 * _L2P], shift=rows_n - 1, axis=0)
           + pltpu.roll(res[:, 2 * _L2P:3 * _L2P], shift=rows_n - 2, axis=0))
    feat = jnp.maximum(out + b2_ref[...], 0.0)              # (R, 128)
    feat_ref[...] = feat

    # Partial BatchNorm statistics for this tile: a (13, R) one-hot selector
    # matmul sums over the tile's samples without any reshape or Python loop.
    sel = sel_ref[...]
    stat_ref[0, 0:_HP, :] = jnp.dot(sel, feat,
                                    preferred_element_type=jnp.float32)
    stat_ref[0, _HP:2 * _HP, :] = jnp.dot(sel, feat * feat,
                                          preferred_element_type=jnp.float32)


# --------------------------------------------------------------------------
# Kernel B: BatchNorm (precomputed scale/shift) + Linear, row tiled
# --------------------------------------------------------------------------
def _bn_linear_kernel(f_ref, sc_ref, sh_ref, w_ref, b_ref, o_ref):
    y = f_ref[...] * sc_ref[...] + sh_ref[...]              # (tile, 1664) f32
    o_ref[...] = (jnp.dot(y.astype(jnp.bfloat16), w_ref[...],
                          preferred_element_type=jnp.float32) + b_ref[...])


# --------------------------------------------------------------------------
# Parameter initialization (torch-layout) and one-time preparation
# --------------------------------------------------------------------------
def init_params(key):
    ks = jax.random.split(key, 6)
    return {
        "w1": jax.random.normal(ks[0], (32, 1, 3, 3), jnp.float32) * 0.1,
        "b1": jax.random.normal(ks[1], (32,), jnp.float32) * 0.1,
        "w2": jax.random.normal(ks[2], (10, 32, 3, 3), jnp.float32) * 0.1,
        "b2": jax.random.normal(ks[3], (10,), jnp.float32) * 0.1,
        "bn_gamma": jnp.ones((1210,), jnp.float32),
        "bn_beta": jnp.zeros((1210,), jnp.float32),
        "wl": jax.random.normal(ks[4], (10, 1210), jnp.float32) * 0.02,
        "bl": jax.random.normal(ks[5], (10,), jnp.float32) * 0.02,
    }


def prepare_params(p):
    """One-time conversion of torch-layout parameters into kernel layouts."""
    w1 = np.asarray(p["w1"], np.float32)          # (32, 1, 3, 3) [co, ci, dy, dx]
    b1 = np.asarray(p["b1"], np.float32)
    w2 = np.asarray(p["w2"], np.float32)          # (10, 32, 3, 3) [co, ci, dy, dx]
    b2 = np.asarray(p["b2"], np.float32)
    gamma = np.asarray(p["bn_gamma"], np.float32)
    beta = np.asarray(p["bn_beta"], np.float32)
    wl = np.asarray(p["wl"], np.float32)          # (10, 1210) torch Linear weight
    bl = np.asarray(p["bl"], np.float32)

    # conv1 as one (112, 1728) matrix.  lhs row k of a sample holds image rows
    # 2k..2k+3 concatenated; output cols [0, 832) are conv1 row 2k
    # (lane = x*32 + c), cols [896, 1728) are conv1 row 2k+1 (128-aligned halves).
    W1 = np.zeros((_KIN, _N1), np.float32)
    for dy in range(3):
        for dx in range(3):
            for xo in range(_H1):
                W1[28 * dy + xo + dx, xo * _C1:(xo + 1) * _C1] = w1[:, 0, dy, dx]
                W1[28 * (dy + 1) + xo + dx,
                   _ODD + xo * _C1:_ODD + (xo + 1) * _C1] = w1[:, 0, dy, dx]
    b1row = np.tile(b1, _H1).reshape(1, _L1)

    # conv2 as one (800, 384) matrix: the three dy bands side by side.  Input
    # lanes are 64*x_in + c_in (lanes with lane%64 >= 32 are pooling
    # by-products -> zero rows); band dy occupies cols 128*dy + x_out*10 + c_out.
    W2 = np.zeros((_LP, 3 * _L2P), np.float32)
    for dy in range(3):
        for dx in range(3):
            for xo in range(_H2):
                xi = xo + dx
                W2[64 * xi:64 * xi + _C1,
                   _L2P * dy + xo * _C2:_L2P * dy + (xo + 1) * _C2] = \
                    w2[:, :, dy, dx].T
    b2row = np.zeros((1, _L2P), np.float32)
    b2row[0, :_L2] = np.tile(b2, _H2)

    # BatchNorm / Linear parameters in the padded (13*128) feature layout:
    # feature (r, l) with r < 11, l = x*10 + c < 110  <->  torch flatten index
    # c*121 + r*11 + x.  All pad positions (cols >= 110, pad rows 11/12) get
    # gamma = beta = weight = 0 so they never contribute to the logits.
    rr, xx, cc = np.meshgrid(np.arange(_H2), np.arange(_H2), np.arange(_C2),
                             indexing="ij")
    t_idx = (cc * (_H2 * _H2) + rr * _H2 + xx).reshape(-1)
    r_idx = rr.reshape(-1)
    l_idx = (xx * _C2 + cc).reshape(-1)
    g_pad = np.zeros((_HP, _L2P), np.float32)
    bt_pad = np.zeros((_HP, _L2P), np.float32)
    wl_pad = np.zeros((_HP, _L2P, _NPAD), np.float32)
    g_pad[r_idx, l_idx] = gamma[t_idx]
    bt_pad[r_idx, l_idx] = beta[t_idx]
    wl_pad[r_idx, l_idx, :_NCLS] = wl[:, t_idx].T
    bl_full = np.zeros((1, _NPAD), np.float32)
    bl_full[0, :_NCLS] = bl

    return {
        "w1": jnp.asarray(W1, jnp.bfloat16),
        "b1row": jnp.asarray(b1row),
        "w2": jnp.asarray(W2, jnp.bfloat16),
        "b2row": jnp.asarray(b2row),
        "gamma": jnp.asarray(g_pad.reshape(1, _F)),
        "beta": jnp.asarray(bt_pad.reshape(1, _F)),
        "wl": jnp.asarray(wl_pad.reshape(_F, _NPAD), jnp.bfloat16),
        "bl": jnp.asarray(bl_full),
    }


# --------------------------------------------------------------------------
# Forward pass
# --------------------------------------------------------------------------
def _pick_batch_tile(n, cap):
    """Largest multiple-of-8 divisor of n (<= cap), preferring >= 2 grid steps
    so the 'parallel' axis can shard across both v7x TensorCores; falls back
    to the whole batch (grid = 1, block = full array) otherwise."""
    cands = [t for t in range(cap, 0, -8) if n % t == 0]
    for t in cands:
        if n // t >= 2:
            return t
    return cands[0] if cands else n


def forward(x, pp):
    n = x.shape[0]
    tb_a = _pick_batch_tile(n, 64)        # feature-kernel batch tile
    tb_c = _pick_batch_tile(n, 512)       # BN + linear batch tile
    n_tiles = n // tb_a
    rows_tile = tb_a * _HP

    # Wrapper packing: slab row (b, k) = image rows 2k..2k+3 of sample b.
    # This folds the conv1 dy bands (and the y-pool pair) into the contraction
    # so the kernel needs exactly one conv1 dot per tile.
    xs = x.reshape(n, _H, _H)
    slab = jnp.concatenate(
        [xs[:, 0:25:2, :], xs[:, 1:26:2, :], xs[:, 2:27:2, :], xs[:, 3:28:2, :]],
        axis=-1).reshape(n * _HP, _KIN)

    # One-hot selector that sums the tile's samples (trace-time constant).
    sel_np = np.zeros((_HP, rows_tile), np.float32)
    sel_np[np.arange(rows_tile) % _HP, np.arange(rows_tile)] = 1.0
    sel = jnp.asarray(sel_np)

    flops_a = 2 * n * _HP * (_KIN * _N1 + _LP * 3 * _L2P + 2 * _HP * _L2P)
    bytes_a = (4 * n * _HP * (_KIN + _L2P)
               + 2 * (_KIN * _N1 + _LP * 3 * _L2P)
               + 4 * (n_tiles * 2 * _HP * _L2P + _HP * rows_tile + _L1 + _L2P))
    feats, psums = pl.pallas_call(
        _feature_kernel,
        out_shape=(jax.ShapeDtypeStruct((n * _HP, _L2P), jnp.float32),
                   jax.ShapeDtypeStruct((n_tiles, 2 * _HP, _L2P), jnp.float32)),
        grid=(n_tiles,),
        in_specs=[
            pl.BlockSpec((rows_tile, _KIN), lambda i: (i, 0)),
            pl.BlockSpec((_KIN, _N1), lambda i: (0, 0)),
            pl.BlockSpec((1, _L1), lambda i: (0, 0)),
            pl.BlockSpec((_LP, 3 * _L2P), lambda i: (0, 0)),
            pl.BlockSpec((1, _L2P), lambda i: (0, 0)),
            pl.BlockSpec((_HP, rows_tile), lambda i: (0, 0)),
        ],
        out_specs=(pl.BlockSpec((rows_tile, _L2P), lambda i: (i, 0)),
                   pl.BlockSpec((1, 2 * _HP, _L2P), lambda i: (i, 0, 0))),
        compiler_params=pltpu.CompilerParams(
            dimension_semantics=("parallel",),
            vmem_limit_bytes=32 * 1024 * 1024),
        cost_estimate=pl.CostEstimate(
            flops=flops_a, transcendentals=0, bytes_accessed=bytes_a),
    )(slab, pp["w1"], pp["b1row"], pp["w2"], pp["b2row"], sel)

    # Finalize BatchNorm statistics (training-mode batch stats, biased var,
    # all in f32) and fold them into per-column scale/shift once per call.
    tot = jnp.sum(psums, axis=0)                               # (26, 128)
    mean = tot[0:_HP].reshape(1, _F) / n
    var = jnp.maximum(tot[_HP:2 * _HP].reshape(1, _F) / n - mean * mean, 0.0)
    scale = pp["gamma"] * jax.lax.rsqrt(var + _EPS)
    shift = pp["beta"] - mean * scale

    f2 = feats.reshape(n, _F)                                  # contiguous, free

    logits = pl.pallas_call(
        _bn_linear_kernel,
        out_shape=jax.ShapeDtypeStruct((n, _NPAD), jnp.float32),
        grid=(n // tb_c,),
        in_specs=[
            pl.BlockSpec((tb_c, _F), lambda i: (i, 0)),
            pl.BlockSpec((1, _F), lambda i: (0, 0)),
            pl.BlockSpec((1, _F), lambda i: (0, 0)),
            pl.BlockSpec((_F, _NPAD), lambda i: (0, 0)),
            pl.BlockSpec((1, _NPAD), lambda i: (0, 0)),
        ],
        out_specs=pl.BlockSpec((tb_c, _NPAD), lambda i: (i, 0)),
        compiler_params=pltpu.CompilerParams(
            dimension_semantics=("parallel",),
            vmem_limit_bytes=32 * 1024 * 1024),
        cost_estimate=pl.CostEstimate(
            flops=2 * n * _F * _NPAD + 2 * n * _F,
            transcendentals=0,
            bytes_accessed=4 * (n * _F + n * _NPAD + 3 * _F) + 2 * _F * _NPAD),
    )(f2, scale, shift, pp["wl"], pp["bl"])

    return logits[:, :_NCLS]                                   # (n, 10)


if __name__ == "__main__":
    key = jax.random.PRNGKey(0)
    k_param, k_x = jax.random.split(key)
    params = init_params(k_param)
    prepped = prepare_params(params)

    x = jax.random.normal(k_x, (16, 1, 28, 28), jnp.float32)   # MNIST-shaped input

    out = jax.jit(forward)(x, prepped)
    out = jax.block_until_ready(out)
    assert out.shape == (16, 10) and out.dtype == jnp.float32
    assert bool(jnp.all(jnp.isfinite(out)))
    print("KERNEL_OK")
</pallas_src>

<mosaic_0001>
module attributes {stable_mosaic.version = 11 : i64} {
  func.func @_feature_kernel(%arg0: i32, %arg1: memref<104x112xf32, #tpu.memory_space<vmem>>, %arg2: memref<112x1728xbf16, #tpu.memory_space<vmem>>, %arg3: memref<1x832xf32, #tpu.memory_space<vmem>>, %arg4: memref<800x384xbf16, #tpu.memory_space<vmem>>, %arg5: memref<1x128xf32, #tpu.memory_space<vmem>>, %arg6: memref<13x104xf32, #tpu.memory_space<vmem>>, %arg7: memref<104x128xf32, #tpu.memory_space<vmem>>, %arg8: memref<1x26x128xf32, #tpu.memory_space<vmem>>) attributes {dimension_semantics = [#tpu.dimension_semantics<parallel>], iteration_bounds = array<i64: 2>, scalar_prefetch = 0 : i64, scratch_operands = 0 : i64, tpu.core_type = #tpu.core_type<tc>, window_params = [{transform_indices = @transform_0, window_bounds = array<i64: 104, 112>}, {pipeline_mode = #tpu.pipeline_mode<synchronous>, transform_indices = @transform_1, window_bounds = array<i64: 112, 1728>}, {pipeline_mode = #tpu.pipeline_mode<synchronous>, transform_indices = @transform_2, window_bounds = array<i64: 1, 832>}, {pipeline_mode = #tpu.pipeline_mode<synchronous>, transform_indices = @transform_3, window_bounds = array<i64: 800, 384>}, {pipeline_mode = #tpu.pipeline_mode<synchronous>, transform_indices = @transform_4, window_bounds = array<i64: 1, 128>}, {pipeline_mode = #tpu.pipeline_mode<synchronous>, transform_indices = @transform_5, window_bounds = array<i64: 13, 104>}, {transform_indices = @transform_6, window_bounds = array<i64: 104, 128>}, {transform_indices = @transform_7, window_bounds = array<i64: 1, 26, 128>}]} {
    %c0 = arith.constant 0 : index
    %c0_0 = arith.constant 0 : index
    %0 = vector.load %arg1[%c0, %c0_0] : memref<104x112xf32, #tpu.memory_space<vmem>>, vector<104x112xf32>
    %1 = arith.truncf %0 : vector<104x112xf32> to vector<104x112xbf16>
    %c0_1 = arith.constant 0 : index
    %c0_2 = arith.constant 0 : index
    %2 = vector.load %arg2[%c0_1, %c0_2] : memref<112x1728xbf16, #tpu.memory_space<vmem>>, vector<112x1728xbf16>
    %cst = arith.constant dense<0.000000e+00> : vector<104x1728xf32>
    %3 = tpu.matmul %1, %2, %cst {dimension_numbers = #tpu.dot_dimension_numbers<[1], [0], [0], [1], [0, 0, 1, 1], [], []>} : vector<104x112xbf16>, vector<112x1728xbf16>, vector<104x1728xf32> -> vector<104x1728xf32>
    %4 = vector.extract_strided_slice %3 {offsets = [0, 0], sizes = [104, 832], strides = [1, 1]} : vector<104x1728xf32> to vector<104x832xf32>
    %5 = vector.extract_strided_slice %3 {offsets = [0, 896], sizes = [104, 832], strides = [1, 1]} : vector<104x1728xf32> to vector<104x832xf32>
    %6 = arith.maximumf %4, %5 : vector<104x832xf32>
    %c0_3 = arith.constant 0 : index
    %c0_4 = arith.constant 0 : index
    %7 = vector.load %arg3[%c0_3, %c0_4] : memref<1x832xf32, #tpu.memory_space<vmem>>, vector<1x832xf32>
    %8 = vector.broadcast %7 : vector<1x832xf32> to vector<104x832xf32>
    %9 = arith.addf %6, %8 : vector<104x832xf32>
    %cst_5 = arith.constant 0.000000e+00 : f32
    %10 = vector.broadcast %cst_5 : f32 to vector<104x832xf32>
    %11 = arith.maximumf %9, %10 : vector<104x832xf32>
    %12 = vector.extract_strided_slice %11 {offsets = [0, 0], sizes = [104, 800], strides = [1, 1]} : vector<104x832xf32> to vector<104x800xf32>
    %13 = vector.extract_strided_slice %11 {offsets = [0, 32], sizes = [104, 800], strides = [1, 1]} : vector<104x832xf32> to vector<104x800xf32>
    %14 = arith.maximumf %12, %13 : vector<104x800xf32>
    %15 = arith.truncf %14 : vector<104x800xf32> to vector<104x800xbf16>
    %c0_6 = arith.constant 0 : index
    %c0_7 = arith.constant 0 : index
    %16 = vector.load %arg4[%c0_6, %c0_7] : memref<800x384xbf16, #tpu.memory_space<vmem>>, vector<800x384xbf16>
    %cst_8 = arith.constant dense<0.000000e+00> : vector<104x384xf32>
    %17 = tpu.matmul %15, %16, %cst_8 {dimension_numbers = #tpu.dot_dimension_numbers<[1], [0], [0], [1], [0, 0, 1, 1], [], []>} : vector<104x800xbf16>, vector<800x384xbf16>, vector<104x384xf32> -> vector<104x384xf32>
    %18 = vector.extract_strided_slice %17 {offsets = [0, 0], sizes = [104, 128], strides = [1, 1]} : vector<104x384xf32> to vector<104x128xf32>
    %19 = vector.extract_strided_slice %17 {offsets = [0, 128], sizes = [104, 128], strides = [1, 1]} : vector<104x384xf32> to vector<104x128xf32>
    %c103_i32 = arith.constant 103 : i32
    %20 = tpu.dynamic_rotate %19 by %c103_i32 dim 0 : vector<104x128xf32>, i32 -> vector<104x128xf32>
    %21 = arith.addf %18, %20 : vector<104x128xf32>
    %22 = vector.extract_strided_slice %17 {offsets = [0, 256], sizes = [104, 128], strides = [1, 1]} : vector<104x384xf32> to vector<104x128xf32>
    %c102_i32 = arith.constant 102 : i32
    %23 = tpu.dynamic_rotate %22 by %c102_i32 dim 0 : vector<104x128xf32>, i32 -> vector<104x128xf32>
    %24 = arith.addf %21, %23 : vector<104x128xf32>
    %c0_9 = arith.constant 0 : index
    %c0_10 = arith.constant 0 : index
    %25 = vector.load %arg5[%c0_9, %c0_10] : memref<1x128xf32, #tpu.memory_space<vmem>>, vector<1x128xf32>
    %26 = vector.broadcast %25 : vector<1x128xf32> to vector<104x128xf32>
    %27 = arith.addf %24, %26 : vector<104x128xf32>
    %cst_11 = arith.constant 0.000000e+00 : f32
    %28 = vector.broadcast %cst_11 : f32 to vector<104x128xf32>
    %29 = arith.maximumf %27, %28 : vector<104x128xf32>
    %c0_12 = arith.constant 0 : index
    %c0_13 = arith.constant 0 : index
    %30 = vector.load %arg7[%c0_12, %c0_13] : memref<104x128xf32, #tpu.memory_space<vmem>>, vector<104x128xf32>
    tpu.vector_store %arg7[%c0_12, %c0_13], %29 {strides = array<i32>} : memref<104x128xf32, #tpu.memory_space<vmem>>, vector<104x128xf32>,
    %c0_14 = arith.constant 0 : index
    %c0_15 = arith.constant 0 : index
    %31 = vector.load %arg6[%c0_14, %c0_15] : memref<13x104xf32, #tpu.memory_space<vmem>>, vector<13x104xf32>
    %cst_16 = arith.constant dense<0.000000e+00> : vector<13x128xf32>
    %32 = tpu.matmul %31, %29, %cst_16 {dimension_numbers = #tpu.dot_dimension_numbers<[1], [0], [0], [1], [0, 0, 1, 1], [], []>} : vector<13x104xf32>, vector<104x128xf32>, vector<13x128xf32> -> vector<13x128xf32>
    %c0_17 = arith.constant 0 : index
    %c0_18 = arith.constant 0 : index
    %c0_19 = arith.constant 0 : index
    %33 = vector.load %arg8[%c0_17, %c0_18, %c0_19] : memref<1x26x128xf32, #tpu.memory_space<vmem>>, vector<1x13x128xf32>
    %34 = vector.shape_cast %33 : vector<1x13x128xf32> to vector<13x128xf32>
    %35 = vector.shape_cast %32 : vector<13x128xf32> to vector<1x13x128xf32>
    tpu.vector_store %arg8[%c0_17, %c0_18, %c0_19], %35 {strides = array<i32>} : memref<1x26x128xf32, #tpu.memory_space<vmem>>, vector<1x13x128xf32>,
    %36 = arith.mulf %29, %29 : vector<104x128xf32>
    %cst_20 = arith.constant dense<0.000000e+00> : vector<13x128xf32>
    %37 = tpu.matmul %31, %36, %cst_20 {dimension_numbers = #tpu.dot_dimension_numbers<[1], [0], [0], [1], [0, 0, 1, 1], [], []>} : vector<13x104xf32>, vector<104x128xf32>, vector<13x128xf32> -> vector<13x128xf32>
    %c0_21 = arith.constant 0 : index
    %c13 = arith.constant 13 : index
    %c0_22 = arith.constant 0 : index
    %38 = vector.load %arg8[%c0_21, %c13, %c0_22] : memref<1x26x128xf32, #tpu.memory_space<vmem>>, vector<1x13x128xf32>
    %39 = vector.shape_cast %38 : vector<1x13x128xf32> to vector<13x128xf32>
    %40 = vector.shape_cast %37 : vector<13x128xf32> to vector<1x13x128xf32>
    tpu.vector_store %arg8[%c0_21, %c13, %c0_22], %40 {strides = array<i32>} : memref<1x26x128xf32, #tpu.memory_space<vmem>>, vector<1x13x128xf32>,
    return
  }
  func.func @transform_0(%arg0: i32) -> (i32, i32) {
    %c0_i32 = arith.constant 0 : i32
    %c0_i32_0 = arith.constant 0 : i32
    return %arg0, %c0_i32 : i32, i32
  }
  func.func @transform_1(%arg0: i32) -> (i32, i32) {
    %c0_i32 = arith.constant 0 : i32
    %c0_i32_0 = arith.constant 0 : i32
    %c0_i32_1 = arith.constant 0 : i32
    return %c0_i32, %c0_i32_0 : i32, i32
  }
  func.func @transform_2(%arg0: i32) -> (i32, i32) {
    %c0_i32 = arith.constant 0 : i32
    %c0_i32_0 = arith.constant 0 : i32
    %c0_i32_1 = arith.constant 0 : i32
    return %c0_i32, %c0_i32_0 : i32, i32
  }
  func.func @transform_3(%arg0: i32) -> (i32, i32) {
    %c0_i32 = arith.constant 0 : i32
    %c0_i32_0 = arith.constant 0 : i32
    %c0_i32_1 = arith.constant 0 : i32
    return %c0_i32, %c0_i32_0 : i32, i32
  }
  func.func @transform_4(%arg0: i32) -> (i32, i32) {
    %c0_i32 = arith.constant 0 : i32
    %c0_i32_0 = arith.constant 0 : i32
    %c0_i32_1 = arith.constant 0 : i32
    return %c0_i32, %c0_i32_0 : i32, i32
  }
  func.func @transform_5(%arg0: i32) -> (i32, i32) {
    %c0_i32 = arith.constant 0 : i32
    %c0_i32_0 = arith.constant 0 : i32
    %c0_i32_1 = arith.constant 0 : i32
    return %c0_i32, %c0_i32_0 : i32, i32
  }
  func.func @transform_6(%arg0: i32) -> (i32, i32) {
    %c0_i32 = arith.constant 0 : i32
    %c0_i32_0 = arith.constant 0 : i32
    return %arg0, %c0_i32 : i32, i32
  }
  func.func @transform_7(%arg0: i32) -> (i32, i32, i32) {
    %c0_i32 = arith.constant 0 : i32
    %c0_i32_0 = arith.constant 0 : i32
    %c0_i32_1 = arith.constant 0 : i32
    return %arg0, %c0_i32, %c0_i32_0 : i32, i32, i32
  }
}

module attributes {stable_mosaic.version = 11 : i64} {
  func.func @_bn_linear_kernel(%arg0: i32, %arg1: memref<8x1664xf32, #tpu.memory_space<vmem>>, %arg2: memref<1x1664xf32, #tpu.memory_space<vmem>>, %arg3: memref<1x1664xf32, #tpu.memory_space<vmem>>, %arg4: memref<1664x128xbf16, #tpu.memory_space<vmem>>, %arg5: memref<1x128xf32, #tpu.memory_space<vmem>>, %arg6: memref<8x128xf32, #tpu.memory_space<vmem>>) attributes {dimension_semantics = [#tpu.dimension_semantics<parallel>], iteration_bounds = array<i64: 2>, scalar_prefetch = 0 : i64, scratch_operands = 0 : i64, tpu.core_type = #tpu.core_type<tc>, window_params = [{transform_indices = @transform_0, window_bounds = array<i64: 8, 1664>}, {pipeline_mode = #tpu.pipeline_mode<synchronous>, transform_indices = @transform_1, window_bounds = array<i64: 1, 1664>}, {pipeline_mode = #tpu.pipeline_mode<synchronous>, transform_indices = @transform_2, window_bounds = array<i64: 1, 1664>}, {pipeline_mode = #tpu.pipeline_mode<synchronous>, transform_indices = @transform_3, window_bounds = array<i64: 1664, 128>}, {pipeline_mode = #tpu.pipeline_mode<synchronous>, transform_indices = @transform_4, window_bounds = array<i64: 1, 128>}, {transform_indices = @transform_5, window_bounds = array<i64: 8, 128>}]} {
    %c0 = arith.constant 0 : index
    %c0_0 = arith.constant 0 : index
    %0 = vector.load %arg1[%c0, %c0_0] : memref<8x1664xf32, #tpu.memory_space<vmem>>, vector<8x1664xf32>
    %c0_1 = arith.constant 0 : index
    %c0_2 = arith.constant 0 : index
    %1 = vector.load %arg2[%c0_1, %c0_2] : memref<1x1664xf32, #tpu.memory_space<vmem>>, vector<1x1664xf32>
    %2 = vector.broadcast %1 : vector<1x1664xf32> to vector<8x1664xf32>
    %3 = arith.mulf %0, %2 : vector<8x1664xf32>
    %c0_3 = arith.constant 0 : index
    %c0_4 = arith.constant 0 : index
    %4 = vector.load %arg3[%c0_3, %c0_4] : memref<1x1664xf32, #tpu.memory_space<vmem>>, vector<1x1664xf32>
    %5 = vector.broadcast %4 : vector<1x1664xf32> to vector<8x1664xf32>
    %6 = arith.addf %3, %5 : vector<8x1664xf32>
    %7 = arith.truncf %6 : vector<8x1664xf32> to vector<8x1664xbf16>
    %c0_5 = arith.constant 0 : index
    %c0_6 = arith.constant 0 : index
    %8 = vector.load %arg4[%c0_5, %c0_6] : memref<1664x128xbf16, #tpu.memory_space<vmem>>, vector<1664x128xbf16>
    %cst = arith.constant dense<0.000000e+00> : vector<8x128xf32>
    %9 = tpu.matmul %7, %8, %cst {dimension_numbers = #tpu.dot_dimension_numbers<[1], [0], [0], [1], [0, 0, 1, 1], [], []>} : vector<8x1664xbf16>, vector<1664x128xbf16>, vector<8x128xf32> -> vector<8x128xf32>
    %c0_7 = arith.constant 0 : index
    %c0_8 = arith.constant 0 : index
    %10 = vector.load %arg5[%c0_7, %c0_8] : memref<1x128xf32, #tpu.memory_space<vmem>>, vector<1x128xf32>
    %11 = vector.broadcast %10 : vector<1x128xf32> to vector<8x128xf32>
    %12 = arith.addf %9, %11 : vector<8x128xf32>
    %c0_9 = arith.constant 0 : index
    %c0_10 = arith.constant 0 : index
    %13 = vector.load %arg6[%c0_9, %c0_10] : memref<8x128xf32, #tpu.memory_space<vmem>>, vector<8x128xf32>
    tpu.vector_store %arg6[%c0_9, %c0_10], %12 {strides = array<i32>} : memref<8x128xf32, #tpu.memory_space<vmem>>, vector<8x128xf32>,
    return
  }
  func.func @transform_0(%arg0: i32) -> (i32, i32) {
    %c0_i32 = arith.constant 0 : i32
    %c0_i32_0 = arith.constant 0 : i32
    return %arg0, %c0_i32 : i32, i32
  }
  func.func @transform_1(%arg0: i32) -> (i32, i32) {
    %c0_i32 = arith.constant 0 : i32
    %c0_i32_0 = arith.constant 0 : i32
    %c0_i32_1 = arith.constant 0 : i32
    return %c0_i32, %c0_i32_0 : i32, i32
  }
  func.func @transform_2(%arg0: i32) -> (i32, i32) {
    %c0_i32 = arith.constant 0 : i32
    %c0_i32_0 = arith.constant 0 : i32
    %c0_i32_1 = arith.constant 0 : i32
    return %c0_i32, %c0_i32_0 : i32, i32
  }
  func.func @transform_3(%arg0: i32) -> (i32, i32) {
    %c0_i32 = arith.constant 0 : i32
    %c0_i32_0 = arith.constant 0 : i32
    %c0_i32_1 = arith.constant 0 : i32
    return %c0_i32, %c0_i32_0 : i32, i32
  }
  func.func @transform_4(%arg0: i32) -> (i32, i32) {
    %c0_i32 = arith.constant 0 : i32
    %c0_i32_0 = arith.constant 0 : i32
    %c0_i32_1 = arith.constant 0 : i32
    return %c0_i32, %c0_i32_0 : i32, i32
  }
  func.func @transform_5(%arg0: i32) -> (i32, i32) {
    %c0_i32 = arith.constant 0 : i32
    %c0_i32_0 = arith.constant 0 : i32
    return %arg0, %c0_i32 : i32, i32
  }
}

</mosaic_0001>

<bundles_post_ra>
// kernel: forward.3
= control target key start
LH: loop header
LB: loop body
LE: loop exit
PB: predicated region body
PF: predicated region fallthrough
CT: control target
= control target key end

     0   :  { %10 = vsyncpa [#allocation3], 0  ;;  %s2542_s0 = inlined_call_operand.vmem [shape: f32[16,1664], index: 0, kind: input, shape index: {}]   ;;  %s2543_s1 = inlined_call_operand.vmem [shape: f32[1,1664], index: 1, kind: input, shape index: {}]   ;;  %s2544_s2 = inlined_call_operand.vmem [shape: f32[1,1664], index: 2, kind: input, shape index: {}]   ;;  %s2545_s3 = inlined_call_operand.vmem [shape: bf16[1664,128], index: 3, kind: input, shape index: {}]   ;;  %s2546_s4 = inlined_call_operand.vmem [shape: f32[1,128], index: 4, kind: input, shape index: {}]   ;;  %s2547_s5 = inlined_call_operand.hbm [shape: f32[16,128], index: 5, kind: output, shape index: {}]  }
   0x1   :  { %12 = vsyncpa [#allocation3 + $0x1], 0  ;;  %s2081_s18 = smov 0   ;;  %s2083_s19 = smov 0  }
   0x2   :  { %s2085_s20 = smov 0   ;;  %s2087_s21 = smov 0  }
   0x3 LB: > { %s2102_s22 = sadd.s32 4294967295, %s2049_s21   ;;  %s1416_s23 = sadd.s32 4294967294, %s2049_s21   ;;  %s2049_s21 = sphi %s2087_s21, %s2553_s21   ;;  %s2045_s20 = sphi %s2085_s20, %s2552_s20   ;;  %s2041_s19 = sphi %s2083_s19, %s2551_s19   ;;  %s2037_s18 = sphi %s2081_s18, %s2550_s18  }
   0x4   : > { %s2106_s24 = sadd.s32 1, %s2049_s21   ;;  %s135_s25 = sadd.s32 1, %s2045_s20 }
   0x5   : > { %s132_s26 = ssub.s32 %s2049_s21, %s2106_s24  ;;  %p145_p0 = scmp.ne.s32.totalorder %s2045_s20, %s2041_s19 }
   0x6   : > { %p133_p1 = scmp.eq.s32.totalorder %s132_s26, 0  ;;  %p146_p2 = scmp.eq.s32.totalorder %s2102_s22, 1 }
   0x7   : > { %p151_p3 = scmp.ne.s32.totalorder %s2041_s19, %s2037_s18  ;;  %p152_p4 = scmp.eq.s32.totalorder %s1416_s23, 1 }
   0x8   : > { %s2117_s27 = scalar_select %p133_p1, %s2045_s20, %s135_s25  }
   0x9   : > { %p2119_p5 = por %p146_p2, %p145_p0  ;;  %p2123_p6 = por %p152_p4, %p151_p3 }
   0xa   : > { %p1419_p7 = scmp.ge.s32.totalorder %s2049_s21, 1  ;;  %p190_p8 = scmp.lt.s32.totalorder %s2049_s21, 3 }
   0xc   : > { %p191_p9 = pnand %p1419_p7, %p190_p8 }
   0xd   : > { %p218_p10 = scmp.lt.s32.totalorder (!%p191_p9), %s2102_s22, 1  ;;  %s215_s15 = sand.u32 (!%p191_p9), 1, %s2041_s19  }
   0xe   : > { %194 = sbr.rel (%p191_p9) target bundleno = 281 (0x119), region = 40  ;;  %s1420_s16 = sshll.u32 (!%p191_p9), %s215_s15, 3 }
   0xf   : > { %s217_s30 = scalar_lea.vmem (!%p191_p9), [#allocation2], %s1420_s16  ;;  %s2007_s12 = scalar_lea.hbm (!%p191_p9), %s2547_s5, 16 }
  0x10   : > { %s1354_s7 = sshll.u32 (!%p191_p9), %s217_s30, 4  ;;  %s1355_s7 = int_to_ptr.vmem [resolvable:$true] %s1354_s7 }
  0x13   : > { %v1849_v0 = vld [vmem:[%s2545_s3 + $0x38] sm:$0xff]  ;;  %v1848_v4 = vld [vmem:[%s2545_s3 + $0x30] sm:$0xff]  ;;  %v1847_v8 = vld [vmem:[%s2545_s3 + $0x28] sm:$0xff]  ;;  %s219_s13 = scalar_select %p218_p10, %s2102_s22, 1 }
  0x14   : > { %v1865_v1 = vld [vmem:[%s2545_s3 + $0xb8] sm:$0xff]  ;;  %1171 = vmatpush.bf16.msra.mxu0 %v1849_v0  ;;  %v1864_v5 = vld [vmem:[%s2545_s3 + $0xb0] sm:$0xff]  ;;  %v1863_v9 = vld [vmem:[%s2545_s3 + $0xa8] sm:$0xff] }
  0x15   : > { %v1857_v2 = vld [vmem:[%s2545_s3 + $0x78] sm:$0xff]  ;;  %1197 = vmatpush.bf16.msra.mxu2 %v1865_v1  ;;  %v1856_v6 = vld [vmem:[%s2545_s3 + $0x70] sm:$0xff]  ;;  %v1855_v10 = vld [vmem:[%s2545_s3 + $0x68] sm:$0xff]  ;;  %s1946_s6 = smul.u32 104, %s219_s13  ;;  %s1839_s13 = sshll.u32 %s2102_s22, 3 }
  0x16   : > { %v1873_v3 = vld [vmem:[%s2545_s3 + $0xf8] sm:$0xff]  ;;  %1184 = vmatpush.bf16.msra.mxu1 %v1857_v2  ;;  %v1872_v7 = vld [vmem:[%s2545_s3 + $0xf0] sm:$0xff]  ;;  %v1871_v11 = vld [vmem:[%s2545_s3 + $0xe8] sm:$0xff]  ;;  %s1352_s26 = scalar_lea.hbm %s2547_s5, %s1839_s13 }
  0x17   : > { %1210 = vmatpush.bf16.msra.mxu3 %v1873_v3  ;;  %v1846_v12 = vld [vmem:[%s2545_s3 + $0x20] sm:$0xff]  ;;  %v1845_v16 = vld [vmem:[%s2545_s3 + $0x18] sm:$0xff]  ;;  %s2194_s17 = scalar_lea.vmem %s2542_s0, %s1946_s6  ;;  %v1844_v20 = vld [vmem:[%s2545_s3 + $0x10] sm:$0xff]  ;;  %s1356_s8 = sshll.u32 %s1352_s26, 4  ;;  %s1357_s8 = int_to_ptr.hbm [resolvable:$true] %s1356_s8 }
  0x18   : > { %1172 = vmatpush.bf16.msra.mxu0 %v1848_v4  ;;  %v1862_v13 = vld [vmem:[%s2545_s3 + $0xa0] sm:$0xff]  ;;  %v1861_v17 = vld [vmem:[%s2545_s3 + $0x98] sm:$0xff]  ;;  %v1860_v22 = vld [vmem:[%s2545_s3 + $0x90] sm:$0xff]  ;;  %s1342_s6 = scalar_lea.sflag [#allocation3], %s215_s15  ;;  %s2001_s9 = sshra.s32 %s1357_s8, 4  ;;  %s2002_s9 = int_to_ptr.hbm [resolvable:$true] %s2001_s9 }
  0x19   : > { %1198 = vmatpush.bf16.msra.mxu2 %v1864_v5  ;;  %v1854_v14 = vld [vmem:[%s2545_s3 + $0x60] sm:$0xff]  ;;  %v1853_v18 = vld [vmem:[%s2545_s3 + $0x58] sm:$0xff]  ;;  %v1852_v23 = vld [vmem:[%s2545_s3 + $0x50] sm:$0xff]  ;;  %s2003_s22 = scalar_lea.hbm %s2002_s9, 8  ;;  %p2008_p0 = scmp.lt.s32.totalorder %s2002_s9, %s2547_s5 }
  0x1a   : > { %1185 = vmatpush.bf16.msra.mxu1 %v1856_v6  ;;  %v1870_v15 = vld [vmem:[%s2545_s3 + $0xe0] sm:$0xff]  ;;  %v1869_v19 = vld [vmem:[%s2545_s3 + $0xd8] sm:$0xff]  ;;  %v1868_v24 = vld [vmem:[%s2545_s3 + $0xd0] sm:$0xff]  ;;  %p2004_p11 = scmp.ne.s32.totalorder %s2002_s9, %s2003_s22  ;;  %p2009_p1 = scmp.lt.s32.totalorder %s2007_s12, %s2003_s22 }
  0x1b   : > { %1211 = vmatpush.bf16.msra.mxu3 %v1872_v7  ;;  %v2202_v21 = vld [vmem:[%s2543_s1] sm:$0xff]  ;;  %v225_v27 = vld [vmem:[%s2194_s17 + $0x10] sm:$0xff]  ;;  %v226_v32 = vld [vmem:[%s2194_s17 + $0x18] sm:$0xff] }
  0x1c   : > { %1173 = vmatpush.bf16.msra.mxu0 %v1847_v8  ;;  %v242_v25 = vperm.slane %v2202_v21, 2  ;;  %v240_v26 = vperm.slane %v2202_v21, 0  ;;  %v2219_v28 = vld [vmem:[%s2544_s2] sm:$0xff]  ;;  %v243_v30 = vperm.slane %v2202_v21, 3  ;;  %v241_v31 = vperm.slane %v2202_v21, 1  ;;  %v224_v33 = vld [vmem:[%s2194_s17 + $0x8] sm:$0xff]  ;;  %p2005_p12 = pnand %p2004_p11, %p2119_p5  ;;  %p2010_p2 = por %p2009_p1, %p2008_p0 }
  0x1d   : > { %1199 = vmatpush.bf16.msra.mxu2 %v1863_v9  ;;  %v223_v29 = vld [vmem:[%s2194_s17] sm:$0xff]  ;;  %v1843_v34 = vld [vmem:[%s2545_s3 + $0x8] sm:$0xff]  ;;  %v285_v37 = vperm.slane %v2219_v28, 2  ;;  %v283_v39 = vperm.slane %v2219_v28, 0  ;;  %v286_v43 = vperm.slane %v2219_v28, 3  ;;  %v284_v45 = vperm.slane %v2219_v28, 1 }
  0x1e   : > { %1186 = vmatpush.bf16.msra.mxu1 %v1855_v10  ;;  %v1859_v35 = vld [vmem:[%s2545_s3 + $0x88] sm:$0xff]  ;;  %v268_v36 = vmul.f32 %v242_v25, %v225_v27  ;;  %v266_v38 = vmul.f32 %v240_v26, %v223_v29  ;;  %v269_v42 = vmul.f32 %v243_v30, %v226_v32  ;;  %v267_v44 = vmul.f32 %v241_v31, %v224_v33  ;;  %v1842_v46 = vld [vmem:[%s2545_s3] sm:$0xff]  ;;  %v1881_v50 = vld [vmem:[%s2545_s3 + $0x138] sm:$0xff]  ;;  %p2006_p13 = pneg %p2005_p12 }
  0x1f   : > { %1212 = vmatpush.bf16.msra.mxu3 %v1871_v11  ;;  %v1851_v40 = vld [vmem:[%s2545_s3 + $0x48] sm:$0xff]  ;;  %v1858_v47 = vld [vmem:[%s2545_s3 + $0x80] sm:$0xff]  ;;  %v1897_v51 = vld [vmem:[%s2545_s3 + $0x1b8] sm:$0xff]  ;;  %v289_v31 = vperm.slane %v2219_v28, 6  ;;  %v287_v33 = vperm.slane %v2219_v28, 4 }
  0x20   : > { %1174 = vmatpush.bf16.msra.mxu0 %v1846_v12  ;;  %v1867_v41 = vld [vmem:[%s2545_s3 + $0xc8] sm:$0xff]  ;;  %v311_v48 = vadd.f32 %v285_v37, %v268_v36  ;;  %v309_v49 = vadd.f32 %v283_v39, %v266_v38  ;;  %v1850_v52 = vld [vmem:[%s2545_s3 + $0x40] sm:$0xff]  ;;  %v312_v54 = vadd.f32 %v286_v43, %v269_v42  ;;  %v310_v55 = vadd.f32 %v284_v45, %v267_v44  ;;  %v1889_v56 = vld [vmem:[%s2545_s3 + $0x178] sm:$0xff]  ;;  %p2011_p3 = pnand %p2010_p2, %p2006_p13 }
  0x21   : > { %1200 = vmatpush.bf16.msra.mxu2 %v1862_v13  ;;  %v1866_v53 = vld [vmem:[%s2545_s3 + $0xc0] sm:$0xff]  ;;  %v1905_v57 = vld [vmem:[%s2545_s3 + $0x1f8] sm:$0xff]  ;;  %v1880_v60 = vld [vmem:[%s2545_s3 + $0x130] sm:$0xff]  ;;  %v290_v36 = vperm.slane %v2219_v28, 7  ;;  %v288_v38 = vperm.slane %v2219_v28, 5 }
  0x22   : > { %1187 = vmatpush.bf16.msra.mxu1 %v1854_v14  ;;  %v324_v58 = vpack.c.bf16 %v311_v48, %v311_v48  ;;  %v322_v59 = vpack.c.bf16 %v309_v49, %v309_v49  ;;  %v1896_v61 = vld [vmem:[%s2545_s3 + $0x1b0] sm:$0xff]  ;;  %v325_v62 = vpack.c.bf16 %v312_v54, %v312_v54  ;;  %v323_v63 = vpack.c.bf16 %v310_v55, %v310_v55  ;;  %v1879_v2 = vld [vmem:[%s2545_s3 + $0x128] sm:$0xff]  ;;  %v1878_v6 = vld [vmem:[%s2545_s3 + $0x120] sm:$0xff] }
  0x23   : > { %1213 = vmatpush.bf16.msra.mxu3 %v1870_v15  ;;  %v1888_v0 = vld [vmem:[%s2545_s3 + $0x170] sm:$0xff]  ;;  %v1895_v3 = vld [vmem:[%s2545_s3 + $0x1a8] sm:$0xff]  ;;  %v1894_v7 = vld [vmem:[%s2545_s3 + $0x1a0] sm:$0xff] }
  0x24   : > { %1175 = vmatpush.bf16.msra.mxu0 %v1845_v16  ;;  %v1904_v1 = vld [vmem:[%s2545_s3 + $0x1f0] sm:$0xff]  ;;  %v1887_v4 = vld [vmem:[%s2545_s3 + $0x168] sm:$0xff]  ;;  %v1886_v8 = vld [vmem:[%s2545_s3 + $0x160] sm:$0xff]  ;;  %v246_v16 = vperm.slane %v2202_v21, 6 }
  0x25   : > { %1201 = vmatpush.bf16.msra.mxu2 %v1861_v17  ;;  %v1903_v5 = vld [vmem:[%s2545_s3 + $0x1e8] sm:$0xff]  ;;  %v1902_v9 = vld [vmem:[%s2545_s3 + $0x1e0] sm:$0xff]  ;;  %v1877_v10 = vld [vmem:[%s2545_s3 + $0x118] sm:$0xff]  ;;  %v244_v17 = vperm.slane %v2202_v21, 4 }
  0x26   : > { %1188 = vmatpush.bf16.msra.mxu1 %v1853_v18  ;;  %v1893_v11 = vld [vmem:[%s2545_s3 + $0x198] sm:$0xff]  ;;  %v1876_v14 = vld [vmem:[%s2545_s3 + $0x110] sm:$0xff]  ;;  %v228_v26 = vld [vmem:[%s2194_s17 + $0x28] sm:$0xff] }
  0x27   : > { %1214 = vmatpush.bf16.msra.mxu3 %v1869_v19  ;;  %v1885_v12 = vld [vmem:[%s2545_s3 + $0x158] sm:$0xff]  ;;  %v1892_v15 = vld [vmem:[%s2545_s3 + $0x190] sm:$0xff]  ;;  %v227_v19 = vld [vmem:[%s2194_s17 + $0x20] sm:$0xff] }
  0x28   : > { %1176 = vmatpush.bf16.msra.mxu0 %v1844_v20  ;;  %v1901_v13 = vld [vmem:[%s2545_s3 + $0x1d8] sm:$0xff]  ;;  %v229_v18 = vld [vmem:[%s2194_s17 + $0x30] sm:$0xff]  ;;  %v1875_v27 = vld [vmem:[%s2545_s3 + $0x108] sm:$0xff]  ;;  %v270_v32 = vmul.f32 %v244_v17, %v227_v19 }
  0x29   : > { %1202 = vmatpush.bf16.msra.mxu2 %v1860_v22  ;;  %v1884_v20 = vld [vmem:[%s2545_s3 + $0x150] sm:$0xff]  ;;  %v230_v25 = vld [vmem:[%s2194_s17 + $0x38] sm:$0xff]  ;;  %v1891_v29 = vld [vmem:[%s2545_s3 + $0x188] sm:$0xff]  ;;  %v272_v30 = vmul.f32 %v246_v16, %v229_v18 }
  0x2a   : > { %1189 = vmatpush.bf16.msra.mxu1 %v1852_v23  ;;  %v1900_v22 = vld [vmem:[%s2545_s3 + $0x1d0] sm:$0xff]  ;;  %v247_v23 = vperm.slane %v2202_v21, 7  ;;  %v1874_v39 = vld [vmem:[%s2545_s3 + $0x100] sm:$0xff]  ;;  %v313_v42 = vadd.f32 %v287_v33, %v270_v32  ;;  %v1913_v43 = vld [vmem:[%s2545_s3 + $0x238] sm:$0xff] }
  0x2b   : > { %1215 = vmatpush.bf16.msra.mxu3 %v1868_v24  ;;  %v245_v24 = vperm.slane %v2202_v21, 5  ;;  %v1883_v21 = vld [vmem:[%s2545_s3 + $0x148] sm:$0xff]  ;;  %v1929_v28 = vld [vmem:[%s2545_s3 + $0x2b8] sm:$0xff]  ;;  %v1882_v44 = vld [vmem:[%s2545_s3 + $0x140] sm:$0xff] }
  0x2c   : > { %1177 = vmatpush.bf16.msra.mxu0 %v1843_v34  ;;  %v1899_v34 = vld [vmem:[%s2545_s3 + $0x1c8] sm:$0xff]  ;;  %v1898_v45 = vld [vmem:[%s2545_s3 + $0x1c0] sm:$0xff]  ;;  %v1921_v48 = vld [vmem:[%s2545_s3 + $0x278] sm:$0xff] }
  0x2d   : > { %1203 = vmatpush.bf16.msra.mxu2 %v1859_v35  ;;  %v273_v35 = vmul.f32 %v247_v23, %v230_v25  ;;  %v271_v37 = vmul.f32 %v245_v24, %v228_v26  ;;  %v1937_v49 = vld [vmem:[%s2545_s3 + $0x2f8] sm:$0xff]  ;;  %v1932_v17 = vld [vmem:[%s2545_s3 + $0x2d0] sm:$0xff]  ;;  %v232_v18 = vld [vmem:[%s2194_s17 + $0x48] sm:$0xff] }
  0x2e   : > { %1190 = vmatpush.bf16.msra.mxu1 %v1851_v40  ;;  %v1890_v40 = vld [vmem:[%s2545_s3 + $0x180] sm:$0xff]  ;;  %v234_v19 = vld [vmem:[%s2194_s17 + $0x58] sm:$0xff]  ;;  %v1907_v25 = vld [vmem:[%s2545_s3 + $0x208] sm:$0xff] }
  0x2f   : > { %1216 = vmatpush.bf16.msra.mxu3 %v1867_v41  ;;  %v315_v41 = vadd.f32 %v289_v31, %v272_v30  ;;  %v1923_v26 = vld [vmem:[%s2545_s3 + $0x288] sm:$0xff] }
  0x30   : > { %1178 = vmatpush.bf16.msra.mxu0 %v1842_v46  ;;  %v316_v46 = vadd.f32 %v290_v36, %v273_v35  ;;  %v1915_v32 = vld [vmem:[%s2545_s3 + $0x248] sm:$0xff]  ;;  %v1906_v35 = vld [vmem:[%s2545_s3 + $0x200] sm:$0xff] }
  0x31   : > { %1204 = vmatpush.bf16.msra.mxu2 %v1858_v47  ;;  %v314_v47 = vadd.f32 %v288_v38, %v271_v37  ;;  %v1931_v33 = vld [vmem:[%s2545_s3 + $0x2c8] sm:$0xff]  ;;  %v1922_v36 = vld [vmem:[%s2545_s3 + $0x280] sm:$0xff]  ;;  %v1945_v37 = vld [vmem:[%s2545_s3 + $0x338] sm:$0xff] }
  0x32   : > { %1191 = vmatpush.bf16.msra.mxu1 %v1850_v52  ;;  %v1912_v52 = vld [vmem:[%s2545_s3 + $0x230] sm:$0xff]  ;;  %v329_v54 = vpack.c.bf16 %v316_v46, %v316_v46  ;;  %v1943_v46 = vld [vmem:[%s2545_s3 + $0x328] sm:$0xff] }
  0x33   : > { %1217 = vmatpush.bf16.msra.mxu3 %v1866_v53  ;;  %1179 = vmatmul.bf16.vlgmr.msra.gmra.mxu0 %v322_v59  ;;  %v1928_v53 = vld [vmem:[%s2545_s3 + $0x2b0] sm:$0xff]  ;;  %v327_v55 = vpack.c.bf16 %v314_v47, %v314_v47  ;;  %v1927_v59 = vld [vmem:[%s2545_s3 + $0x2a8] sm:$0xff]  ;;  %v1942_v47 = vld [vmem:[%s2545_s3 + $0x320] sm:$0xff] }
  0x34   : > { %1223 = vmatpush.bf16.msrb.mxu0 %v1881_v50  ;;  %1205 = vmatmul.bf16.vlgmr.msra.gmra.mxu2 %v324_v58  ;;  %v328_v50 = vpack.c.bf16 %v315_v41, %v315_v41  ;;  %v1911_v58 = vld [vmem:[%s2545_s3 + $0x228] sm:$0xff]  ;;  %v1930_v41 = vld [vmem:[%s2545_s3 + $0x2c0] sm:$0xff] }
  0x35   : > { %1249 = vmatpush.bf16.msrb.mxu2 %v1897_v51  ;;  %1192 = vmatmul.bf16.vlgmr.msra.gmra.mxu1 %v323_v63  ;;  %v326_v51 = vpack.c.bf16 %v313_v42, %v313_v42  ;;  %v1926_v63 = vld [vmem:[%s2545_s3 + $0x2a0] sm:$0xff] }
  0x36   : > { %1236 = vmatpush.bf16.msrb.mxu1 %v1889_v56  ;;  %1218 = vmatmul.bf16.vlgmr.msra.gmra.mxu3 %v325_v62  ;;  %v1920_v56 = vld [vmem:[%s2545_s3 + $0x270] sm:$0xff]  ;;  %v1910_v62 = vld [vmem:[%s2545_s3 + $0x220] sm:$0xff] }
  0x37   : > { %1262 = vmatpush.bf16.msrb.mxu3 %v1905_v57  ;;  %v1936_v57 = vld [vmem:[%s2545_s3 + $0x2f0] sm:$0xff] }
  0x38   : > { %1224 = vmatpush.bf16.msrb.mxu0 %v1880_v60  ;;  %v1919_v60 = vld [vmem:[%s2545_s3 + $0x268] sm:$0xff] }
  0x39   : > { %1250 = vmatpush.bf16.msrb.mxu2 %v1896_v61  ;;  %v1935_v61 = vld [vmem:[%s2545_s3 + $0x2e8] sm:$0xff] }
  0x3a   : > { %1237 = vmatpush.bf16.msrb.mxu1 %v1888_v0  ;;  %v1918_v0 = vld [vmem:[%s2545_s3 + $0x260] sm:$0xff] }
  0x3b   : > { %1263 = vmatpush.bf16.msrb.mxu3 %v1904_v1  ;;  %v1934_v1 = vld [vmem:[%s2545_s3 + $0x2e0] sm:$0xff] }
  0x3c   : > { %1225 = vmatpush.bf16.msrb.mxu0 %v1879_v2  ;;  %v1909_v2 = vld [vmem:[%s2545_s3 + $0x218] sm:$0xff] }
  0x3d   : > { %1251 = vmatpush.bf16.msrb.mxu2 %v1895_v3  ;;  %v1925_v3 = vld [vmem:[%s2545_s3 + $0x298] sm:$0xff] }
  0x3e   : > { %1238 = vmatpush.bf16.msrb.mxu1 %v1887_v4  ;;  %v2419_v4 = vld [vmem:[%s2543_s1 + $0x8] sm:$0x1f] }
  0x3f   : > { %1264 = vmatpush.bf16.msrb.mxu3 %v1903_v5  ;;  %v1917_v5 = vld [vmem:[%s2545_s3 + $0x258] sm:$0xff]  ;;  %v251_v16 = vperm.slane %v2419_v4, 3 }
  0x40   : > { %1226 = vmatpush.bf16.msrb.mxu0 %v1878_v6  ;;  %v1933_v6 = vld [vmem:[%s2545_s3 + $0x2d8] sm:$0xff] }
  0x41   : > { %1252 = vmatpush.bf16.msrb.mxu2 %v1894_v7  ;;  %v1908_v7 = vld [vmem:[%s2545_s3 + $0x210] sm:$0xff]  ;;  %v277_v30 = vmul.f32 %v251_v16, %v234_v19 }
  0x42   : > { %1239 = vmatpush.bf16.msrb.mxu1 %v1886_v8  ;;  %v1924_v8 = vld [vmem:[%s2545_s3 + $0x290] sm:$0xff] }
  0x43   : > { %1265 = vmatpush.bf16.msrb.mxu3 %v1902_v9  ;;  %v248_v9 = vperm.slane %v2419_v4, 0 }
  0x44   : > { %1227 = vmatpush.bf16.msrb.mxu0 %v1877_v10  ;;  %v250_v10 = vperm.slane %v2419_v4, 2 }
  0x45   : > { %1253 = vmatpush.bf16.msrb.mxu2 %v1893_v11  ;;  %v231_v11 = vld [vmem:[%s2194_s17 + $0x40] sm:$0xff] }
  0x46   : > { %1240 = vmatpush.bf16.msrb.mxu1 %v1885_v12  ;;  %v2439_v12 = vld [vmem:[%s2544_s2 + $0x8] sm:$0x1f] }
  0x47   : > { %1266 = vmatpush.bf16.msrb.mxu3 %v1901_v13  ;;  %v233_v13 = vld [vmem:[%s2194_s17 + $0x50] sm:$0xff]  ;;  %v293_v24 = vperm.slane %v2439_v12, 2  ;;  %v294_v31 = vperm.slane %v2439_v12, 3 }
  0x48   : > { %1228 = vmatpush.bf16.msrb.mxu0 %v1876_v14  ;;  %v1916_v14 = vld [vmem:[%s2545_s3 + $0x250] sm:$0xff]  ;;  %v276_v23 = vmul.f32 %v250_v10, %v233_v13 }
  0x49   : > { %1254 = vmatpush.bf16.msrb.mxu2 %v1892_v15  ;;  %v249_v15 = vperm.slane %v2419_v4, 1 }
  0x4a   : > { %1241 = vmatpush.bf16.msrb.mxu1 %v1884_v20  ;;  %v274_v20 = vmul.f32 %v248_v9, %v231_v11 }
  0x4b   : > { %1267 = vmatpush.bf16.msrb.mxu3 %v1900_v22  ;;  %v291_v22 = vperm.slane %v2439_v12, 0 }
  0x4c   : > { %1229 = vmatpush.bf16.msrb.mxu0 %v1875_v27  ;;  %v275_v27 = vmul.f32 %v249_v15, %v232_v18 }
  0x4d   : > { %1255 = vmatpush.bf16.msrb.mxu2 %v1891_v29  ;;  %v292_v29 = vperm.slane %v2439_v12, 1 }
  0x4e   : > { %1242 = vmatpush.bf16.msrb.mxu1 %v1883_v21  ;;  %v317_v21 = vadd.f32 %v291_v22, %v274_v20 }
  0x4f   : > { %1268 = vmatpush.bf16.msrb.mxu3 %v1899_v34  ;;  %v319_v34 = vadd.f32 %v293_v24, %v276_v23  ;;  %v318_v38 = vadd.f32 %v292_v29, %v275_v27 }
  0x50   : > { %1230 = vmatpush.bf16.msrb.mxu0 %v1874_v39  ;;  %v320_v39 = vadd.f32 %v294_v31, %v277_v30  ;;  %v330_v42 = vpack.c.bf16 %v317_v21, %v317_v21 }
  0x51   : > { %1256 = vmatpush.bf16.msrb.mxu2 %v1890_v40  ;;  %v1914_v40 = vld [vmem:[%s2545_s3 + $0x240] sm:$0xff] }
  0x52   : > { %1243 = vmatpush.bf16.msrb.mxu1 %v1882_v44  ;;  %v333_v44 = vpack.c.bf16 %v320_v39, %v320_v39 }
  0x53   : > { %1269 = vmatpush.bf16.msrb.mxu3 %v1898_v45  ;;  %1231 = vmatmul.bf16.vlgmr.msrb.gmra.mxu0 %v326_v51  ;;  %v1944_v45 = vld [vmem:[%s2545_s3 + $0x330] sm:$0xff]  ;;  %v235_v51 = vld [vmem:[%s2194_s17 + $0x60] sm:$0xff] }
  0x54   : > { %1275 = vmatpush.bf16.msra.mxu0 %v1913_v43  ;;  %1257 = vmatmul.bf16.vlgmr.msrb.gmra.mxu2 %v328_v50  ;;  %v332_v43 = vpack.c.bf16 %v319_v34, %v319_v34  ;;  %v1940_v50 = vld [vmem:[%s2545_s3 + $0x310] sm:$0xff] }
  0x55   : > { %1301 = vmatpush.bf16.msra.mxu2 %v1929_v28  ;;  %1244 = vmatmul.bf16.vlgmr.msrb.gmra.mxu1 %v327_v55  ;;  %v331_v28 = vpack.c.bf16 %v318_v38, %v318_v38 }
  0x56   : > { %1288 = vmatpush.bf16.msra.mxu1 %v1921_v48  ;;  %1270 = vmatmul.bf16.vlgmr.msrb.gmra.mxu3 %v329_v54  ;;  %v1941_v48 = vld [vmem:[%s2545_s3 + $0x318] sm:$0xff]  ;;  %v1939_v54 = vld [vmem:[%s2545_s3 + $0x308] sm:$0xff] }
  0x57   : > { %1314 = vmatpush.bf16.msra.mxu3 %v1937_v49  ;;  %v252_v49 = vperm.slane %v2419_v4, 4 }
  0x58   : > { %1276 = vmatpush.bf16.msra.mxu0 %v1912_v52 }
  0x59   : > { %1302 = vmatpush.bf16.msra.mxu2 %v1928_v53  ;;  %v278_v52 = vmul.f32 %v252_v49, %v235_v51  ;;  %v295_v53 = vperm.slane %v2439_v12, 4 }
  0x5a   : > { %1289 = vmatpush.bf16.msra.mxu1 %v1920_v56  ;;  %v1938_v56 = vld [vmem:[%s2545_s3 + $0x300] sm:$0xff] }
  0x5b   : > { %1315 = vmatpush.bf16.msra.mxu3 %v1936_v57  ;;  %v321_v55 = vadd.f32 %v295_v53, %v278_v52 }
  0x5c   : > { %1277 = vmatpush.bf16.msra.mxu0 %v1911_v58 }
  0x5d   : > { %1303 = vmatpush.bf16.msra.mxu2 %v1927_v59  ;;  %v334_v57 = vpack.c.bf16 %v321_v55, %v321_v55 }
  0x5e   : > { %1290 = vmatpush.bf16.msra.mxu1 %v1919_v60 }
  0x5f   : > { %1316 = vmatpush.bf16.msra.mxu3 %v1935_v61 }
  0x60   : > { %1278 = vmatpush.bf16.msra.mxu0 %v1910_v62 }
  0x61   : > { %1304 = vmatpush.bf16.msra.mxu2 %v1926_v63 }
  0x62   : > { %1291 = vmatpush.bf16.msra.mxu1 %v1918_v0 }
  0x63   : > { %1317 = vmatpush.bf16.msra.mxu3 %v1934_v1 }
  0x64   : > { %1279 = vmatpush.bf16.msra.mxu0 %v1909_v2 }
  0x65   : > { %1305 = vmatpush.bf16.msra.mxu2 %v1925_v3 }
  0x66   : > { %1292 = vmatpush.bf16.msra.mxu1 %v1917_v5 }
  0x67   : > { %1318 = vmatpush.bf16.msra.mxu3 %v1933_v6 }
  0x68   : > { %1280 = vmatpush.bf16.msra.mxu0 %v1908_v7 }
  0x69   : > { %1306 = vmatpush.bf16.msra.mxu2 %v1924_v8  ;;  %v1986_v8 = vld [vmem:[%s2546_s4] ss:$0 sm:$0xff] }
  0x6a   : > { %1293 = vmatpush.bf16.msra.mxu1 %v1916_v14 }
  0x6b   : > { %1319 = vmatpush.bf16.msra.mxu3 %v1932_v17 }
  0x6c   : > { %1281 = vmatpush.bf16.msra.mxu0 %v1907_v25 }
  0x6d   : > { %1307 = vmatpush.bf16.msra.mxu2 %v1923_v26 }
  0x6e   : > { %1294 = vmatpush.bf16.msra.mxu1 %v1915_v32 }
  0x6f   : > { %1320 = vmatpush.bf16.msra.mxu3 %v1931_v33 }
  0x70   : > { %1282 = vmatpush.bf16.msra.mxu0 %v1906_v35 }
  0x71   : > { %1308 = vmatpush.bf16.msra.mxu2 %v1922_v36 }
  0x72   : > { %1295 = vmatpush.bf16.msra.mxu1 %v1914_v40 }
  0x73   : > { %1321 = vmatpush.bf16.msra.mxu3 %v1930_v41  ;;  %1283 = vmatmul.bf16.vlgmr.msra.gmra.mxu0 %v330_v42 }
  0x74   : > { %1327 = vmatpush.bf16.msrb.mxu0 %v1945_v37  ;;  %1309 = vmatmul.bf16.vlgmr.msra.gmra.mxu2 %v332_v43 }
  0x75   : > { %1296 = vmatmul.bf16.vlgmr.msra.gmra.mxu1 %v331_v28 }
  0x76   : > { %1322 = vmatmul.bf16.vlgmr.msra.gmra.mxu3 %v333_v44 }
  0x78   : > { %1328 = vmatpush.bf16.msrb.mxu0 %v1944_v45 }
  0x7c   : > { %1329 = vmatpush.bf16.msrb.mxu0 %v1943_v46 }
  0x80   : > { %1330 = vmatpush.bf16.msrb.mxu0 %v1942_v47 }
  0x84   : > { %1331 = vmatpush.bf16.msrb.mxu0 %v1941_v48 }
  0x88   : > { %1332 = vmatpush.bf16.msrb.mxu0 %v1940_v50 }
  0x8c   : > { %1333 = vmatpush.bf16.msrb.mxu0 %v1939_v54 }
  0x90   : > { %1334 = vmatpush.bf16.msrb.mxu0 %v1938_v56 }
  0x93   : > { %1335 = vmatmul.bf16.vlgmr.msrb.gmra.mxu0 %v334_v57 }
  0xb0   : > { %v1180_v58 = vpop.f32.mrf.mxu0 }
  0xb1   : > { %v1181_v11 = vadd.f32 %v1986_v8, %v1180_v58 }
  0xb2   : > { %v1193_v59 = vpop.f32.mrf.mxu1 }
  0xb3   : > { %v1194_v12 = vadd.f32 %v1193_v59, %v1181_v11 }
  0xb7   : > { %v1206_v60 = vpop.f32.mrf.mxu2 }
  0xb8   : > { %v1182_v62 = vpop.f32.mrf.mxu0  ;;  %v1207_v13 = vadd.f32 %v1206_v60, %v1194_v12 }
  0xb9   : > { %v1219_v61 = vpop.f32.mrf.mxu3 }
  0xba   : > { %v1195_v63 = vpop.f32.mrf.mxu1  ;;  %v1220_v15 = vadd.f32 %v1219_v61, %v1207_v13 }
  0xbf   : > { %v1208_v0 = vpop.f32.mrf.mxu2 }
  0xc1   : > { %v1221_v1 = vpop.f32.mrf.mxu3 }
  0xd0   : > { %v1232_v2 = vpop.f32.mrf.mxu0 }
  0xd1   : > { %v1233_v17 = vadd.f32 %v1232_v2, %v1220_v15 }
  0xd2   : > { %v1245_v3 = vpop.f32.mrf.mxu1 }
  0xd3   : > { %v1246_v22 = vadd.f32 %v1245_v3, %v1233_v17 }
  0xd7   : > { %v1258_v4 = vpop.f32.mrf.mxu2 }
  0xd8   : > { %v1234_v6 = vpop.f32.mrf.mxu0  ;;  %v1259_v24 = vadd.f32 %v1258_v4, %v1246_v22 }
  0xd9   : > { %v1271_v5 = vpop.f32.mrf.mxu3 }
  0xda   : > { %v1247_v7 = vpop.f32.mrf.mxu1  ;;  %v1272_v27 = vadd.f32 %v1271_v5, %v1259_v24 }
  0xdf   : > { %v1260_v9 = vpop.f32.mrf.mxu2 }
  0xe1   : > { %v1273_v10 = vpop.f32.mrf.mxu3 }
  0xf0   : > { %v1284_v14 = vpop.f32.mrf.mxu0 }
  0xf1   : > { %v1285_v29 = vadd.f32 %v1284_v14, %v1272_v27 }
  0xf2   : > { %v1297_v16 = vpop.f32.mrf.mxu1 }
  0xf3   : > { %v1298_v30 = vadd.f32 %v1297_v16, %v1285_v29 }
  0xf7   : > { %v1310_v18 = vpop.f32.mrf.mxu2 }
  0xf8   : > { %v1286_v20 = vpop.f32.mrf.mxu0  ;;  %v1311_v31 = vadd.f32 %v1310_v18, %v1298_v30 }
  0xf9   : > { %v1323_v19 = vpop.f32.mrf.mxu3 }
  0xfa   : > { %v1299_v23 = vpop.f32.mrf.mxu1  ;;  %v1324_v32 = vadd.f32 %v1323_v19, %v1311_v31 }
  0xff   : > { %v1312_v25 = vpop.f32.mrf.mxu2 }
 0x101   : > { %v1325_v26 = vpop.f32.mrf.mxu3 }
 0x110   : > { %v1336_v33 = vpop.f32.mrf.mxu0 }
 0x111   : > { %v1337_v21 = vadd.f32 %v1336_v33, %v1324_v32 }
 0x113   : > { %1340 = vst [vmem:[%s217_s30] sm:$0xff] %v1337_v21 }
 0x114   : > { %2014 = shalt.err (!%p2011_p3)
}
 0x115   : > { %1947 = dma.vmem_to_hbm [thread:$0]  (%p2119_p5), %s1355_s7, 128, %s1357_s8, %s1342_s6  }
 0x118   : > { %v1338_v34 = vpop.f32.mrf.mxu0 }
 0x119 PF: > { %p1953_p4 = scmp.ge.s32.totalorder %s2049_s21, 2  ;;  %s1368_s15 = sand.u32 1, %s2037_s18  }
 0x11a   : > { %s1369_s13 = scalar_lea.sflag [#allocation3], %s1368_s15 }
 0x11b   : > { %p1950_p7 = pnand %p1953_p4, %p2123_p6 }
 0x11d   : > { %p1951_p8 = pneg %p1950_p7 }
 0x11f   : > { %2032 = dma.done.wait (%p1951_p8), %s1369_s13, 128  }
 0x120   : > { %2034 = vsyncadd (%p1951_p8), %s1369_s13, 4294967168  ;;  %p15_p9 = scmp.ge.s32.totalorder %s2106_s24, 4   ;;  %s2550_s18 = smov %s2041_s19 }
 0x121   : > { %s2551_s19 = smov %s2045_s20  ;;  %s2552_s20 = smov %s2117_s27 }
 0x122   : > { %s2553_s21 = smov %s2106_s24  ;;  %17 = sbr.rel (!%p15_p9) target bundleno = 3 (0x3), region = 75 }
 0x127   :  { %1375 = vsyncpa [#allocation3], 1 }
 0x128   :  { %1377 = vsyncpa [#allocation3 + $0x1], 1 }

// kernel: forward.2
= control target key start
LH: loop header
LB: loop body
LE: loop exit
PB: predicated region body
PF: predicated region fallthrough
CT: control target
= control target key end

     0   :  { %s6273_s24 = smov 0   ;;  %s10460_s0 = inlined_call_operand.vmem [shape: f32[208,112], index: 0, kind: input, shape index: {}]   ;;  %s10461_s1 = inlined_call_operand.vmem [shape: bf16[112,1728], index: 1, kind: input, shape index: {}]   ;;  %s10462_s2 = inlined_call_operand.vmem [shape: f32[1,832], index: 2, kind: input, shape index: {}]   ;;  %s10463_s3 = inlined_call_operand.vmem [shape: bf16[800,384], index: 3, kind: input, shape index: {}]   ;;  %s10464_s4 = inlined_call_operand.vmem [shape: f32[1,128], index: 4, kind: input, shape index: {}]   ;;  %s10465_s5 = inlined_call_operand.vmem [shape: f32[13,104], index: 5, kind: input, shape index: {}]   ;;  %s10466_s6 = inlined_call_operand.vmem [shape: f32[208,128], index: 6, kind: output, shape index: {0}]   ;;  %s10467_s7 = inlined_call_operand.vmem [shape: f32[2,26,128], index: 7, kind: output, shape index: {1}]  }
   0x1 LB: > { %s6279_s25 = sadd.s32 4294967295, %s6230_s24   ;;  %p4615_p0 = scmp.ge.s32.totalorder %s6230_s24, 1  ;;  %s6230_s24 = sphi %s6273_s24, %s18_s24  }
   0x2   : > { %p241_p1 = scmp.lt.s32.totalorder %s6230_s24, 3 }
   0x4   : > { %p242_p2 = pnand %p4615_p0, %p241_p1 }
   0x6   : > { %245 = sbr.rel (%p242_p2) target bundleno = 1526 (0x5f6), region = 44 }
   0xb   : > { %v4958_v0 = vld [vmem:[%s10461_s1 + $0x2a0] sm:$0xf]  ;;  %v5829_v1 = vld [vmem:[%s10461_s1 + $0x2d4] sm:$0xf0]  ;;  %v5822_v2 = vld [vmem:[%s10461_s1 + $0x2a4] sm:$0xf] }
   0xc   : > { %v4959_v3 = vor.u32 %v5829_v1, %v4958_v0  ;;  %v4960_v4 = vld [vmem:[%s10461_s1 + $0x2d8] sm:$0xf0]  ;;  %v4966_v5 = vld [vmem:[%s10461_s1 + $0x2a8] sm:$0xf]  ;;  %v5830_v6 = vld [vmem:[%s10461_s1 + $0x2dc] sm:$0xf0] }
   0xd   : > { %v4963_v7 = vor.u32 %v5822_v2, %v4960_v4  ;;  %v4967_v8 = vor.u32 %v5830_v6, %v4966_v5  ;;  %v5823_v9 = vld [vmem:[%s10461_s1 + $0x2ac] sm:$0xf]  ;;  %v4968_v10 = vld [vmem:[%s10461_s1 + $0x2e0] sm:$0xf0]  ;;  %v4902_v11 = vld [vmem:[%s10461_s1 + $0x230] sm:$0xf] }
   0xe   : > { %927 = vmatpush.bf16.msra.mxu0 %v4959_v3  ;;  %v4971_v12 = vor.u32 %v5823_v9, %v4968_v10  ;;  %v5815_v13 = vld [vmem:[%s10461_s1 + $0x264] sm:$0xf0]  ;;  %v5808_v14 = vld [vmem:[%s10461_s1 + $0x234] sm:$0xf]  ;;  %v4904_v15 = vld [vmem:[%s10461_s1 + $0x268] sm:$0xf0] }
   0xf   : > { %970 = vmatpush.bf16.msra.mxu1 %v4963_v7  ;;  %1013 = vmatpush.bf16.msra.mxu2 %v4967_v8  ;;  %v4903_v16 = vor.u32 %v5815_v13, %v4902_v11  ;;  %v4907_v17 = vor.u32 %v5808_v14, %v4904_v15  ;;  %v4910_v18 = vld [vmem:[%s10461_s1 + $0x238] sm:$0xf]  ;;  %v5816_v19 = vld [vmem:[%s10461_s1 + $0x26c] sm:$0xf0]  ;;  %v5809_v20 = vld [vmem:[%s10461_s1 + $0x23c] sm:$0xf] }
  0x10   : > { %1056 = vmatpush.bf16.msra.mxu3 %v4971_v12  ;;  %v4911_v21 = vor.u32 %v5816_v19, %v4910_v18  ;;  %v4912_v22 = vld [vmem:[%s10461_s1 + $0x270] sm:$0xf0]  ;;  %v4846_v23 = vld [vmem:[%s10461_s1 + $0x1c0] sm:$0xf]  ;;  %v5801_v24 = vld [vmem:[%s10461_s1 + $0x1f4] sm:$0xf0] }
  0x11   : > { %v4915_v25 = vor.u32 %v5809_v20, %v4912_v22  ;;  %v5794_v26 = vld [vmem:[%s10461_s1 + $0x1c4] sm:$0xf]  ;;  %v4848_v27 = vld [vmem:[%s10461_s1 + $0x1f8] sm:$0xf0]  ;;  %v4854_v28 = vld [vmem:[%s10461_s1 + $0x1c8] sm:$0xf]  ;;  %v4847_v29 = vor.u32 %v5801_v24, %v4846_v23 }
  0x12   : > { %928 = vmatpush.bf16.msra.mxu0 %v4903_v16  ;;  %v5802_v30 = vld [vmem:[%s10461_s1 + $0x1fc] sm:$0xf0]  ;;  %v5795_v31 = vld [vmem:[%s10461_s1 + $0x1cc] sm:$0xf]  ;;  %v4856_v32 = vld [vmem:[%s10461_s1 + $0x200] sm:$0xf0]  ;;  %v4851_v33 = vor.u32 %v5794_v26, %v4848_v27 }
  0x13   : > { %971 = vmatpush.bf16.msra.mxu1 %v4907_v17  ;;  %1014 = vmatpush.bf16.msra.mxu2 %v4911_v21  ;;  %v4855_v34 = vor.u32 %v5802_v30, %v4854_v28  ;;  %v4790_v35 = vld [vmem:[%s10461_s1 + $0x150] sm:$0xf]  ;;  %v5787_v36 = vld [vmem:[%s10461_s1 + $0x184] sm:$0xf0]  ;;  %v5780_v37 = vld [vmem:[%s10461_s1 + $0x154] sm:$0xf]  ;;  %v4859_v38 = vor.u32 %v5795_v31, %v4856_v32 }
  0x14   : > { %1057 = vmatpush.bf16.msra.mxu3 %v4915_v25  ;;  %v4792_v39 = vld [vmem:[%s10461_s1 + $0x188] sm:$0xf0]  ;;  %v4798_v40 = vld [vmem:[%s10461_s1 + $0x158] sm:$0xf]  ;;  %v5788_v41 = vld [vmem:[%s10461_s1 + $0x18c] sm:$0xf0]  ;;  %v4791_v44 = vor.u32 %v5787_v36, %v4790_v35 }
  0x15   : > { %v5781_v42 = vld [vmem:[%s10461_s1 + $0x15c] sm:$0xf]  ;;  %v4800_v43 = vld [vmem:[%s10461_s1 + $0x190] sm:$0xf0]  ;;  %v4795_v45 = vor.u32 %v5780_v37, %v4792_v39  ;;  %v4799_v46 = vor.u32 %v5788_v41, %v4798_v40  ;;  %v4734_v47 = vld [vmem:[%s10461_s1 + $0xe0] sm:$0xf] }
  0x16   : > { %929 = vmatpush.bf16.msra.mxu0 %v4847_v29  ;;  %v5773_v48 = vld [vmem:[%s10461_s1 + $0x114] sm:$0xf0]  ;;  %v5766_v49 = vld [vmem:[%s10461_s1 + $0xe4] sm:$0xf]  ;;  %v4803_v50 = vor.u32 %v5781_v42, %v4800_v43  ;;  %v4736_v51 = vld [vmem:[%s10461_s1 + $0x118] sm:$0xf0] }
  0x17   : > { %972 = vmatpush.bf16.msra.mxu1 %v4851_v33  ;;  %1015 = vmatpush.bf16.msra.mxu2 %v4855_v34  ;;  %v4742_v52 = vld [vmem:[%s10461_s1 + $0xe8] sm:$0xf]  ;;  %v5774_v53 = vld [vmem:[%s10461_s1 + $0x11c] sm:$0xf0]  ;;  %v5767_v54 = vld [vmem:[%s10461_s1 + $0xec] sm:$0xf]  ;;  %v4735_v56 = vor.u32 %v5773_v48, %v4734_v47  ;;  %v4739_v57 = vor.u32 %v5766_v49, %v4736_v51 }
  0x18   : > { %1058 = vmatpush.bf16.msra.mxu3 %v4859_v38  ;;  %v4744_v55 = vld [vmem:[%s10461_s1 + $0x120] sm:$0xf0]  ;;  %v4743_v58 = vor.u32 %v5774_v53, %v4742_v52  ;;  %v4678_v59 = vld [vmem:[%s10461_s1 + $0x70] sm:$0xf]  ;;  %v5759_v60 = vld [vmem:[%s10461_s1 + $0xa4] sm:$0xf0] }
  0x19   : > { %v5752_v61 = vld [vmem:[%s10461_s1 + $0x74] sm:$0xf]  ;;  %v4747_v62 = vor.u32 %v5767_v54, %v4744_v55  ;;  %v4680_v63 = vld [vmem:[%s10461_s1 + $0xa8] sm:$0xf0]  ;;  %v4686_v0 = vld [vmem:[%s10461_s1 + $0x78] sm:$0xf]  ;;  %v4679_v4 = vor.u32 %v5759_v60, %v4678_v59 }
  0x1a   : > { %930 = vmatpush.bf16.msra.mxu0 %v4791_v44  ;;  %v5760_v1 = vld [vmem:[%s10461_s1 + $0xac] sm:$0xf0]  ;;  %v5753_v2 = vld [vmem:[%s10461_s1 + $0x7c] sm:$0xf]  ;;  %v4688_v3 = vld [vmem:[%s10461_s1 + $0xb0] sm:$0xf0]  ;;  %v4683_v6 = vor.u32 %v5752_v61, %v4680_v63 }
  0x1b   : > { %973 = vmatpush.bf16.msra.mxu1 %v4795_v45  ;;  %1016 = vmatpush.bf16.msra.mxu2 %v4799_v46  ;;  %s278_s15 = smul.u32 13, %s6279_s25  ;;  %v4622_v5 = vld [vmem:[%s10461_s1] sm:$0xf]  ;;  %v4687_v7 = vor.u32 %v5760_v1, %v4686_v0  ;;  %v5745_v8 = vld [vmem:[%s10461_s1 + $0x34] sm:$0xf0]  ;;  %v4691_v10 = vor.u32 %v5753_v2, %v4688_v3  ;;  %vm904_vm0 = vcmask 916480  }
  0x1c   : > { %1059 = vmatpush.bf16.msra.mxu3 %v4803_v50  ;;  %v5738_v9 = vld [vmem:[%s10461_s1 + $0x4] sm:$0xf]  ;;  %v4624_v11 = vld [vmem:[%s10461_s1 + $0x38] sm:$0xf0]  ;;  %v4630_v12 = vld [vmem:[%s10461_s1 + $0x8] sm:$0xf]  ;;  %v4623_v16 = vor.u32 %v5745_v8, %v4622_v5 }
  0x1d   : > { %p279_p3 = scmp.lt.s32.totalorder %s278_s15, 25  ;;  %v5746_v13 = vld [vmem:[%s10461_s1 + $0x3c] sm:$0xf0]  ;;  %v5739_v14 = vld [vmem:[%s10461_s1 + $0xc] sm:$0xf]  ;;  %v4627_v17 = vor.u32 %v5738_v9, %v4624_v11  ;;  %s6232_s19 = smov 96  }
  0x1e   : > { %931 = vmatpush.bf16.msra.mxu0 %v4735_v56  ;;  %v4632_v15 = vld [vmem:[%s10461_s1 + $0x40] sm:$0xf0]  ;;  %v4631_v18 = vor.u32 %v5746_v13, %v4630_v12  ;;  %v4974_v32 = vld [vmem:[%s10461_s1 + $0x2b0] sm:$0xf]  ;;  %v5831_v33 = vld [vmem:[%s10461_s1 + $0x2e4] sm:$0xf0] }
  0x1f   : > { %974 = vmatpush.bf16.msra.mxu1 %v4739_v57  ;;  %1017 = vmatpush.bf16.msra.mxu2 %v4743_v58  ;;  %s11200_s15 = smov (!%p279_p3, %s278_s15), 25  ;;  %v4635_v19 = vor.u32 %v5739_v14, %v4632_v15  ;;  %v5824_v34 = vld [vmem:[%s10461_s1 + $0x2b4] sm:$0xf]  ;;  %v4975_v35 = vor.u32 %v5831_v33, %v4974_v32  ;;  %v4976_v36 = vld [vmem:[%s10461_s1 + $0x2e8] sm:$0xf0]  ;;  %vm2090_vm1 = vcmask 785408  }
  0x20   : > { %1060 = vmatpush.bf16.msra.mxu3 %v4747_v62  ;;  %s4616_s11 = sshll.u32 %s11200_s15, 3  ;;  %v4982_v37 = vld [vmem:[%s10461_s1 + $0x2b8] sm:$0xf]  ;;  %v5832_v38 = vld [vmem:[%s10461_s1 + $0x2ec] sm:$0xf0]  ;;  %v4979_v39 = vor.u32 %v5824_v34, %v4976_v36  ;;  %vm3400_vm2 = vcmask 261120  }
  0x21   : > { %s6460_s14 = scalar_lea.vmem %s10460_s0, %s4616_s11  ;;  %v4983_v40 = vor.u32 %v5832_v38, %v4982_v37  ;;  %v5825_v41 = vld [vmem:[%s10461_s1 + $0x2bc] sm:$0xf]  ;;  %v4984_v42 = vld [vmem:[%s10461_s1 + $0x2f0] sm:$0xf0]  ;;  %v4918_v43 = vld [vmem:[%s10461_s1 + $0x240] sm:$0xf]  ;;  %s10320_s23 = scalar_lea.vmem %s10466_s6, %s4616_s11 }
  0x22   : > { %932 = vmatpush.bf16.msra.mxu0 %v4679_v4  ;;  %v296_v20 = vld [vmem:[%s6460_s14] sm:$0xff]  ;;  %v297_v21 = vld [vmem:[%s6460_s14 + $0x8] sm:$0xff]  ;;  %v298_v23 = vld [vmem:[%s6460_s14 + $0x10] sm:$0xff]  ;;  %v4987_v44 = vor.u32 %v5825_v41, %v4984_v42  ;;  %vm4452_vm5 = vcmask 850944   ;;  %p290_p4 = scmp.lt.s32.totalorder %s6279_s25, 1 }
  0x23   : > { %975 = vmatpush.bf16.msra.mxu1 %v4683_v6  ;;  %1018 = vmatpush.bf16.msra.mxu2 %v4687_v7  ;;  %v6464_v22 = vpack.c.bf16 %v297_v21, %v296_v20  ;;  %v299_v24 = vld [vmem:[%s6460_s14 + $0x18] sm:$0xff]  ;;  %v300_v26 = vld [vmem:[%s6460_s14 + $0x20] sm:$0xff]  ;;  %v301_v27 = vld [vmem:[%s6460_s14 + $0x28] sm:$0xff] }
  0x24   : > { %1061 = vmatpush.bf16.msra.mxu3 %v4691_v10  ;;  %v6476_v25 = vpack.c.bf16 %v299_v24, %v298_v23  ;;  %v6488_v28 = vpack.c.bf16 %v301_v27, %v300_v26  ;;  %v302_v29 = vld [vmem:[%s6460_s14 + $0x30] sm:$0xff]  ;;  %v303_v30 = vld [vmem:[%s6460_s14 + $0x38] sm:$0xff]  ;;  %v5810_v46 = vld [vmem:[%s10461_s1 + $0x244] sm:$0xf]  ;;  %s11202_s25 = smov (!%p290_p4, %s6279_s25), 1 }
  0x25   : > { %v6500_v31 = vpack.c.bf16 %v303_v30, %v302_v29  ;;  %v5817_v45 = vld [vmem:[%s10461_s1 + $0x274] sm:$0xf0]  ;;  %v4920_v47 = vld [vmem:[%s10461_s1 + $0x278] sm:$0xf0]  ;;  %v4926_v50 = vld [vmem:[%s10461_s1 + $0x248] sm:$0xf] }
  0x26   : > { %933 = vmatpush.bf16.msra.mxu0 %v4623_v16  ;;  %v4919_v48 = vor.u32 %v5817_v45, %v4918_v43  ;;  %v4923_v49 = vor.u32 %v5810_v46, %v4920_v47  ;;  %v5818_v51 = vld [vmem:[%s10461_s1 + $0x27c] sm:$0xf0]  ;;  %v5811_v52 = vld [vmem:[%s10461_s1 + $0x24c] sm:$0xf]  ;;  %v4928_v56 = vld [vmem:[%s10461_s1 + $0x280] sm:$0xf0] }
  0x27   : > { %976 = vmatpush.bf16.msra.mxu1 %v4627_v17  ;;  %1019 = vmatpush.bf16.msra.mxu2 %v4631_v18  ;;  %v304_v53 = vld [vmem:[%s6460_s14 + $0x40] sm:$0xff]  ;;  %v305_v54 = vld [vmem:[%s6460_s14 + $0x48] sm:$0xff]  ;;  %v4927_v55 = vor.u32 %v5818_v51, %v4926_v50  ;;  %v4862_v57 = vld [vmem:[%s10461_s1 + $0x1d0] sm:$0xf]  ;;  %v4931_v59 = vor.u32 %v5811_v52, %v4928_v56  ;;  %s5737_s28 = sshll.u32 %s11202_s25, 5 }
  0x28   : > { %1062 = vmatpush.bf16.msra.mxu3 %v4635_v19  ;;  %v5803_v58 = vld [vmem:[%s10461_s1 + $0x204] sm:$0xf0]  ;;  %v5796_v60 = vld [vmem:[%s10461_s1 + $0x1d4] sm:$0xf]  ;;  %v4864_v61 = vld [vmem:[%s10461_s1 + $0x208] sm:$0xf0]  ;;  %v6584_v6 = vpack.c.bf16 %v305_v54, %v304_v53  ;;  %s294_s8 = scalar_lea.vmem %s10467_s7, %s5737_s28 }
  0x29   : > { %5012 = vmatmul.msk.bf16.vlgmr.msra.gmra.mxu0 %vm904_vm0, %v6464_v22  ;;  %v4870_v62 = vld [vmem:[%s10461_s1 + $0x1d8] sm:$0xf]  ;;  %v4863_v63 = vor.u32 %v5803_v58, %v4862_v57  ;;  %v5804_v0 = vld [vmem:[%s10461_s1 + $0x20c] sm:$0xf0]  ;;  %v5797_v1 = vld [vmem:[%s10461_s1 + $0x1dc] sm:$0xf]  ;;  %v4867_v3 = vor.u32 %v5796_v60, %v4864_v61 }
  0x2a   : > { %5019 = vmatmul.msk.bf16.vlgmr.msra.gmra.mxu1 %vm904_vm0, %v6464_v22  ;;  %5026 = vmatmul.msk.bf16.vlgmr.msra.gmra.mxu2 %vm904_vm0, %v6464_v22  ;;  %v4872_v2 = vld [vmem:[%s10461_s1 + $0x210] sm:$0xf0]  ;;  %v4871_v4 = vor.u32 %v5804_v0, %v4870_v62  ;;  %v4806_v7 = vld [vmem:[%s10461_s1 + $0x160] sm:$0xf]  ;;  %v5789_v8 = vld [vmem:[%s10461_s1 + $0x194] sm:$0xf0] }
  0x2b   : > { %5033 = vmatmul.msk.bf16.vlgmr.msra.gmra.mxu3 %vm904_vm0, %v6464_v22  ;;  %1099 = vmatpush.bf16.msrb.mxu0 %v4975_v35  ;;  %v4875_v5 = vor.u32 %v5797_v1, %v4872_v2  ;;  %v5782_v9 = vld [vmem:[%s10461_s1 + $0x164] sm:$0xf]  ;;  %v4807_v10 = vor.u32 %v5789_v8, %v4806_v7  ;;  %v4808_v11 = vld [vmem:[%s10461_s1 + $0x198] sm:$0xf0]  ;;  %v4814_v12 = vld [vmem:[%s10461_s1 + $0x168] sm:$0xf] }
  0x2c   : > { %1142 = vmatpush.bf16.msrb.mxu1 %v4979_v39  ;;  %1185 = vmatpush.bf16.msrb.mxu2 %v4983_v40  ;;  %v5790_v13 = vld [vmem:[%s10461_s1 + $0x19c] sm:$0xf0]  ;;  %v4811_v14 = vor.u32 %v5782_v9, %v4808_v11  ;;  %v5783_v16 = vld [vmem:[%s10461_s1 + $0x16c] sm:$0xf]  ;;  %v4816_v17 = vld [vmem:[%s10461_s1 + $0x1a0] sm:$0xf0] }
  0x2d   : > { %1228 = vmatpush.bf16.msrb.mxu3 %v4987_v44  ;;  %v4815_v15 = vor.u32 %v5790_v13, %v4814_v12  ;;  %v4750_v18 = vld [vmem:[%s10461_s1 + $0xf0] sm:$0xf]  ;;  %v4819_v19 = vor.u32 %v5783_v16, %v4816_v17  ;;  %v5775_v20 = vld [vmem:[%s10461_s1 + $0x124] sm:$0xf0]  ;;  %v5768_v21 = vld [vmem:[%s10461_s1 + $0xf4] sm:$0xf] }
  0x2e   : > { %v4752_v23 = vld [vmem:[%s10461_s1 + $0x128] sm:$0xf0]  ;;  %v4751_v24 = vor.u32 %v5775_v20, %v4750_v18  ;;  %v4758_v27 = vld [vmem:[%s10461_s1 + $0xf8] sm:$0xf]  ;;  %v5776_v29 = vld [vmem:[%s10461_s1 + $0x12c] sm:$0xf0] }
  0x2f   : > { %1100 = vmatpush.bf16.msrb.mxu0 %v4919_v48  ;;  %v4755_v26 = vor.u32 %v5768_v21, %v4752_v23  ;;  %v5769_v30 = vld [vmem:[%s10461_s1 + $0xfc] sm:$0xf]  ;;  %v4759_v32 = vor.u32 %v5776_v29, %v4758_v27  ;;  %v4760_v33 = vld [vmem:[%s10461_s1 + $0x130] sm:$0xf0]  ;;  %v4694_v34 = vld [vmem:[%s10461_s1 + $0x80] sm:$0xf] }
  0x30   : > { %1143 = vmatpush.bf16.msrb.mxu1 %v4923_v49  ;;  %1186 = vmatpush.bf16.msrb.mxu2 %v4927_v55  ;;  %v5761_v35 = vld [vmem:[%s10461_s1 + $0xb4] sm:$0xf0]  ;;  %v4763_v36 = vor.u32 %v5769_v30, %v4760_v33  ;;  %v5754_v37 = vld [vmem:[%s10461_s1 + $0x84] sm:$0xf]  ;;  %v4696_v38 = vld [vmem:[%s10461_s1 + $0xb8] sm:$0xf0] }
  0x31   : > { %1229 = vmatpush.bf16.msrb.mxu3 %v4931_v59  ;;  %v4702_v39 = vld [vmem:[%s10461_s1 + $0x88] sm:$0xf]  ;;  %v4695_v40 = vor.u32 %v5761_v35, %v4694_v34  ;;  %v5762_v41 = vld [vmem:[%s10461_s1 + $0xbc] sm:$0xf0]  ;;  %v5755_v42 = vld [vmem:[%s10461_s1 + $0x8c] sm:$0xf]  ;;  %v4699_v45 = vor.u32 %v5754_v37, %v4696_v38 }
  0x32   : > { %v4704_v43 = vld [vmem:[%s10461_s1 + $0xc0] sm:$0xf0]  ;;  %v306_v44 = vld [vmem:[%s6460_s14 + $0x50] sm:$0xff]  ;;  %v4703_v46 = vor.u32 %v5762_v41, %v4702_v39  ;;  %v5747_v48 = vld [vmem:[%s10461_s1 + $0x44] sm:$0xf0] }
  0x33   : > { %1101 = vmatpush.bf16.msrb.mxu0 %v4863_v63  ;;  %v4638_v47 = vld [vmem:[%s10461_s1 + $0x10] sm:$0xf]  ;;  %v307_v49 = vld [vmem:[%s6460_s14 + $0x58] sm:$0xff]  ;;  %v4707_v50 = vor.u32 %v5755_v42, %v4704_v43  ;;  %v5740_v51 = vld [vmem:[%s10461_s1 + $0x14] sm:$0xf] }
  0x34   : > { %1144 = vmatpush.bf16.msrb.mxu1 %v4867_v3  ;;  %1187 = vmatpush.bf16.msrb.mxu2 %v4871_v4  ;;  %v4640_v52 = vld [vmem:[%s10461_s1 + $0x48] sm:$0xf0]  ;;  %v4639_v53 = vor.u32 %v5747_v48, %v4638_v47  ;;  %v4646_v54 = vld [vmem:[%s10461_s1 + $0x18] sm:$0xf]  ;;  %v5748_v55 = vld [vmem:[%s10461_s1 + $0x4c] sm:$0xf0]  ;;  %v6686_v56 = vpack.c.bf16 %v307_v49, %v306_v44 }
  0x35   : > { %1230 = vmatpush.bf16.msrb.mxu3 %v4875_v5  ;;  %v4643_v57 = vor.u32 %v5740_v51, %v4640_v52  ;;  %v5741_v58 = vld [vmem:[%s10461_s1 + $0x1c] sm:$0xf]  ;;  %v4648_v59 = vld [vmem:[%s10461_s1 + $0x50] sm:$0xf0]  ;;  %v4647_v60 = vor.u32 %v5748_v55, %v4646_v54  ;;  %v308_v62 = vld [vmem:[%s6460_s14 + $0x60] sm:$0xff] }
  0x36   : > { %v4651_v61 = vor.u32 %v5741_v58, %v4648_v59  ;;  %v6703_v63 = vpack.c.bf16 %v308_v62, %v308_v62  ;;  %v4990_v20 = vld [vmem:[%s10461_s1 + $0x2c0] sm:$0xf]  ;;  %v5833_v21 = vld [vmem:[%s10461_s1 + $0x2f4] sm:$0xf0]  ;;  %v5826_v23 = vld [vmem:[%s10461_s1 + $0x2c4] sm:$0xf] }
  0x37   : > { %1102 = vmatpush.bf16.msrb.mxu0 %v4807_v10  ;;  %v4991_v27 = vor.u32 %v5833_v21, %v4990_v20  ;;  %v4992_v29 = vld [vmem:[%s10461_s1 + $0x2f8] sm:$0xf0]  ;;  %v4998_v30 = vld [vmem:[%s10461_s1 + $0x2c8] sm:$0xf]  ;;  %v5000_v37 = vld [vmem:[%s10461_s1 + $0x300] sm:$0xf0] }
  0x38   : > { %1145 = vmatpush.bf16.msrb.mxu1 %v4811_v14  ;;  %1188 = vmatpush.bf16.msrb.mxu2 %v4815_v15  ;;  %v4995_v34 = vor.u32 %v5826_v23, %v4992_v29  ;;  %v4934_v38 = vld [vmem:[%s10461_s1 + $0x250] sm:$0xf]  ;;  %v5812_v41 = vld [vmem:[%s10461_s1 + $0x254] sm:$0xf]  ;;  %v4936_v42 = vld [vmem:[%s10461_s1 + $0x288] sm:$0xf0] }
  0x39   : > { %5013 = vmatmul.msk.bf16.gmra.mxu0 %vm904_vm0, %v6476_v25  ;;  %1231 = vmatpush.bf16.msrb.mxu3 %v4819_v19  ;;  %v4939_v44 = vor.u32 %v5812_v41, %v4936_v42  ;;  %v5813_v47 = vld [vmem:[%s10461_s1 + $0x25c] sm:$0xf]  ;;  %v4944_v49 = vld [vmem:[%s10461_s1 + $0x290] sm:$0xf0]  ;;  %v4878_v52 = vld [vmem:[%s10461_s1 + $0x1e0] sm:$0xf] }
  0x3a   : > { %5020 = vmatmul.msk.bf16.gmra.mxu1 %vm904_vm0, %v6476_v25  ;;  %5027 = vmatmul.msk.bf16.gmra.mxu2 %vm904_vm0, %v6476_v25  ;;  %v5798_v54 = vld [vmem:[%s10461_s1 + $0x1e4] sm:$0xf]  ;;  %v4880_v59 = vld [vmem:[%s10461_s1 + $0x218] sm:$0xf0]  ;;  %v5799_v23 = vld [vmem:[%s10461_s1 + $0x1ec] sm:$0xf] }
  0x3b   : > { %5034 = vmatmul.msk.bf16.gmra.mxu3 %vm904_vm0, %v6476_v25  ;;  %1103 = vmatpush.bf16.msrb.mxu0 %v4751_v24  ;;  %v4883_v20 = vor.u32 %v5798_v54, %v4880_v59  ;;  %v5785_v41 = vld [vmem:[%s10461_s1 + $0x17c] sm:$0xf]  ;;  %v4832_v42 = vld [vmem:[%s10461_s1 + $0x1b0] sm:$0xf0]  ;;  %v5778_v54 = vld [vmem:[%s10461_s1 + $0x13c] sm:$0xf0] }
  0x3c   : > { %1146 = vmatpush.bf16.msrb.mxu1 %v4755_v26  ;;  %1189 = vmatpush.bf16.msrb.mxu2 %v4759_v32  ;;  %v5834_v32 = vld [vmem:[%s10461_s1 + $0x2fc] sm:$0xf0] }
  0x3d   : > { %1232 = vmatpush.bf16.msrb.mxu3 %v4763_v36  ;;  %v4999_v35 = vor.u32 %v5834_v32, %v4998_v30  ;;  %v5827_v36 = vld [vmem:[%s10461_s1 + $0x2cc] sm:$0xf]  ;;  %v4822_v30 = vld [vmem:[%s10461_s1 + $0x170] sm:$0xf]  ;;  %v5791_v32 = vld [vmem:[%s10461_s1 + $0x1a4] sm:$0xf0] }
  0x3e   : > { %v5003_v39 = vor.u32 %v5827_v36, %v5000_v37  ;;  %v4824_v36 = vld [vmem:[%s10461_s1 + $0x1a8] sm:$0xf0]  ;;  %v4830_v37 = vld [vmem:[%s10461_s1 + $0x178] sm:$0xf] }
  0x3f   : > { %1104 = vmatpush.bf16.msrb.mxu0 %v4695_v40  ;;  %v5819_v40 = vld [vmem:[%s10461_s1 + $0x284] sm:$0xf0] }
  0x40   : > { %1147 = vmatpush.bf16.msrb.mxu1 %v4699_v45  ;;  %1190 = vmatpush.bf16.msrb.mxu2 %v4703_v46  ;;  %v4935_v43 = vor.u32 %v5819_v40, %v4934_v38  ;;  %v4942_v45 = vld [vmem:[%s10461_s1 + $0x258] sm:$0xf]  ;;  %v5820_v46 = vld [vmem:[%s10461_s1 + $0x28c] sm:$0xf0] }
  0x41   : > { %1233 = vmatpush.bf16.msrb.mxu3 %v4707_v50  ;;  %v4943_v48 = vor.u32 %v5820_v46, %v4942_v45  ;;  %v4947_v50 = vor.u32 %v5813_v47, %v4944_v49  ;;  %v5792_v38 = vld [vmem:[%s10461_s1 + $0x1ac] sm:$0xf0]  ;;  %v4766_v45 = vld [vmem:[%s10461_s1 + $0x100] sm:$0xf]  ;;  %v5777_v46 = vld [vmem:[%s10461_s1 + $0x134] sm:$0xf0] }
  0x42   : > { %v4831_v40 = vor.u32 %v5792_v38, %v4830_v37  ;;  %v5770_v47 = vld [vmem:[%s10461_s1 + $0x104] sm:$0xf]  ;;  %v5757_v37 = vld [vmem:[%s10461_s1 + $0x9c] sm:$0xf]  ;;  %v4720_v38 = vld [vmem:[%s10461_s1 + $0xd0] sm:$0xf0] }
  0x43   : > { %1105 = vmatpush.bf16.msrb.mxu0 %v4639_v53  ;;  %v5805_v53 = vld [vmem:[%s10461_s1 + $0x214] sm:$0xf0] }
  0x44   : > { %1148 = vmatpush.bf16.msrb.mxu1 %v4643_v57  ;;  %1191 = vmatpush.bf16.msrb.mxu2 %v4647_v60  ;;  %v4879_v58 = vor.u32 %v5805_v53, %v4878_v52  ;;  %v4886_v60 = vld [vmem:[%s10461_s1 + $0x1e8] sm:$0xf]  ;;  %v4768_v52 = vld [vmem:[%s10461_s1 + $0x138] sm:$0xf0] }
  0x45   : > { %1234 = vmatpush.bf16.msrb.mxu3 %v4651_v61  ;;  %v5806_v61 = vld [vmem:[%s10461_s1 + $0x21c] sm:$0xf0]  ;;  %v4774_v53 = vld [vmem:[%s10461_s1 + $0x108] sm:$0xf]  ;;  %v4771_v59 = vor.u32 %v5770_v47, %v4768_v52  ;;  %v4656_v52 = vld [vmem:[%s10461_s1 + $0x58] sm:$0xf0] }
  0x46   : > { %v4887_v21 = vor.u32 %v5806_v61, %v4886_v60  ;;  %v4775_v60 = vor.u32 %v5778_v54, %v4774_v53  ;;  %v5771_v61 = vld [vmem:[%s10461_s1 + $0x10c] sm:$0xf]  ;;  %v4662_v53 = vld [vmem:[%s10461_s1 + $0x28] sm:$0xf]  ;;  %v5750_v54 = vld [vmem:[%s10461_s1 + $0x5c] sm:$0xf0] }
  0x47   : > { %1271 = vmatpush.bf16.msra.mxu0 %v4991_v27  ;;  %v4888_v27 = vld [vmem:[%s10461_s1 + $0x220] sm:$0xf0] }
  0x48   : > { %1314 = vmatpush.bf16.msra.mxu1 %v4995_v34  ;;  %1357 = vmatpush.bf16.msra.mxu2 %v4999_v35  ;;  %v4891_v29 = vor.u32 %v5799_v23, %v4888_v27  ;;  %v5784_v34 = vld [vmem:[%s10461_s1 + $0x174] sm:$0xf]  ;;  %v4823_v35 = vor.u32 %v5791_v32, %v4822_v30  ;;  %v5763_v27 = vld [vmem:[%s10461_s1 + $0xc4] sm:$0xf0]  ;;  %v4712_v30 = vld [vmem:[%s10461_s1 + $0xc8] sm:$0xf0] }
  0x49   : > { %5014 = vmatmul.msk.bf16.gmra.mxu0 %vm904_vm0, %v6488_v28  ;;  %1400 = vmatpush.bf16.msra.mxu3 %v5003_v39  ;;  %v4827_v39 = vor.u32 %v5784_v34, %v4824_v36  ;;  %v5764_v36 = vld [vmem:[%s10461_s1 + $0xcc] sm:$0xf0] }
  0x4a   : > { %5021 = vmatmul.msk.bf16.gmra.mxu1 %vm904_vm0, %v6488_v28  ;;  %5028 = vmatmul.msk.bf16.gmra.mxu2 %vm904_vm0, %v6488_v28 }
  0x4b   : > { %5035 = vmatmul.msk.bf16.gmra.mxu3 %vm904_vm0, %v6488_v28  ;;  %1272 = vmatpush.bf16.msra.mxu0 %v4935_v43  ;;  %v4835_v43 = vor.u32 %v5785_v41, %v4832_v42  ;;  %v4654_v42 = vld [vmem:[%s10461_s1 + $0x20] sm:$0xf] }
  0x4c   : > { %1315 = vmatpush.bf16.msra.mxu1 %v4939_v44  ;;  %1358 = vmatpush.bf16.msra.mxu2 %v4943_v48 }
  0x4d   : > { %1401 = vmatpush.bf16.msra.mxu3 %v4947_v50  ;;  %v4767_v50 = vor.u32 %v5777_v46, %v4766_v45  ;;  %v5742_v45 = vld [vmem:[%s10461_s1 + $0x24] sm:$0xf] }
  0x4f   : > { %1273 = vmatpush.bf16.msra.mxu0 %v4879_v58 }
  0x50   : > { %1316 = vmatpush.bf16.msra.mxu1 %v4883_v20  ;;  %1359 = vmatpush.bf16.msra.mxu2 %v4887_v21  ;;  %v4776_v20 = vld [vmem:[%s10461_s1 + $0x140] sm:$0xf0]  ;;  %v4710_v21 = vld [vmem:[%s10461_s1 + $0x90] sm:$0xf] }
  0x51   : > { %1402 = vmatpush.bf16.msra.mxu3 %v4891_v29  ;;  %v4779_v23 = vor.u32 %v5771_v61, %v4776_v20  ;;  %v5756_v29 = vld [vmem:[%s10461_s1 + $0x94] sm:$0xf]  ;;  %v4711_v32 = vor.u32 %v5763_v27, %v4710_v21  ;;  %v4663_v61 = vor.u32 %v5750_v54, %v4662_v53  ;;  %v5743_v20 = vld [vmem:[%s10461_s1 + $0x2c] sm:$0xf]  ;;  %v4664_v21 = vld [vmem:[%s10461_s1 + $0x60] sm:$0xf0] }
  0x52   : > { %v4715_v34 = vor.u32 %v5756_v29, %v4712_v30 }
  0x53   : > { %1274 = vmatpush.bf16.msra.mxu0 %v4823_v35  ;;  %v4718_v35 = vld [vmem:[%s10461_s1 + $0x98] sm:$0xf] }
  0x54   : > { %1317 = vmatpush.bf16.msra.mxu1 %v4827_v39  ;;  %1360 = vmatpush.bf16.msra.mxu2 %v4831_v40  ;;  %v4719_v39 = vor.u32 %v5764_v36, %v4718_v35  ;;  %v4723_v40 = vor.u32 %v5757_v37, %v4720_v38 }
  0x55   : > { %1403 = vmatpush.bf16.msra.mxu3 %v4835_v43  ;;  %v5749_v43 = vld [vmem:[%s10461_s1 + $0x54] sm:$0xf0] }
  0x57   : > { %1275 = vmatpush.bf16.msra.mxu0 %v4767_v50  ;;  %v4655_v50 = vor.u32 %v5749_v43, %v4654_v42 }
  0x58   : > { %1318 = vmatpush.bf16.msra.mxu1 %v4771_v59  ;;  %1361 = vmatpush.bf16.msra.mxu2 %v4775_v60  ;;  %v4659_v60 = vor.u32 %v5742_v45, %v4656_v52 }
  0x59   : > { %5015 = vmatmul.msk.bf16.gmra.mxu0 %vm904_vm0, %v6500_v31  ;;  %1404 = vmatpush.bf16.msra.mxu3 %v4779_v23  ;;  %v4667_v23 = vor.u32 %v5743_v20, %v4664_v21 }
  0x5a   : > { %5022 = vmatmul.msk.bf16.gmra.mxu1 %vm904_vm0, %v6500_v31  ;;  %5029 = vmatmul.msk.bf16.gmra.mxu2 %vm904_vm0, %v6500_v31 }
  0x5b   : > { %5036 = vmatmul.msk.bf16.gmra.mxu3 %vm904_vm0, %v6500_v31  ;;  %1276 = vmatpush.bf16.msra.mxu0 %v4711_v32 }
  0x5c   : > { %1319 = vmatpush.bf16.msra.mxu1 %v4715_v34  ;;  %1362 = vmatpush.bf16.msra.mxu2 %v4719_v39 }
  0x5d   : > { %1405 = vmatpush.bf16.msra.mxu3 %v4723_v40 }
  0x5f   : > { %1277 = vmatpush.bf16.msra.mxu0 %v4655_v50 }
  0x60   : > { %1320 = vmatpush.bf16.msra.mxu1 %v4659_v60  ;;  %1363 = vmatpush.bf16.msra.mxu2 %v4663_v61 }
  0x61   : > { %1406 = vmatpush.bf16.msra.mxu3 %v4667_v23 }
  0x69   : > { %5016 = vmatmul.msk.bf16.gmra.mxu0 %vm904_vm0, %v6584_v6 }
  0x6a   : > { %5023 = vmatmul.msk.bf16.gmra.mxu1 %vm904_vm0, %v6584_v6  ;;  %5030 = vmatmul.msk.bf16.gmra.mxu2 %vm904_vm0, %v6584_v6 }
  0x6b   : > { %5037 = vmatmul.msk.bf16.gmra.mxu3 %vm904_vm0, %v6584_v6 }
  0x79   : > { %5017 = vmatmul.msk.bf16.gmra.mxu0 %vm904_vm0, %v6686_v56 }
  0x7a   : > { %5024 = vmatmul.msk.bf16.gmra.mxu1 %vm904_vm0, %v6686_v56  ;;  %5031 = vmatmul.msk.bf16.gmra.mxu2 %vm904_vm0, %v6686_v56 }
  0x7b   : > { %5038 = vmatmul.msk.bf16.gmra.mxu3 %vm904_vm0, %v6686_v56 }
  0x89   : > { %5018 = vmatmul.msk.bf16.gmra.mxu0 %vm904_vm0, %v6703_v63 }
  0x8a   : > { %5025 = vmatmul.msk.bf16.gmra.mxu1 %vm904_vm0, %v6703_v63  ;;  %5032 = vmatmul.msk.bf16.gmra.mxu2 %vm904_vm0, %v6703_v63 }
  0x8b   : > { %5039 = vmatmul.msk.bf16.gmra.mxu3 %vm904_vm0, %v6703_v63 }
  0x99   : > { %5040 = vmatmul.msk.bf16.vlgmr.msrb.gmra.mxu0 %vm904_vm0, %v6464_v22 }
  0x9a   : > { %5047 = vmatmul.msk.bf16.vlgmr.msrb.gmra.mxu1 %vm904_vm0, %v6464_v22  ;;  %5054 = vmatmul.msk.bf16.vlgmr.msrb.gmra.mxu2 %vm904_vm0, %v6464_v22 }
  0x9b   : > { %5061 = vmatmul.msk.bf16.vlgmr.msrb.gmra.mxu3 %vm904_vm0, %v6464_v22 }
  0xa6   : > { %v6721_v0 = vpop.f32.mrf.mxu0 }
  0xa7   : > { %v6723_v1 = vpop.f32.mrf.mxu1 }
  0xa9   : > { %5041 = vmatmul.msk.bf16.gmra.mxu0 %vm904_vm0, %v6476_v25 }
  0xaa   : > { %5048 = vmatmul.msk.bf16.gmra.mxu1 %vm904_vm0, %v6476_v25  ;;  %5055 = vmatmul.msk.bf16.gmra.mxu2 %vm904_vm0, %v6476_v25 }
  0xab   : > { %5062 = vmatmul.msk.bf16.gmra.mxu3 %vm904_vm0, %v6476_v25 }
  0xad   : > { %v6733_v2 = vpop.f32.mrf.mxu2 }
  0xae   : > { %v6735_v3 = vpop.f32.mrf.mxu3  ;;  %v6737_v4 = vpop.f32.mrf.mxu0 }
  0xaf   : > { %v6739_v5 = vpop.f32.mrf.mxu1 }
  0xb5   : > { %v6741_v7 = vpop.f32.mrf.mxu2 }
  0xb6   : > { %v6743_v8 = vpop.f32.mrf.mxu3  ;;  %v6745_v9 = vpop.f32.mrf.mxu0 }
  0xb7   : > { %v6747_v10 = vpop.f32.mrf.mxu1 }
  0xb9   : > { %5042 = vmatmul.msk.bf16.gmra.mxu0 %vm904_vm0, %v6488_v28 }
  0xba   : > { %5049 = vmatmul.msk.bf16.gmra.mxu1 %vm904_vm0, %v6488_v28  ;;  %5056 = vmatmul.msk.bf16.gmra.mxu2 %vm904_vm0, %v6488_v28 }
  0xbb   : > { %5063 = vmatmul.msk.bf16.gmra.mxu3 %vm904_vm0, %v6488_v28 }
  0xbd   : > { %v6757_v11 = vpop.f32.mrf.mxu2 }
  0xbe   : > { %v6759_v12 = vpop.f32.mrf.mxu3  ;;  %v6761_v13 = vpop.f32.mrf.mxu0 }
  0xbf   : > { %10695 = vst [vmem:[#allocation2_spill] sm:$0xff] %v6759_v12  ;;  %v6763_v14 = vpop.f32.mrf.mxu1 }
  0xc5   : > { %v6765_v15 = vpop.f32.mrf.mxu2 }
  0xc6   : > { %v6767_v16 = vpop.f32.mrf.mxu3  ;;  %v6769_v17 = vpop.f32.mrf.mxu0 }
  0xc7   : > { %10696 = vst [vmem:[#allocation3_spill] sm:$0xff] %v6767_v16  ;;  %v6771_v18 = vpop.f32.mrf.mxu1 }
  0xc9   : > { %5043 = vmatmul.msk.bf16.gmra.mxu0 %vm904_vm0, %v6500_v31 }
  0xca   : > { %5050 = vmatmul.msk.bf16.gmra.mxu1 %vm904_vm0, %v6500_v31  ;;  %5057 = vmatmul.msk.bf16.gmra.mxu2 %vm904_vm0, %v6500_v31 }
  0xcb   : > { %5064 = vmatmul.msk.bf16.gmra.mxu3 %vm904_vm0, %v6500_v31 }
  0xcd   : > { %v6781_v19 = vpop.f32.mrf.mxu2 }
  0xce   : > { %10697 = vst [vmem:[#allocation4_spill] sm:$0xff] %v6781_v19  ;;  %v6792_v24 = vpop.f32.mrf.mxu3  ;;  %v6794_v26 = vpop.f32.mrf.mxu0 }
  0xcf   : > { %10698 = vst [vmem:[#allocation5_spill] sm:$0xff] %v6792_v24  ;;  %v6805_v33 = vpop.f32.mrf.mxu1 }
  0xd5   : > { %v6837_v51 = vpop.f32.mrf.mxu2 }
  0xd6   : > { %10699 = vst [vmem:[#allocation6_spill] sm:$0xff] %v6837_v51  ;;  %v6848_v55 = vpop.f32.mrf.mxu3  ;;  %v6850_v57 = vpop.f32.mrf.mxu0 }
  0xd7   : > { %10700 = vst [vmem:[#allocation7_spill] sm:$0xff] %v6848_v55  ;;  %v6861_v62 = vpop.f32.mrf.mxu1 }
  0xd9   : > { %5044 = vmatmul.msk.bf16.gmra.mxu0 %vm904_vm0, %v6584_v6 }
  0xda   : > { %5051 = vmatmul.msk.bf16.gmra.mxu1 %vm904_vm0, %v6584_v6  ;;  %5058 = vmatmul.msk.bf16.gmra.mxu2 %vm904_vm0, %v6584_v6 }
  0xdb   : > { %5065 = vmatmul.msk.bf16.gmra.mxu3 %vm904_vm0, %v6584_v6 }
  0xdd   : > { %v6901_v44 = vpop.f32.mrf.mxu2 }
  0xde   : > { %10701 = vst [vmem:[#allocation8_spill] sm:$0xff] %v6901_v44  ;;  %v6912_v48 = vpop.f32.mrf.mxu3  ;;  %v6914_v49 = vpop.f32.mrf.mxu0 }
  0xdf   : > { %10702 = vst [vmem:[#allocation9_spill] sm:$0xff] %v6912_v48  ;;  %v6925_v58 = vpop.f32.mrf.mxu1 }
  0xe5   : > { %v6957_v41 = vpop.f32.mrf.mxu2 }
  0xe6   : > { %10703 = vst [vmem:[#allocation10_spill] sm:$0xff] %v6957_v41  ;;  %v6968_v46 = vpop.f32.mrf.mxu3  ;;  %v6970_v47 = vpop.f32.mrf.mxu0  ;;  %v5821_v41 = vld [vmem:[%s10461_s1 + $0x294] sm:$0xf0] }
  0xe7   : > { %10704 = vst [vmem:[#allocation11_spill] sm:$0xff] %v6968_v46  ;;  %v6981_v59 = vpop.f32.mrf.mxu1 }
  0xe9   : > { %5045 = vmatmul.msk.bf16.gmra.mxu0 %vm904_vm0, %v6686_v56 }
  0xea   : > { %5052 = vmatmul.msk.bf16.gmra.mxu1 %vm904_vm0, %v6686_v56  ;;  %5059 = vmatmul.msk.bf16.gmra.mxu2 %vm904_vm0, %v6686_v56 }
  0xeb   : > { %5066 = vmatmul.msk.bf16.gmra.mxu3 %vm904_vm0, %v6686_v56 }
  0xed   : > { %v6997_v27 = vpop.f32.mrf.mxu2 }
  0xee   : > { %10705 = vst [vmem:[#allocation12_spill] sm:$0xff] %v6997_v27  ;;  %v6999_v29 = vpop.f32.mrf.mxu3  ;;  %v7001_v30 = vpop.f32.mrf.mxu0 }
  0xef   : > { %10706 = vst [vmem:[#allocation13_spill] sm:$0xff] %v6999_v29  ;;  %v7003_v32 = vpop.f32.mrf.mxu1 }
  0xf5   : > { %v7005_v34 = vpop.f32.mrf.mxu2 }
  0xf6   : > { %10707 = vst [vmem:[#allocation14_spill] sm:$0xff] %v7005_v34  ;;  %v7007_v35 = vpop.f32.mrf.mxu3  ;;  %v7009_v36 = vpop.f32.mrf.mxu0  ;;  %v5835_v34 = vld [vmem:[%s10461_s1 + $0x304] sm:$0xf0] }
  0xf7   : > { %10708 = vst [vmem:[#allocation15_spill] sm:$0xff] %v7007_v35  ;;  %v7011_v37 = vpop.f32.mrf.mxu1 }
  0xf9   : > { %5046 = vmatmul.msk.bf16.gmra.mxu0 %vm904_vm0, %v6703_v63 }
  0xfa   : > { %5053 = vmatmul.msk.bf16.gmra.mxu1 %vm904_vm0, %v6703_v63  ;;  %5060 = vmatmul.msk.bf16.gmra.mxu2 %vm904_vm0, %v6703_v63 }
  0xfb   : > { %5067 = vmatmul.msk.bf16.gmra.mxu3 %vm904_vm0, %v6703_v63 }
  0xfd   : > { %v7021_v38 = vpop.f32.mrf.mxu2 }
  0xfe   : > { %10709 = vst [vmem:[#allocation16_spill] sm:$0xff] %v7021_v38  ;;  %v7023_v39 = vpop.f32.mrf.mxu3  ;;  %v7025_v40 = vpop.f32.mrf.mxu0 }
  0xff   : > { %10710 = vst [vmem:[#allocation17_spill] sm:$0xff] %v7023_v39  ;;  %v7027_v42 = vpop.f32.mrf.mxu1 }
 0x105   : > { %v7029_v43 = vpop.f32.mrf.mxu2 }
 0x106   : > { %10711 = vst [vmem:[#allocation18_spill] sm:$0xff] %v7029_v43  ;;  %v7031_v45 = vpop.f32.mrf.mxu3  ;;  %v7033_v50 = vpop.f32.mrf.mxu0 }
 0x107   : > { %10712 = vst [vmem:[#allocation19_spill] sm:$0xff] %v7031_v45  ;;  %v7035_v52 = vpop.f32.mrf.mxu1 }
 0x109   : > { %5068 = vmatmul.msk.bf16.vlgmr.msra.gmra.mxu0 %vm904_vm0, %v6464_v22 }
 0x10a   : > { %5075 = vmatmul.msk.bf16.vlgmr.msra.gmra.mxu1 %vm904_vm0, %v6464_v22  ;;  %5082 = vmatmul.msk.bf16.vlgmr.msra.gmra.mxu2 %vm904_vm0, %v6464_v22 }
 0x10b   : > { %5089 = vmatmul.msk.bf16.vlgmr.msra.gmra.mxu3 %vm904_vm0, %v6464_v22 }
 0x10d   : > { %v7045_v53 = vpop.f32.mrf.mxu2 }
 0x10e   : > { %10713 = vst [vmem:[#allocation20_spill] sm:$0xff] %v7045_v53  ;;  %v7047_v54 = vpop.f32.mrf.mxu3  ;;  %v967_v60 = vpop.f32.mrf.mxu0 }
 0x10f   : > { %10714 = vst [vmem:[#allocation21_spill] sm:$0xff] %v7047_v54  ;;  %v1010_v61 = vpop.f32.mrf.mxu1 }
 0x115   : > { %v1053_v20 = vpop.f32.mrf.mxu2 }
 0x116   : > { %v1096_v21 = vpop.f32.mrf.mxu3  ;;  %v7049_v23 = vpop.f32.mrf.mxu0 }
 0x117   : > { %v7051_v39 = vpop.f32.mrf.mxu1 }
 0x118   : > { %10715 = vst [vmem:[#allocation22_spill] sm:$0xff] %v7051_v39 }
 0x119   : > { %5069 = vmatmul.msk.bf16.gmra.mxu0 %vm904_vm0, %v6476_v25 }
 0x11a   : > { %5076 = vmatmul.msk.bf16.gmra.mxu1 %vm904_vm0, %v6476_v25  ;;  %5083 = vmatmul.msk.bf16.gmra.mxu2 %vm904_vm0, %v6476_v25 }
 0x11b   : > { %5090 = vmatmul.msk.bf16.gmra.mxu3 %vm904_vm0, %v6476_v25 }
 0x11d   : > { %v7061_v60 = vpop.f32.mrf.mxu2 }
 0x11e   : > { %10716 = vst [vmem:[#allocation23_spill] sm:$0xff] %v7061_v60  ;;  %v7063_v61 = vpop.f32.mrf.mxu3  ;;  %v7065_v20 = vpop.f32.mrf.mxu0 }
 0x11f   : > { %10717 = vst [vmem:[#allocation24_spill] sm:$0xff] %v7065_v20  ;;  %v7067_v21 = vpop.f32.mrf.mxu1 }
 0x120   : > { %10718 = vst [vmem:[#allocation25_spill] sm:$0xff] %v7067_v21 }
 0x125   : > { %v7069_v54 = vpop.f32.mrf.mxu2 }
 0x126   : > { %10719 = vst [vmem:[#allocation26_spill] sm:$0xff] %v7069_v54  ;;  %v7071_v45 = vpop.f32.mrf.mxu3  ;;  %v7073_v53 = vpop.f32.mrf.mxu0 }
 0x127   : > { %10720 = vst [vmem:[#allocation27_spill] sm:$0xff] %v7073_v53  ;;  %v7075_v35 = vpop.f32.mrf.mxu1  ;;  %v5765_v53 = vld [vmem:[%s10461_s1 + $0xd4] sm:$0xf0] }
 0x128   : > { %10721 = vst [vmem:[#allocation28_spill] sm:$0xff] %v7075_v35 }
 0x129   : > { %5070 = vmatmul.msk.bf16.gmra.mxu0 %vm904_vm0, %v6488_v28 }
 0x12a   : > { %5077 = vmatmul.msk.bf16.gmra.mxu1 %vm904_vm0, %v6488_v28  ;;  %5084 = vmatmul.msk.bf16.gmra.mxu2 %vm904_vm0, %v6488_v28 }
 0x12b   : > { %5091 = vmatmul.msk.bf16.gmra.mxu3 %vm904_vm0, %v6488_v28 }
 0x12d   : > { %v7085_v60 = vpop.f32.mrf.mxu2 }
 0x12e   : > { %10722 = vst [vmem:[#allocation29_spill] sm:$0xff] %v7085_v60  ;;  %v7087_v54 = vpop.f32.mrf.mxu3  ;;  %v7089_v29 = vpop.f32.mrf.mxu0 }
 0x12f   : > { %10723 = vst [vmem:[#allocation30_spill] sm:$0xff] %v7089_v29  ;;  %v7091_v38 = vpop.f32.mrf.mxu1  ;;  %v4950_v29 = vld [vmem:[%s10461_s1 + $0x260] sm:$0xf] }
 0x130   : > { %10724 = vst [vmem:[#allocation31_spill] sm:$0xff] %v7091_v38 }
 0x135   : > { %v7093_v43 = vpop.f32.mrf.mxu2 }
 0x136   : > { %10725 = vst [vmem:[#allocation32_spill] sm:$0xff] %v7093_v43  ;;  %v7095_v46 = vpop.f32.mrf.mxu3  ;;  %v7097_v48 = vpop.f32.mrf.mxu0  ;;  %v5006_v43 = vld [vmem:[%s10461_s1 + $0x2d0] sm:$0xf] }
 0x137   : > { %10726 = vst [vmem:[#allocation33_spill] sm:$0xff] %v7097_v48  ;;  %v7099_v27 = vpop.f32.mrf.mxu1  ;;  %v5007_v55 = vor.u32 %v5835_v34, %v5006_v43  ;;  %v5814_v34 = vld [vmem:[%s10461_s1 + $0x264] sm:$0xf]  ;;  %v4951_v43 = vor.u32 %v5821_v41, %v4950_v29  ;;  %v5800_v41 = vld [vmem:[%s10461_s1 + $0x1f4] sm:$0xf] }
 0x138   : > { %10727 = vst [vmem:[#allocation34_spill] sm:$0xff] %v7099_v27  ;;  %v5828_v27 = vld [vmem:[%s10461_s1 + $0x2d4] sm:$0xf] }
 0x139   : > { %5071 = vmatmul.msk.bf16.gmra.mxu0 %vm904_vm0, %v6500_v31 }
 0x13a   : > { %5078 = vmatmul.msk.bf16.gmra.mxu1 %vm904_vm0, %v6500_v31  ;;  %5085 = vmatmul.msk.bf16.gmra.mxu2 %vm904_vm0, %v6500_v31 }
 0x13b   : > { %5092 = vmatmul.msk.bf16.gmra.mxu3 %vm904_vm0, %v6500_v31  ;;  %1443 = vmatpush.bf16.msrb.mxu0 %v5007_v55 }
 0x13d   : > { %v7109_v60 = vpop.f32.mrf.mxu2 }
 0x13e   : > { %10728 = vst [vmem:[#allocation35_spill] sm:$0xff] %v7109_v60  ;;  %v7120_v48 = vpop.f32.mrf.mxu3  ;;  %v7122_v24 = vpop.f32.mrf.mxu0  ;;  %v5008_v60 = vld [vmem:[%s10461_s1 + $0x308] sm:$0xf0] }
 0x13f   : > { %10729 = vst [vmem:[#allocation36_spill] sm:$0xff] %v7122_v24  ;;  %v7127_v38 = vpop.f32.mrf.mxu1  ;;  %v5011_v44 = vor.u32 %v5828_v27, %v5008_v60  ;;  %1444 = vmatpush.bf16.msrb.mxu0 %v4951_v43  ;;  %v5807_v60 = vld [vmem:[%s10461_s1 + $0x224] sm:$0xf0] }
 0x140   : > { %10730 = vst [vmem:[#allocation37_spill] sm:$0xff] %v7127_v38  ;;  %v4952_v38 = vld [vmem:[%s10461_s1 + $0x298] sm:$0xf0] }
 0x141   : > { %1486 = vmatpush.bf16.msrb.mxu1 %v5011_v44  ;;  %v4955_v27 = vor.u32 %v5814_v34, %v4952_v38  ;;  %v4894_v44 = vld [vmem:[%s10461_s1 + $0x1f0] sm:$0xf]  ;;  %v4896_v34 = vld [vmem:[%s10461_s1 + $0x228] sm:$0xf0] }
 0x142   : > { %v4895_v38 = vor.u32 %v5807_v60, %v4894_v44  ;;  %v5793_v44 = vld [vmem:[%s10461_s1 + $0x1b4] sm:$0xf0]  ;;  %v5786_v60 = vld [vmem:[%s10461_s1 + $0x184] sm:$0xf] }
 0x144   : > { %1445 = vmatpush.bf16.msrb.mxu0 %v4895_v38  ;;  %v4840_v38 = vld [vmem:[%s10461_s1 + $0x1b8] sm:$0xf0] }
 0x145   : > { %v7141_v55 = vpop.f32.mrf.mxu2  ;;  %1487 = vmatpush.bf16.msrb.mxu1 %v4955_v27  ;;  %v4899_v27 = vor.u32 %v5800_v41, %v4896_v34  ;;  %v4843_v34 = vor.u32 %v5786_v60, %v4840_v38 }
 0x146   : > { %10731 = vst [vmem:[#allocation38_spill] sm:$0xff] %v7141_v55  ;;  %v7152_v29 = vpop.f32.mrf.mxu3  ;;  %v7154_v24 = vpop.f32.mrf.mxu0  ;;  %v4838_v55 = vld [vmem:[%s10461_s1 + $0x180] sm:$0xf] }
 0x147   : > { %10732 = vst [vmem:[#allocation39_spill] sm:$0xff] %v7154_v24  ;;  %v7159_v43 = vpop.f32.mrf.mxu1  ;;  %v4839_v41 = vor.u32 %v5793_v44, %v4838_v55  ;;  %v5779_v55 = vld [vmem:[%s10461_s1 + $0x144] sm:$0xf0]  ;;  %v5772_v44 = vld [vmem:[%s10461_s1 + $0x114] sm:$0xf] }
 0x148   : > { %10733 = vst [vmem:[#allocation40_spill] sm:$0xff] %v7159_v43  ;;  %v4782_v43 = vld [vmem:[%s10461_s1 + $0x110] sm:$0xf] }
 0x149   : > { %5072 = vmatmul.msk.bf16.gmra.mxu0 %vm904_vm0, %v6584_v6  ;;  %1488 = vmatpush.bf16.msrb.mxu1 %v4899_v27  ;;  %v4783_v60 = vor.u32 %v5779_v55, %v4782_v43  ;;  %v5758_v43 = vld [vmem:[%s10461_s1 + $0xa4] sm:$0xf] }
 0x14a   : > { %5079 = vmatmul.msk.bf16.gmra.mxu1 %vm904_vm0, %v6584_v6  ;;  %5086 = vmatmul.msk.bf16.gmra.mxu2 %vm904_vm0, %v6584_v6 }
 0x14b   : > { %5093 = vmatmul.msk.bf16.gmra.mxu3 %vm904_vm0, %v6584_v6  ;;  %1446 = vmatpush.bf16.msrb.mxu0 %v4839_v41  ;;  %v4784_v41 = vld [vmem:[%s10461_s1 + $0x148] sm:$0xf0] }
 0x14d   : > { %v7181_v27 = vpop.f32.mrf.mxu2  ;;  %1489 = vmatpush.bf16.msrb.mxu1 %v4843_v34  ;;  %v4787_v34 = vor.u32 %v5772_v44, %v4784_v41  ;;  %v4670_v41 = vld [vmem:[%s10461_s1 + $0x30] sm:$0xf] }
 0x14e   : > { %10734 = vst [vmem:[#allocation41_spill] sm:$0xff] %v7181_v27  ;;  %v7192_v24 = vpop.f32.mrf.mxu3  ;;  %v7194_v35 = vpop.f32.mrf.mxu0  ;;  %v4726_v27 = vld [vmem:[%s10461_s1 + $0xa0] sm:$0xf] }
 0x14f   : > { %10735 = vst [vmem:[#allocation42_spill] sm:$0xff] %v7194_v35  ;;  %v7199_v38 = vpop.f32.mrf.mxu1  ;;  %1447 = vmatpush.bf16.msrb.mxu0 %v4783_v60  ;;  %v4727_v55 = vor.u32 %v5765_v53, %v4726_v27  ;;  %v5744_v53 = vld [vmem:[%s10461_s1 + $0x34] sm:$0xf] }
 0x150   : > { %10736 = vst [vmem:[#allocation43_spill] sm:$0xff] %v7199_v38  ;;  %v4728_v38 = vld [vmem:[%s10461_s1 + $0xd8] sm:$0xf0] }
 0x151   : > { %1490 = vmatpush.bf16.msrb.mxu1 %v4787_v34  ;;  %v4731_v44 = vor.u32 %v5758_v43, %v4728_v38  ;;  %v5751_v34 = vld [vmem:[%s10461_s1 + $0x64] sm:$0xf0]  ;;  %v4672_v43 = vld [vmem:[%s10461_s1 + $0x68] sm:$0xf0] }
 0x152   : > { %v4671_v38 = vor.u32 %v5751_v34, %v4670_v41 }
 0x153   : > { %1448 = vmatpush.bf16.msrb.mxu0 %v4727_v55 }
 0x155   : > { %v7213_v60 = vpop.f32.mrf.mxu2  ;;  %1491 = vmatpush.bf16.msrb.mxu1 %v4731_v44  ;;  %v4675_v44 = vor.u32 %v5744_v53, %v4672_v43 }
 0x156   : > { %10737 = vst [vmem:[#allocation44_spill] sm:$0xff] %v7213_v60  ;;  %v7224_v27 = vpop.f32.mrf.mxu3  ;;  %v7226_v35 = vpop.f32.mrf.mxu0 }
 0x157   : > { %10738 = vst [vmem:[#allocation45_spill] sm:$0xff] %v7226_v35  ;;  %v7231_v55 = vpop.f32.mrf.mxu1  ;;  %1449 = vmatpush.bf16.msrb.mxu0 %v4671_v38 }
 0x158   : > { %10739 = vst [vmem:[#allocation46_spill] sm:$0xff] %v7231_v55 }
 0x159   : > { %5073 = vmatmul.msk.bf16.gmra.mxu0 %vm904_vm0, %v6686_v56  ;;  %1492 = vmatpush.bf16.msrb.mxu1 %v4675_v44 }
 0x15a   : > { %5080 = vmatmul.msk.bf16.gmra.mxu1 %vm904_vm0, %v6686_v56  ;;  %5087 = vmatmul.msk.bf16.gmra.mxu2 %vm904_vm0, %v6686_v56 }
 0x15b   : > { %5094 = vmatmul.msk.bf16.gmra.mxu3 %vm904_vm0, %v6686_v56 }
 0x15d   : > { %v7241_v41 = vpop.f32.mrf.mxu2 }
 0x15e   : > { %10740 = vst [vmem:[#allocation47_spill] sm:$0xff] %v7241_v41  ;;  %v7243_v34 = vpop.f32.mrf.mxu3  ;;  %v7245_v60 = vpop.f32.mrf.mxu0 }
 0x15f   : > { %10741 = vst [vmem:[#allocation48_spill] sm:$0xff] %v7245_v60  ;;  %v7247_v53 = vpop.f32.mrf.mxu1 }
 0x160   : > { %10742 = vst [vmem:[#allocation49_spill] sm:$0xff] %v7247_v53 }
 0x165   : > { %v7249_v38 = vpop.f32.mrf.mxu2 }
 0x166   : > { %10743 = vst [vmem:[#allocation50_spill] sm:$0xff] %v7249_v38  ;;  %v7251_v43 = vpop.f32.mrf.mxu3  ;;  %v7253_v44 = vpop.f32.mrf.mxu0 }
 0x167   : > { %10744 = vst [vmem:[#allocation51_spill] sm:$0xff] %v7253_v44  ;;  %v7255_v55 = vpop.f32.mrf.mxu1 }
 0x168   : > { %10745 = vst [vmem:[#allocation52_spill] sm:$0xff] %v7255_v55 }
 0x169   : > { %5074 = vmatmul.msk.bf16.gmra.mxu0 %vm904_vm0, %v6703_v63 }
 0x16a   : > { %5081 = vmatmul.msk.bf16.gmra.mxu1 %vm904_vm0, %v6703_v63  ;;  %5088 = vmatmul.msk.bf16.gmra.mxu2 %vm904_vm0, %v6703_v63 }
 0x16b   : > { %5095 = vmatmul.msk.bf16.gmra.mxu3 %vm904_vm0, %v6703_v63 }
 0x16d   : > { %v7265_v41 = vpop.f32.mrf.mxu2 }
 0x16e   : > { %10746 = vst [vmem:[#allocation53_spill] sm:$0xff] %v7265_v41  ;;  %v7267_v38 = vpop.f32.mrf.mxu3  ;;  %v7269_v53 = vpop.f32.mrf.mxu0 }
 0x16f   : > { %10747 = vst [vmem:[#allocation54_spill] sm:$0xff] %v7269_v53  ;;  %v7271_v44 = vpop.f32.mrf.mxu1 }
 0x170   : > { %10748 = vst [vmem:[#allocation55_spill] sm:$0xff] %v7271_v44 }
 0x175   : > { %v7273_v55 = vpop.f32.mrf.mxu2 }
 0x176   : > { %10749 = vst [vmem:[#allocation56_spill] sm:$0xff] %v7273_v55  ;;  %v7275_v60 = vpop.f32.mrf.mxu3  ;;  %v7277_v35 = vpop.f32.mrf.mxu0  ;;  %v7292_v55 = vld [vmem:[%s10462_s2] sm:$0x7f] }
 0x177   : > { %10750 = vst [vmem:[#allocation57_spill] sm:$0xff] %v7277_v35  ;;  %v7279_v12 = vpop.f32.mrf.mxu1  ;;  %v7297_v35 = vperm.slane %v7292_v55, 0 }
 0x178   : > { %10751 = vst [vmem:[#allocation58_spill] sm:$0xff] %v7279_v12  ;;  %v1528_v12 = vmax.f32 %v6721_v0, %v7063_v61  ;;  %v1535_v61 = vmax.f32 %v6737_v4, %v7071_v45 }
 0x179   : > { %5096 = vmatmul.msk.bf16.vlgmr.msrb.gmra.mxu0 %vm904_vm0, %v6464_v22 }
 0x17a   : > { %5103 = vmatmul.msk.bf16.vlgmr.msrb.gmra.mxu1 %vm904_vm0, %v6464_v22  ;;  %v7300_v22 = vperm.slane %v7292_v55, 1 }
 0x17d   : > { %v7285_v41 = vpop.f32.mrf.mxu2 }
 0x17e   : > { %10752 = vst [vmem:[#allocation59_spill] sm:$0xff] %v7285_v41  ;;  %v7287_v16 = vpop.f32.mrf.mxu3  ;;  %v1139_v53 = vpop.f32.mrf.mxu0 }
 0x17f   : > { %v1182_v44 = vpop.f32.mrf.mxu1  ;;  %v7303_v53 = vadd.f32 %v7297_v35, %v1528_v12 }
 0x181   : > { %10753 = vst [vmem:[#allocation60_spill] sm:$0xff] %v7303_v53  ;;  %v10469_v0 = vmax.f32 %v7303_v53, 0.0 }
 0x185   : > { %v1225_v21 = vpop.f32.mrf.mxu2 }
 0x186   : > { %v1268_v41 = vpop.f32.mrf.mxu3  ;;  %v1279_v19 = vpop.f32.mrf.mxu0 }
 0x187   : > { %v1529_v44 = vmax.f32 %v6723_v1, %v1279_v19  ;;  %v7306_v20 = vpop.f32.mrf.mxu1 }
 0x189   : > { %v7309_v51 = vadd.f32 %v7300_v22, %v1529_v44  ;;  %5097 = vmatmul.msk.bf16.gmra.mxu0 %vm904_vm0, %v6476_v25  ;;  %v7328_v44 = vadd.f32 %v7297_v35, %v1535_v61 }
 0x18a   : > { %5104 = vmatmul.msk.bf16.gmra.mxu1 %vm904_vm0, %v6476_v25 }
 0x18b   : > { %10754 = vst [vmem:[#allocation61_spill] sm:$0xff] %v7309_v51  ;;  %v10468_v12 = vmax.f32 %v7309_v51, 0.0  ;;  %v10473_v45 = vmax.f32 %v7328_v44, 0.0 }
 0x18d   : > { %v7319_v21 = vpop.f32.mrf.mxu2  ;;  %v6003_v1 = vpack.i.bf16 %v10468_v12, %v10469_v0  ;;  %v1542_v12 = vmax.f32 %v6745_v9, %v7087_v54 }
 0x18e   : > { %v7325_v19 = vpop.f32.mrf.mxu3  ;;  %v1281_v41 = vpop.f32.mrf.mxu0 }
 0x18f   : > { %v1536_v25 = vmax.f32 %v6739_v5, %v1281_v41  ;;  %v7331_v39 = vpop.f32.mrf.mxu1  ;;  %6004 = vrot.lane.b32.xlu0 %v6003_v1, %s6232_s19  ;;  %v7350_v41 = vadd.f32 %v7297_v35, %v1542_v12  ;;  %v1549_v12 = vmax.f32 %v6761_v13, %v7095_v46 }
 0x191   : > { %v7335_v4 = vadd.f32 %v7300_v22, %v1536_v25  ;;  %10756 = vst [vmem:[#allocation63_spill] sm:$0xff] %v7350_v41  ;;  %v10476_v54 = vmax.f32 %v7350_v41, 0.0 }
 0x193   : > { %10755 = vst [vmem:[#allocation62_spill] sm:$0xff] %v7335_v4  ;;  %v10472_v0 = vmax.f32 %v7335_v4, 0.0 }
 0x195   : > { %v7341_v51 = vpop.f32.mrf.mxu2  ;;  %v6008_v5 = vpack.i.bf16 %v10472_v0, %v10473_v45  ;;  %v7376_v45 = vadd.f32 %v7297_v35, %v1549_v12 }
 0x196   : > { %v7347_v61 = vpop.f32.mrf.mxu3  ;;  %v1284_v1 = vpop.f32.mrf.mxu0 }
 0x197   : > { %v1543_v25 = vmax.f32 %v6747_v10, %v1284_v1  ;;  %v7353_v53 = vpop.f32.mrf.mxu1  ;;  %6009 = vrot.lane.b32.xlu0 %v6008_v5, %s6232_s19  ;;  %v10480_v46 = vmax.f32 %v7376_v45, 0.0 }
 0x199   : > { %v7357_v9 = vadd.f32 %v7300_v22, %v1543_v25  ;;  %5098 = vmatmul.msk.bf16.gmra.mxu0 %vm904_vm0, %v6488_v28 }
 0x19a   : > { %5105 = vmatmul.msk.bf16.gmra.mxu1 %vm904_vm0, %v6488_v28 }
 0x19b   : > { %10757 = vst [vmem:[#allocation64_spill] sm:$0xff] %v7357_v9  ;;  %v10475_v10 = vmax.f32 %v7357_v9, 0.0 }
 0x19d   : > { %v7367_v1 = vpop.f32.mrf.mxu2  ;;  %v6013_v5 = vpack.i.bf16 %v10475_v10, %v10476_v54  ;;  %v1556_v10 = vmax.f32 %v6769_v17, %v7120_v48 }
 0x19e   : > { %v7373_v25 = vpop.f32.mrf.mxu3  ;;  %v1286_v0 = vpop.f32.mrf.mxu0 }
 0x19f   : > { %v1550_v28 = vmax.f32 %v6763_v14, %v1286_v0  ;;  %v7379_v4 = vpop.f32.mrf.mxu1  ;;  %6014 = vrot.lane.b32.xlu1 %v6013_v5, %s6232_s19  ;;  %v7398_v5 = vadd.f32 %v7297_v35, %v1556_v10  ;;  %v1563_v10 = vmax.f32 %v6794_v26, %v7152_v29 }
 0x1a1   : > { %v7383_v13 = vadd.f32 %v7300_v22, %v1550_v28  ;;  %10759 = vst [vmem:[#allocation66_spill] sm:$0xff] %v7398_v5  ;;  %v10483_v48 = vmax.f32 %v7398_v5, 0.0 }
 0x1a3   : > { %10758 = vst [vmem:[#allocation65_spill] sm:$0xff] %v7383_v13  ;;  %v10479_v54 = vmax.f32 %v7383_v13, 0.0 }
 0x1a5   : > { %v7389_v9 = vpop.f32.mrf.mxu2  ;;  %v6018_v14 = vpack.i.bf16 %v10479_v54, %v10480_v46  ;;  %v7424_v46 = vadd.f32 %v7297_v35, %v1563_v10 }
 0x1a6   : > { %v7395_v0 = vpop.f32.mrf.mxu3  ;;  %v1289_v12 = vpop.f32.mrf.mxu0 }
 0x1a7   : > { %v1557_v28 = vmax.f32 %v6771_v18, %v1289_v12  ;;  %v7401_v41 = vpop.f32.mrf.mxu1  ;;  %6019 = vrot.lane.b32.xlu1 %v6018_v14, %s6232_s19  ;;  %v10487_v29 = vmax.f32 %v7424_v46, 0.0 }
 0x1a9   : > { %v7405_v17 = vadd.f32 %v7300_v22, %v1557_v28  ;;  %5099 = vmatmul.msk.bf16.gmra.mxu0 %vm904_vm0, %v6500_v31 }
 0x1aa   : > { %5106 = vmatmul.msk.bf16.gmra.mxu1 %vm904_vm0, %v6500_v31 }
 0x1ab   : > { %10760 = vst [vmem:[#allocation67_spill] sm:$0xff] %v7405_v17  ;;  %v10482_v18 = vmax.f32 %v7405_v17, 0.0 }
 0x1ad   : > { %v7415_v12 = vpop.f32.mrf.mxu2  ;;  %v6023_v14 = vpack.i.bf16 %v10482_v18, %v10483_v48  ;;  %v1570_v18 = vmax.f32 %v6850_v57, %v7192_v24 }
 0x1ae   : > { %v7421_v28 = vpop.f32.mrf.mxu3  ;;  %v1291_v54 = vpop.f32.mrf.mxu0 }
 0x1af   : > { %v1564_v31 = vmax.f32 %v6805_v33, %v1291_v54  ;;  %v7427_v13 = vpop.f32.mrf.mxu1  ;;  %6024 = vrot.lane.b32.xlu2 %v6023_v14, %s6232_s19  ;;  %v7446_v14 = vadd.f32 %v7297_v35, %v1570_v18  ;;  %v1577_v18 = vmax.f32 %v6914_v49, %v7224_v27 }
 0x1b1   : > { %v7431_v26 = vadd.f32 %v7300_v22, %v1564_v31  ;;  %10762 = vst [vmem:[#allocation69_spill] sm:$0xff] %v7446_v14  ;;  %v10490_v57 = vmax.f32 %v7446_v14, 0.0 }
 0x1b3   : > { %10761 = vst [vmem:[#allocation68_spill] sm:$0xff] %v7431_v26  ;;  %v10486_v48 = vmax.f32 %v7431_v26, 0.0 }
 0x1b5   : > { %v7437_v17 = vpop.f32.mrf.mxu2  ;;  %v6028_v33 = vpack.i.bf16 %v10486_v48, %v10487_v29  ;;  %v7472_v29 = vadd.f32 %v7297_v35, %v1577_v18 }
 0x1b6   : > { %v7443_v54 = vpop.f32.mrf.mxu3  ;;  %v1294_v10 = vpop.f32.mrf.mxu0 }
 0x1b7   : > { %v1571_v31 = vmax.f32 %v6861_v62, %v1294_v10  ;;  %v7449_v5 = vpop.f32.mrf.mxu1  ;;  %6029 = vrot.lane.b32.xlu2 %v6028_v33, %s6232_s19  ;;  %v10494_v27 = vmax.f32 %v7472_v29, 0.0 }
 0x1b9   : > { %v7453_v24 = vadd.f32 %v7300_v22, %v1571_v31  ;;  %5100 = vmatmul.msk.bf16.gmra.mxu0 %vm904_vm0, %v6584_v6 }
 0x1ba   : > { %5107 = vmatmul.msk.bf16.gmra.mxu1 %vm904_vm0, %v6584_v6 }
 0x1bb   : > { %10763 = vst [vmem:[#allocation70_spill] sm:$0xff] %v7453_v24  ;;  %v10489_v62 = vmax.f32 %v7453_v24, 0.0 }
 0x1bd   : > { %v7463_v10 = vpop.f32.mrf.mxu2  ;;  %v6033_v33 = vpack.i.bf16 %v10489_v62, %v10490_v57  ;;  %v1584_v62 = vmax.f32 %v6970_v47, %v7243_v34 }
 0x1be   : > { %v7469_v31 = vpop.f32.mrf.mxu3  ;;  %v1296_v48 = vpop.f32.mrf.mxu0 }
 0x1bf   : > { %v1578_v6 = vmax.f32 %v6925_v58, %v1296_v48  ;;  %v7475_v26 = vpop.f32.mrf.mxu1  ;;  %6034 = vrot.lane.b32.xlu0 %v6033_v33, %s6232_s19  ;;  %v7494_v33 = vadd.f32 %v7297_v35, %v1584_v62  ;;  %v1591_v62 = vmax.f32 %v7001_v30, %v7251_v43  ;;  %v1537_v30 = vmax.f32 %v6741_v7, %v7331_v39 }
 0x1c0   : > { %v1598_v7 = vmax.f32 %v7009_v36, %v7267_v38  ;;  %v1530_v39 = vmax.f32 %v6733_v2, %v7306_v20  ;;  %v5184_v36 = vld [vmem:[%s10463_s3 + $0x90] sm:$0xf]  ;;  %v5855_v2 = vld [vmem:[%s10463_s3 + $0x98] sm:$0xf0] }
 0x1c1   : > { %v7479_v49 = vadd.f32 %v7300_v22, %v1578_v6  ;;  %v10497_v34 = vmax.f32 %v7494_v33, 0.0 }
 0x1c3   : > { %10764 = vst [vmem:[#allocation71_spill] sm:$0xff] %v7479_v49  ;;  %v10493_v57 = vmax.f32 %v7479_v49, 0.0 }
 0x1c5   : > { %v7485_v24 = vpop.f32.mrf.mxu2  ;;  %v6038_v58 = vpack.i.bf16 %v10493_v57, %v10494_v27  ;;  %v7520_v27 = vadd.f32 %v7297_v35, %v1591_v62  ;;  %v5858_v62 = vld [vmem:[%s10463_s3 + $0xb0] sm:$0xf0] }
 0x1c6   : > { %v7491_v48 = vpop.f32.mrf.mxu3  ;;  %v1299_v18 = vpop.f32.mrf.mxu0 }
 0x1c7   : > { %v1585_v6 = vmax.f32 %v6981_v59, %v1299_v18  ;;  %v7497_v14 = vpop.f32.mrf.mxu1  ;;  %6039 = vrot.lane.b32.xlu1 %v6038_v58, %s6232_s19  ;;  %10766 = vst [vmem:[#allocation73_spill] sm:$0xff] %v7520_v27 }
 0x1c9   : > { %v7501_v47 = vadd.f32 %v7300_v22, %v1585_v6  ;;  %5101 = vmatmul.msk.bf16.gmra.mxu0 %vm904_vm0, %v6686_v56 }
 0x1ca   : > { %5108 = vmatmul.msk.bf16.gmra.mxu1 %vm904_vm0, %v6686_v56 }
 0x1cb   : > { %10765 = vst [vmem:[#allocation72_spill] sm:$0xff] %v7501_v47  ;;  %v10496_v59 = vmax.f32 %v7501_v47, 0.0 }
 0x1cd   : > { %v7511_v18 = vpop.f32.mrf.mxu2  ;;  %v6043_v58 = vpack.i.bf16 %v10496_v59, %v10497_v34  ;;  %v5196_v59 = vld [vmem:[%s10463_s3 + $0xa8] sm:$0xf] }
 0x1ce   : > { %v7517_v6 = vpop.f32.mrf.mxu3  ;;  %v1301_v57 = vpop.f32.mrf.mxu0 }
 0x1cf   : > { %v1592_v56 = vmax.f32 %v7003_v32, %v1301_v57  ;;  %v7523_v49 = vpop.f32.mrf.mxu1  ;;  %6044 = vrot.lane.b32.xlu2 %v6043_v58, %s6232_s19  ;;  %v7538_v32 = vperm.slane %v7292_v55, 2  ;;  %v5197_v57 = vor.u32 %v5858_v62, %v5196_v59  ;;  %v10500_v58 = vmax.f32 %v7520_v27, 0.0 }
 0x1d0   : > { %v7564_v62 = vadd.f32 %v7297_v35, %v1598_v7  ;;  %v5172_v7 = vld [vmem:[%s10463_s3 + $0x78] sm:$0xf] }
 0x1d1   : > { %v7529_v43 = vadd.f32 %v7300_v22, %v1592_v56  ;;  %3422 = vmatpush.bf16.msrb.mxu2 %v5197_v57  ;;  %v7547_v34 = vadd.f32 %v7538_v32, %v1537_v30  ;;  %v5185_v30 = vor.u32 %v5855_v2, %v5184_v36  ;;  %v7567_v57 = vadd.f32 %v7538_v32, %v1530_v39 }
 0x1d3   : > { %10767 = vst [vmem:[#allocation74_spill] sm:$0xff] %v7529_v43  ;;  %v10499_v56 = vmax.f32 %v7529_v43, 0.0  ;;  %v10505_v43 = vmax.f32 %v7547_v34, 0.0  ;;  %v10504_v36 = vmax.f32 %v7567_v57, 0.0 }
 0x1d4   : > { %10768 = vst [vmem:[#allocation75_spill] sm:$0xff] %v7567_v57 }
 0x1d5   : > { %v7549_v47 = vpop.f32.mrf.mxu2  ;;  %v6048_v59 = vpack.i.bf16 %v10499_v56, %v10500_v58  ;;  %3423 = vmatpush.bf16.msrb.mxu2 %v5185_v30  ;;  %v6063_v30 = vpack.i.bf16 %v10505_v43, %v10504_v36 }
 0x1d6   : > { %v7561_v20 = vpop.f32.mrf.mxu3  ;;  %v1304_v38 = vpop.f32.mrf.mxu0 }
 0x1d7   : > { %v1599_v56 = vmax.f32 %v7011_v37, %v1304_v38  ;;  %v7570_v58 = vpop.f32.mrf.mxu1  ;;  %6049 = vrot.lane.b32.xlu0 %v6048_v59, %s6232_s19  ;;  %v5852_v37 = vld [vmem:[%s10463_s3 + $0x80] sm:$0xf0]  ;;  %v10507_v59 = vmax.f32 %v7564_v62, 0.0 }
 0x1d8   : > { %v5173_v39 = vor.u32 %v5852_v37, %v5172_v7 }
 0x1d9   : > { %v7575_v27 = vadd.f32 %v7300_v22, %v1599_v56  ;;  %5102 = vmatmul.msk.bf16.gmra.mxu0 %vm904_vm0, %v6703_v63  ;;  %v1605_v56 = vmax.f32 %v7025_v40, %v7275_v60  ;;  %v5160_v40 = vld [vmem:[%s10463_s3 + $0x60] sm:$0xf]  ;;  %v5849_v60 = vld [vmem:[%s10463_s3 + $0x68] sm:$0xf0] }
 0x1da   : > { %5109 = vmatmul.msk.bf16.gmra.mxu1 %vm904_vm0, %v6703_v63  ;;  %3424 = vmatpush.bf16.msrb.mxu2 %v5173_v39  ;;  %v5161_v39 = vor.u32 %v5849_v60, %v5160_v40 }
 0x1db   : > { %10769 = vst [vmem:[#allocation76_spill] sm:$0xff] %v7575_v27  ;;  %v10506_v2 = vmax.f32 %v7575_v27, 0.0  ;;  %v7611_v57 = vadd.f32 %v7297_v35, %v1605_v56  ;;  %v5148_v56 = vld [vmem:[%s10463_s3 + $0x48] sm:$0xf] }
 0x1dd   : > { %v7592_v38 = vpop.f32.mrf.mxu2  ;;  %v6053_v63 = vpack.i.bf16 %v10506_v2, %v10507_v59  ;;  %v1551_v2 = vmax.f32 %v6765_v15, %v7379_v4  ;;  %v1544_v15 = vmax.f32 %v6757_v11, %v7353_v53  ;;  %v5843_v11 = vld [vmem:[%s10463_s3 + $0x38] sm:$0xf0] }
 0x1de   : > { %v7608_v7 = vpop.f32.mrf.mxu3  ;;  %v1306_v37 = vpop.f32.mrf.mxu0  ;;  %3425 = vmatpush.bf16.msrb.mxu2 %v5161_v39 }
 0x1df   : > { %v1606_v36 = vmax.f32 %v7027_v42, %v1306_v37  ;;  %v7614_v43 = vpop.f32.mrf.mxu1  ;;  %6064 = vrot.lane.b32.xlu0 %v6063_v30, %s6232_s19  ;;  %6054 = vrot.lane.b32.xlu1 %v6053_v63, %s6232_s19  ;;  %v5846_v42 = vld [vmem:[%s10463_s3 + $0x50] sm:$0xf0]  ;;  %v10509_v30 = vmax.f32 %v7611_v57, 0.0  ;;  %v1612_v63 = vmax.f32 %v7033_v50, %v7287_v16  ;;  %v5136_v16 = vld [vmem:[%s10463_s3 + $0x30] sm:$0xf] }
 0x1e0   : > { %v5149_v40 = vor.u32 %v5846_v42, %v5148_v56  ;;  %v7656_v56 = vadd.f32 %v7538_v32, %v1544_v15 }
 0x1e1   : > { %v7621_v59 = vadd.f32 %v7300_v22, %v1606_v36  ;;  %v7636_v36 = vadd.f32 %v7538_v32, %v1551_v2  ;;  %v5137_v2 = vor.u32 %v5843_v11, %v5136_v16  ;;  %v7653_v39 = vadd.f32 %v7297_v35, %v1612_v63  ;;  %v5124_v35 = vld [vmem:[%s10463_s3 + $0x18] sm:$0xf] }
 0x1e2   : > { %3426 = vmatpush.bf16.msrb.mxu2 %v5149_v40  ;;  %10773 = vst [vmem:[#allocation80_spill] sm:$0xff] %v7656_v56  ;;  %v7675_v63 = vperm.slane %v7292_v55, 3 }
 0x1e3   : > { %10770 = vst [vmem:[#allocation77_spill] sm:$0xff] %v7621_v59  ;;  %v10508_v4 = vmax.f32 %v7621_v59, 0.0 }
 0x1e4   : > { %10771 = vst [vmem:[#allocation78_spill] sm:$0xff] %v7636_v36 }
 0x1e5   : > { %v7638_v60 = vpop.f32.mrf.mxu2  ;;  %v6058_v37 = vpack.i.bf16 %v10508_v4, %v10509_v30  ;;  %10772 = vst [vmem:[#allocation79_spill] sm:$0xff] %v7653_v39  ;;  %v1538_v4 = vmax.f32 %v6743_v8, %v7341_v51  ;;  %v10510_v30 = vmax.f32 %v7636_v36, 0.0  ;;  %v1531_v8 = vmax.f32 %v6735_v3, %v7319_v21  ;;  %v5112_v21 = vld [vmem:[%s10463_s3] sm:$0xf] }
 0x1e6   : > { %v7650_v50 = vpop.f32.mrf.mxu3  ;;  %v1309_v53 = vpop.f32.mrf.mxu0  ;;  %3427 = vmatpush.bf16.msrb.mxu2 %v5137_v2  ;;  %v10512_v51 = vmax.f32 %v7656_v56, 0.0  ;;  %v10788_v36 = vld [vmem:[#allocation2_spill] sm:$0xff] }
 0x1e7   : > { %v1613_v42 = vmax.f32 %v7035_v52, %v1309_v53  ;;  %v7659_v40 = vpop.f32.mrf.mxu1  ;;  %6059 = vrot.lane.b32.xlu2 %v6058_v37, %s6232_s19  ;;  %v5840_v52 = vld [vmem:[%s10463_s3 + $0x20] sm:$0xf0]  ;;  %v10513_v37 = vmax.f32 %v7653_v39, 0.0  ;;  %v7683_v11 = vadd.f32 %v7675_v63, %v1538_v4  ;;  %v5837_v4 = vld [vmem:[%s10463_s3 + $0x8] sm:$0xf0] }
 0x1e8   : > { %v5125_v15 = vor.u32 %v5840_v52, %v5124_v35  ;;  %v6073_v2 = vpack.i.bf16 %v10510_v30, %v10512_v51  ;;  %v5113_v52 = vor.u32 %v5837_v4, %v5112_v21  ;;  %v7716_v21 = vperm.slane %v7292_v55, 5 }
 0x1e9   : > { %v7666_v16 = vadd.f32 %v7300_v22, %v1613_v42  ;;  %10775 = vst [vmem:[#allocation82_spill] sm:$0xff] %v7683_v11 }
 0x1ea   : > { %3428 = vmatpush.bf16.msrb.mxu2 %v5125_v15  ;;  %v7704_v15 = vadd.f32 %v7675_v63, %v1531_v8 }
 0x1eb   : > { %10774 = vst [vmem:[#allocation81_spill] sm:$0xff] %v7666_v16  ;;  %v10511_v22 = vmax.f32 %v7666_v16, 0.0  ;;  %v7713_v16 = vperm.slane %v7292_v55, 4 }
 0x1ec   : > { %10776 = vst [vmem:[#allocation83_spill] sm:$0xff] %v7704_v15  ;;  %v10518_v51 = vmax.f32 %v7704_v15, 0.0  ;;  %v10804_v15 = vmax.f32 %v7328_v44, 0.0  ;;  %v10810_v44 = vld [vmem:[#allocation7_spill] sm:$0xff] }
 0x1ed   : > { %v7685_v53 = vpop.f32.mrf.mxu2  ;;  %v6068_v3 = vpack.i.bf16 %v10511_v22, %v10513_v37  ;;  %v10517_v22 = vmax.f32 %v7683_v11, 0.0  ;;  %v1532_v37 = vmax.f32 %v7049_v23, %v7325_v19  ;;  %v10779_v19 = vld [vmem:[#allocation6_spill] sm:$0xff] }
 0x1ee   : > { %v7701_v42 = vpop.f32.mrf.mxu3  ;;  %v1311_v35 = vpop.f32.mrf.mxu0  ;;  %3429 = vmatpush.bf16.msrb.mxu2 %v5113_v52  ;;  %v1565_v59 = vmax.f32 %v10779_v19, %v7427_v13 }
 0x1ef   : > { %v1354_v30 = vpop.f32.mrf.mxu1  ;;  %6074 = vrot.lane.b32.xlu2 %v6073_v2, %s6232_s19  ;;  %6069 = vrot.lane.b32.xlu1 %v6068_v3, %s6232_s19  ;;  %v7723_v4 = vadd.f32 %v7713_v16, %v1532_v37  ;;  %v10778_v35 = vld [vmem:[#allocation22_spill] sm:$0xff]  ;;  %v10782_v37 = vld [vmem:[#allocation4_spill] sm:$0xff] }
 0x1f0   : > { %v6088_v30 = vpack.i.bf16 %v10517_v22, %v10518_v51  ;;  %v1558_v51 = vmax.f32 %v10782_v37, %v7401_v41 }
 0x1f1   : > { %10777 = vst [vmem:[#allocation84_spill] sm:$0xff] %v7723_v4  ;;  %v10522_v22 = vmax.f32 %v7723_v4, 0.0 }
 0x1f2   : > { %v7751_v19 = vadd.f32 %v7538_v32, %v1558_v51 }
 0x1f4   : > { %10785 = vst [vmem:[#allocation4_spill] sm:$0xff] %v7751_v19 }
 0x1f5   : > { %v1397_v8 = vpop.f32.mrf.mxu2 }
 0x1f6   : > { %v1451_v2 = vpop.f32.mrf.mxu0  ;;  %v1440_v3 = vpop.f32.mrf.mxu3  ;;  %v10781_v8 = vld [vmem:[#allocation24_spill] sm:$0xff] }
 0x1f7   : > { %v1533_v52 = vmax.f32 %v10778_v35, %v1451_v2  ;;  %v7726_v23 = vpop.f32.mrf.mxu1  ;;  %6089 = vrot.lane.b32.xlu2 %v6088_v30, %s6232_s19  ;;  %v1539_v3 = vmax.f32 %v10781_v8, %v7347_v61  ;;  %v7741_v35 = vadd.f32 %v7538_v32, %v1565_v59  ;;  %v10786_v61 = vld [vmem:[#allocation25_spill] sm:$0xff]  ;;  %v10787_v59 = vld [vmem:[#allocation3_spill] sm:$0xff] }
 0x1f8   : > { %v1552_v37 = vmax.f32 %v10787_v59, %v7389_v9 }
 0x1f9   : > { %v7732_v27 = vadd.f32 %v7716_v21, %v1533_v52  ;;  %10783 = vst [vmem:[#allocation6_spill] sm:$0xff] %v7741_v35  ;;  %v7748_v52 = vadd.f32 %v7713_v16, %v1539_v3 }
 0x1fa   : > { %v7773_v9 = vadd.f32 %v7675_v63, %v1552_v37 }
 0x1fb   : > { %10780 = vst [vmem:[#allocation22_spill] sm:$0xff] %v7732_v27  ;;  %v10521_v2 = vmax.f32 %v7732_v27, 0.0  ;;  %v1545_v27 = vmax.f32 %v10788_v36, %v7367_v1  ;;  %v10529_v51 = vmax.f32 %v7748_v52, 0.0 }
 0x1fc   : > { %10784 = vst [vmem:[#allocation24_spill] sm:$0xff] %v7748_v52  ;;  %v10802_v52 = vld [vmem:[#allocation60_spill] sm:$0xff] }
 0x1fd   : > { %v6078_v13 = vpack.i.bf16 %v10521_v2, %v10522_v22  ;;  %v10526_v2 = vmax.f32 %v7741_v35, 0.0  ;;  %10791 = vst [vmem:[#allocation3_spill] sm:$0xff] %v7773_v9  ;;  %v7776_v1 = vadd.f32 %v7675_v63, %v1545_v27  ;;  %v10793_v27 = vld [vmem:[#allocation28_spill] sm:$0xff]  ;;  %v10803_v4 = vmax.f32 %v10802_v52, 0.0 }
 0x1fe   : > { %v1453_v30 = vpop.f32.mrf.mxu0 }
 0x1ff   : > { %v1540_v8 = vmax.f32 %v10786_v61, %v1453_v30  ;;  %v7754_v41 = vpop.f32.mrf.mxu1  ;;  %6079 = vrot.lane.b32.xlu0 %v6078_v13, %s6232_s19  ;;  %v10790_v30 = vld [vmem:[#allocation27_spill] sm:$0xff]  ;;  %v10528_v13 = vmax.f32 %v7751_v19, 0.0 }
 0x200   : > { %v1546_v61 = vmax.f32 %v10790_v30, %v7373_v25 }
 0x201   : > { %v7763_v3 = vadd.f32 %v7716_v21, %v1540_v8  ;;  %v7765_v22 = vpop.permute.xlu0 %6004  ;;  %v6093_v36 = vpack.i.bf16 %v10526_v2, %v10528_v13  ;;  %v10794_v13 = vld [vmem:[#allocation10_spill] sm:$0xff] }
 0x202   : > { %v6006_v59 = vunpack.i.l.bf16 %v7765_v22  ;;  %v7789_v37 = vadd.f32 %v7713_v16, %v1546_v61 }
 0x203   : > { %10789 = vst [vmem:[#allocation25_spill] sm:$0xff] %v7763_v3  ;;  %v10527_v56 = vmax.f32 %v7763_v3, 0.0  ;;  %v10797_v3 = vunpack.i.h.bf16 %v7765_v22 }
 0x204   : > { %10792 = vst [vmem:[#allocation2_spill] sm:$0xff] %v7789_v37 }
 0x205   : > { %v6083_v25 = vpack.i.bf16 %v10527_v56, %v10529_v51  ;;  %v1579_v51 = vmax.f32 %v10794_v13, %v7475_v26  ;;  %v10798_v26 = vld [vmem:[#allocation8_spill] sm:$0xff] }
 0x206   : > { %v1456_v30 = vpop.f32.mrf.mxu0  ;;  %v1572_v13 = vmax.f32 %v10798_v26, %v7449_v5  ;;  %v10805_v26 = vmax.f32 %v7789_v37, 0.0  ;;  %v10822_v37 = vld [vmem:[#allocation63_spill] sm:$0xff] }
 0x207   : > { %v1547_v11 = vmax.f32 %v10793_v27, %v1456_v30  ;;  %v7792_v19 = vpop.f32.mrf.mxu1  ;;  %6094 = vrot.lane.b32.xlu0 %v6093_v36, %s6232_s19  ;;  %6084 = vrot.lane.b32.xlu1 %v6083_v25, %s6232_s19  ;;  %v10796_v30 = vld [vmem:[#allocation30_spill] sm:$0xff]  ;;  %v2091_v36 = vsel %vm2090_vm1, %v6006_v59, %v10797_v3  ;;  %v7824_v59 = vadd.f32 %v7538_v32, %v1579_v51 }
 0x208   : > { %v1553_v27 = vmax.f32 %v10796_v30, %v7395_v0  ;;  %v10799_v0 = vmax.f32 %v7776_v1, 0.0  ;;  %v10800_v30 = vmax.f32 %v7773_v9, 0.0  ;;  %v2260_v56 = vmax.f32 %v10803_v4, %v2091_v36 }
 0x209   : > { %v7801_v8 = vadd.f32 %v7716_v21, %v1547_v11  ;;  %v7803_v61 = vpop.permute.xlu0 %6009  ;;  %10801 = vst [vmem:[#allocation28_spill] sm:$0xff] %v7824_v59 }
 0x20a   : > { %v10536_v25 = vunpack.i.h.bf16 %v7803_v61  ;;  %v6011_v2 = vunpack.i.l.bf16 %v7803_v61  ;;  %v6108_v3 = vpack.i.bf16 %v10800_v30, %v10799_v0  ;;  %v7838_v0 = vadd.f32 %v7538_v32, %v1572_v13  ;;  %v10809_v30 = vld [vmem:[#allocation31_spill] sm:$0xff] }
 0x20b   : > { %10795 = vst [vmem:[#allocation27_spill] sm:$0xff] %v7801_v8  ;;  %v10537_v11 = vmax.f32 %v7801_v8, 0.0 }
 0x20c   : > { %v2097_v35 = vsel %vm2090_vm1, %v6011_v2, %v10536_v25  ;;  %v7835_v2 = vadd.f32 %v7713_v16, %v1553_v27  ;;  %10807 = vst [vmem:[#allocation30_spill] sm:$0xff] %v7838_v0 }
 0x20d   : > { %v2267_v5 = vmax.f32 %v10804_v15, %v2097_v35  ;;  %v6098_v39 = vpack.i.bf16 %v10537_v11, %v10805_v26  ;;  %v1566_v15 = vmax.f32 %v10810_v44, %v7437_v17  ;;  %v10538_v35 = vmax.f32 %v7824_v59, 0.0  ;;  %v10814_v11 = vld [vmem:[#allocation34_spill] sm:$0xff] }
 0x20e   : > { %10806 = vst [vmem:[#allocation10_spill] sm:$0xff] %v7835_v2  ;;  %v1458_v25 = vpop.f32.mrf.mxu0  ;;  %v10541_v36 = vmax.f32 %v7835_v2, 0.0 }
 0x20f   : > { %v7840_v51 = vpack.c.bf16 %v2267_v5, %v2260_v56  ;;  %v1554_v52 = vmax.f32 %v10809_v30, %v1458_v25  ;;  %v7843_v4 = vpop.f32.mrf.mxu1  ;;  %6109 = vrot.lane.b32.xlu0 %v6108_v3, %s6232_s19  ;;  %6099 = vrot.lane.b32.xlu1 %v6098_v39, %s6232_s19  ;;  %v10812_v25 = vld [vmem:[#allocation5_spill] sm:$0xff]  ;;  %v10539_v5 = vmax.f32 %v7838_v0, 0.0  ;;  %v7864_v26 = vadd.f32 %v7675_v63, %v1566_v15 }
 0x210   : > { %v1559_v13 = vmax.f32 %v10812_v25, %v7415_v12  ;;  %v10813_v3 = vld [vmem:[#allocation33_spill] sm:$0xff] }
 0x211   : > { %10808 = vst [vmem:[#allocation8_spill] sm:$0xff] %v7840_v51  ;;  %v7851_v27 = vadd.f32 %v7716_v21, %v1554_v52  ;;  %3430 = vmatmul.bf16.vlgmr.msrb.gmra.mxu2 %v7840_v51  ;;  %v7854_v56 = vpop.permute.xlu1 %6014  ;;  %v1560_v39 = vmax.f32 %v10813_v3, %v7421_v28  ;;  %v6113_v30 = vpack.i.bf16 %v10538_v35, %v10539_v5  ;;  %v7882_v3 = vpop.permute.xlu2 %6024 }
 0x212   : > { %v6016_v28 = vunpack.i.l.bf16 %v7854_v56  ;;  %v7877_v25 = vadd.f32 %v7675_v63, %v1559_v13  ;;  %v10816_v13 = vld [vmem:[#allocation36_spill] sm:$0xff] }
 0x213   : > { %10811 = vst [vmem:[#allocation60_spill] sm:$0xff] %v7851_v27  ;;  %v10540_v17 = vmax.f32 %v7851_v27, 0.0  ;;  %v7880_v15 = vadd.f32 %v7713_v16, %v1560_v39  ;;  %v1567_v51 = vmax.f32 %v10816_v13, %v7443_v54  ;;  %v10817_v39 = vld [vmem:[#allocation12_spill] sm:$0xff]  ;;  %v5388_v54 = vld [vmem:[%s10463_s3 + $0x228] sm:$0xf] }
 0x214   : > { %v1586_v27 = vmax.f32 %v10817_v39, %v7497_v14  ;;  %v5906_v13 = vld [vmem:[%s10463_s3 + $0x230] sm:$0xf0]  ;;  %v10552_v39 = vmax.f32 %v7877_v25, 0.0 }
 0x215   : > { %v6103_v12 = vpack.i.bf16 %v10540_v17, %v10541_v36  ;;  %v10815_v36 = vld [vmem:[#allocation14_spill] sm:$0xff]  ;;  %v10553_v17 = vmax.f32 %v7880_v15, 0.0  ;;  %v5389_v0 = vor.u32 %v5906_v13, %v5388_v54  ;;  %v10823_v54 = vmax.f32 %v10822_v37, 0.0 }
 0x216   : > { %v1461_v44 = vpop.f32.mrf.mxu0  ;;  %v1593_v52 = vmax.f32 %v10815_v36, %v7523_v49  ;;  %v10819_v49 = vunpack.i.h.bf16 %v7854_v56  ;;  %v7952_v37 = vadd.f32 %v7538_v32, %v1586_v27  ;;  %v10829_v27 = vld [vmem:[#allocation9_spill] sm:$0xff] }
 0x217   : > { %v1561_v35 = vmax.f32 %v10814_v11, %v1461_v44  ;;  %v7885_v5 = vpop.f32.mrf.mxu1  ;;  %6114 = vrot.lane.b32.xlu1 %v6113_v30, %s6232_s19  ;;  %6104 = vrot.lane.b32.xlu2 %v6103_v12, %s6232_s19  ;;  %v5292_v30 = vld [vmem:[%s10463_s3 + $0x168] sm:$0xf]  ;;  %v5882_v12 = vld [vmem:[%s10463_s3 + $0x170] sm:$0xf0] }
 0x218   : > { %v2103_v14 = vsel %vm2090_vm1, %v6016_v28, %v10819_v49  ;;  %v5293_v44 = vor.u32 %v5882_v12, %v5292_v30  ;;  %v7922_v2 = vadd.f32 %v7538_v32, %v1593_v52  ;;  %v10821_v30 = vmax.f32 %v7864_v26, 0.0  ;;  %3508 = vmatpush.bf16.msra.mxu0 %v5389_v0  ;;  %10826 = vst [vmem:[#allocation33_spill] sm:$0xff] %v7952_v37 }
 0x219   : > { %v7897_v8 = vadd.f32 %v7716_v21, %v1561_v35  ;;  %v7899_v11 = vpop.permute.xlu1 %6019  ;;  %v2274_v13 = vmax.f32 %v10823_v54, %v2103_v14  ;;  %v10824_v52 = vmax.f32 %v7376_v45, 0.0  ;;  %v5903_v14 = vld [vmem:[%s10463_s3 + $0x218] sm:$0xf0] }
 0x21a   : > { %v10554_v35 = vunpack.i.h.bf16 %v7899_v11  ;;  %v6021_v36 = vunpack.i.l.bf16 %v7899_v11  ;;  %10820 = vst [vmem:[#allocation7_spill] sm:$0xff] %v7922_v2  ;;  %3465 = vmatpush.bf16.msrb.mxu3 %v5293_v44  ;;  %v6128_v12 = vpack.i.bf16 %v10821_v30, %v10552_v39  ;;  %v5879_v44 = vld [vmem:[%s10463_s3 + $0x158] sm:$0xf0]  ;;  %v5376_v30 = vld [vmem:[%s10463_s3 + $0x210] sm:$0xf] }
 0x21b   : > { %10818 = vst [vmem:[#allocation31_spill] sm:$0xff] %v7897_v8  ;;  %v10551_v59 = vmax.f32 %v7897_v8, 0.0  ;;  %v7969_v8 = vpop.permute.xlu2 %6029 }
 0x21c   : > { %v2109_v28 = vsel %vm2090_vm1, %v6021_v36, %v10554_v35  ;;  %v5280_v36 = vld [vmem:[%s10463_s3 + $0x150] sm:$0xf]  ;;  %v10556_v35 = vmax.f32 %v7922_v2, 0.0  ;;  %v10837_v2 = vunpack.i.h.bf16 %v7969_v8 }
 0x21d   : > { %v6118_v49 = vpack.i.bf16 %v10551_v59, %v10553_v17  ;;  %v2281_v9 = vmax.f32 %v10824_v52, %v2109_v28  ;;  %v7949_v59 = vadd.f32 %v7713_v16, %v1567_v51  ;;  %v5281_v0 = vor.u32 %v5879_v44, %v5280_v36  ;;  %v10827_v28 = vld [vmem:[#allocation37_spill] sm:$0xff]  ;;  %v10830_v36 = vld [vmem:[#allocation11_spill] sm:$0xff] }
 0x21e   : > { %v1463_v45 = vpop.f32.mrf.mxu0  ;;  %v5377_v51 = vor.u32 %v5903_v14, %v5376_v30  ;;  %v1573_v17 = vmax.f32 %v10829_v27, %v7463_v10  ;;  %v1580_v44 = vmax.f32 %v10830_v36, %v7485_v24  ;;  %v5876_v10 = vld [vmem:[%s10463_s3 + $0x140] sm:$0xf0]  ;;  %v5364_v24 = vld [vmem:[%s10463_s3 + $0x1f8] sm:$0xf]  ;;  %v10832_v30 = vld [vmem:[#allocation39_spill] sm:$0xff]  ;;  %v10558_v14 = vmax.f32 %v7952_v37, 0.0 }
 0x21f   : > { %10825 = vst [vmem:[#allocation5_spill] sm:$0xff] %v7949_v59  ;;  %v1568_v54 = vmax.f32 %v10827_v28, %v1463_v45  ;;  %v7958_v52 = vpop.f32.mrf.mxu1  ;;  %6129 = vrot.lane.b32.xlu1 %v6128_v12, %s6232_s19  ;;  %6119 = vrot.lane.b32.xlu2 %v6118_v49, %s6232_s19  ;;  %v7962_v39 = vpack.c.bf16 %v2281_v9, %v2274_v13  ;;  %v5268_v9 = vld [vmem:[%s10463_s3 + $0x138] sm:$0xf]  ;;  %v10559_v12 = vmax.f32 %v7949_v59, 0.0  ;;  %v5900_v13 = vld [vmem:[%s10463_s3 + $0x200] sm:$0xf0] }
 0x220   : > { %3466 = vmatpush.bf16.msrb.mxu3 %v5281_v0  ;;  %3509 = vmatpush.bf16.msra.mxu0 %v5377_v51  ;;  %v5269_v49 = vor.u32 %v5876_v10, %v5268_v9  ;;  %v1574_v0 = vmax.f32 %v10832_v30, %v7469_v31  ;;  %v7993_v51 = vadd.f32 %v7675_v63, %v1573_v17  ;;  %v6031_v9 = vunpack.i.l.bf16 %v7969_v8  ;;  %v5256_v17 = vld [vmem:[%s10463_s3 + $0x120] sm:$0xf] }
 0x221   : > { %10828 = vst [vmem:[#allocation34_spill] sm:$0xff] %v7962_v39  ;;  %v7972_v45 = vadd.f32 %v7716_v21, %v1568_v54  ;;  %3435 = vmatmul.bf16.gmra.mxu2 %v7962_v39  ;;  %v5365_v54 = vor.u32 %v5900_v13, %v5364_v24  ;;  %v7996_v27 = vadd.f32 %v7675_v63, %v1580_v44  ;;  %v5873_v44 = vld [vmem:[%s10463_s3 + $0x128] sm:$0xf0]  ;;  %v5352_v24 = vld [vmem:[%s10463_s3 + $0x1e0] sm:$0xf]  ;;  %v6026_v13 = vunpack.i.l.bf16 %v7882_v3 }
 0x222   : > { %v6133_v31 = vpack.i.bf16 %v10556_v35, %v10558_v14  ;;  %v5257_v35 = vor.u32 %v5873_v44, %v5256_v17  ;;  %v10835_v14 = vld [vmem:[#allocation40_spill] sm:$0xff]  ;;  %v10836_v44 = vld [vmem:[#allocation18_spill] sm:$0xff]  ;;  %v10842_v39 = vmax.f32 %v7424_v46, 0.0 }
 0x223   : > { %10831 = vst [vmem:[#allocation14_spill] sm:$0xff] %v7972_v45  ;;  %v10557_v28 = vmax.f32 %v7972_v45, 0.0  ;;  %v1607_v45 = vmax.f32 %v10836_v44, %v7614_v43  ;;  %v5340_v43 = vld [vmem:[%s10463_s3 + $0x1c8] sm:$0xf]  ;;  %v5232_v46 = vld [vmem:[%s10463_s3 + $0xf0] sm:$0xf] }
 0x224   : > { %10833 = vst [vmem:[#allocation36_spill] sm:$0xff] %v7996_v27  ;;  %3467 = vmatpush.bf16.msrb.mxu3 %v5269_v49  ;;  %3510 = vmatpush.bf16.msra.mxu0 %v5365_v54  ;;  %v5897_v54 = vld [vmem:[%s10463_s3 + $0x1e8] sm:$0xf0] }
 0x225   : > { %v6123_v10 = vpack.i.bf16 %v10557_v28, %v10559_v12  ;;  %v8023_v28 = vadd.f32 %v7713_v16, %v1574_v0  ;;  %v5353_v49 = vor.u32 %v5897_v54, %v5352_v24  ;;  %v2121_v0 = vsel %vm2090_vm1, %v6031_v9, %v10837_v2  ;;  %v10839_v24 = vld [vmem:[#allocation42_spill] sm:$0xff]  ;;  %v5894_v54 = vld [vmem:[%s10463_s3 + $0x1d0] sm:$0xf0] }
 0x226   : > { %v1466_v30 = vpop.f32.mrf.mxu0  ;;  %v1581_v2 = vmax.f32 %v10839_v24, %v7491_v48  ;;  %v10841_v9 = vunpack.i.h.bf16 %v7882_v3  ;;  %v2295_v37 = vmax.f32 %v10842_v39, %v2121_v0  ;;  %v5341_v48 = vor.u32 %v5894_v54, %v5340_v43  ;;  %v5867_v39 = vld [vmem:[%s10463_s3 + $0xf8] sm:$0xf0] }
 0x227   : > { %10834 = vst [vmem:[#allocation12_spill] sm:$0xff] %v8023_v28  ;;  %v1575_v12 = vmax.f32 %v10835_v14, %v1466_v30  ;;  %v8026_v36 = vpop.f32.mrf.mxu1  ;;  %6134 = vrot.lane.b32.xlu2 %v6133_v31, %s6232_s19  ;;  %6124 = vrot.lane.b32.xlu0 %v6123_v10, %s6232_s19  ;;  %v5244_v31 = vld [vmem:[%s10463_s3 + $0x108] sm:$0xf]  ;;  %v5870_v10 = vld [vmem:[%s10463_s3 + $0x110] sm:$0xf0]  ;;  %v10571_v44 = vmax.f32 %v8023_v28, 0.0  ;;  %v8064_v24 = vadd.f32 %v7538_v32, %v1607_v45 }
 0x228   : > { %3468 = vmatpush.bf16.msrb.mxu3 %v5257_v35  ;;  %3511 = vmatpush.bf16.msra.mxu0 %v5353_v49  ;;  %v10840_v35 = vld [vmem:[#allocation16_spill] sm:$0xff]  ;;  %v2115_v49 = vsel %vm2090_vm1, %v6026_v13, %v10841_v9  ;;  %v5245_v30 = vor.u32 %v5870_v10, %v5244_v31  ;;  %v10845_v13 = vmax.f32 %v7996_v27, 0.0  ;;  %v8086_v0 = vadd.f32 %v7713_v16, %v1581_v2  ;;  %v5891_v54 = vld [vmem:[%s10463_s3 + $0x1b8] sm:$0xf0] }
 0x229   : > { %v8038_v14 = vadd.f32 %v7716_v21, %v1575_v12  ;;  %v1600_v12 = vmax.f32 %v10840_v35, %v7570_v58  ;;  %10843 = vst [vmem:[#allocation37_spill] sm:$0xff] %v8064_v24  ;;  %v10844_v58 = vmax.f32 %v7993_v51, 0.0  ;;  %v10846_v35 = vld [vmem:[#allocation66_spill] sm:$0xff]  ;;  %v5328_v45 = vld [vmem:[%s10463_s3 + $0x1b0] sm:$0xf]  ;;  %v10893_v28 = vld [vmem:[#allocation65_spill] sm:$0xff] }
 0x22a   : > { %v10847_v9 = vmax.f32 %v10846_v35, 0.0  ;;  %10848 = vst [vmem:[#allocation9_spill] sm:$0xff] %v8086_v0  ;;  %v5329_v2 = vor.u32 %v5891_v54, %v5328_v45  ;;  %v5888_v45 = vld [vmem:[%s10463_s3 + $0x1a0] sm:$0xf0] }
 0x22b   : > { %10838 = vst [vmem:[#allocation63_spill] sm:$0xff] %v8038_v14  ;;  %v10566_v17 = vmax.f32 %v8038_v14, 0.0  ;;  %v6148_v31 = vpack.i.bf16 %v10845_v13, %v10844_v58  ;;  %v8089_v43 = vadd.f32 %v7538_v32, %v1600_v12  ;;  %v10569_v12 = vmax.f32 %v8064_v24, 0.0 }
 0x22c   : > { %3469 = vmatpush.bf16.msrb.mxu3 %v5245_v30  ;;  %v2288_v59 = vmax.f32 %v10847_v9, %v2115_v49  ;;  %3512 = vmatpush.bf16.msra.mxu0 %v5341_v48  ;;  %v5233_v30 = vor.u32 %v5867_v39, %v5232_v46  ;;  %v10850_v48 = vld [vmem:[#allocation43_spill] sm:$0xff]  ;;  %v10852_v9 = vld [vmem:[#allocation13_spill] sm:$0xff] }
 0x22d   : > { %v6138_v10 = vpack.i.bf16 %v10566_v17, %v10571_v44  ;;  %10849 = vst [vmem:[#allocation11_spill] sm:$0xff] %v8089_v43  ;;  %v1587_v46 = vmax.f32 %v10852_v9, %v7511_v18  ;;  %v10853_v39 = vld [vmem:[#allocation15_spill] sm:$0xff]  ;;  %v5316_v18 = vld [vmem:[%s10463_s3 + $0x198] sm:$0xf]  ;;  %v10568_v54 = vmax.f32 %v8089_v43, 0.0  ;;  %v8172_v43 = vpop.permute.xlu2 %6044 }
 0x22e   : > { %v1468_v49 = vpop.f32.mrf.mxu0  ;;  %v8099_v35 = vpack.c.bf16 %v2295_v37, %v2288_v59  ;;  %v1594_v17 = vmax.f32 %v10853_v39, %v7549_v47  ;;  %v5220_v59 = vld [vmem:[%s10463_s3 + $0xd8] sm:$0xf]  ;;  %v5864_v37 = vld [vmem:[%s10463_s3 + $0xe0] sm:$0xf0] }
 0x22f   : > { %v1582_v58 = vmax.f32 %v10850_v48, %v1468_v49  ;;  %v8095_v13 = vpop.f32.mrf.mxu1  ;;  %6149 = vrot.lane.b32.xlu2 %v6148_v31, %s6232_s19  ;;  %6139 = vrot.lane.b32.xlu0 %v6138_v10, %s6232_s19  ;;  %v10855_v47 = vld [vmem:[#allocation45_spill] sm:$0xff]  ;;  %v5221_v10 = vor.u32 %v5864_v37, %v5220_v59  ;;  %v8130_v9 = vadd.f32 %v7675_v63, %v1587_v46  ;;  %v5208_v37 = vld [vmem:[%s10463_s3 + $0xc0] sm:$0xf] }
 0x230   : > { %10851 = vst [vmem:[#allocation39_spill] sm:$0xff] %v8099_v35  ;;  %3470 = vmatpush.bf16.msrb.mxu3 %v5233_v30  ;;  %3513 = vmatpush.bf16.msra.mxu0 %v5329_v2  ;;  %v1588_v31 = vmax.f32 %v10855_v47, %v7517_v6  ;;  %v10570_v30 = vmax.f32 %v8086_v0, 0.0  ;;  %v5317_v2 = vor.u32 %v5888_v45, %v5316_v18  ;;  %v5304_v46 = vld [vmem:[%s10463_s3 + $0x180] sm:$0xf]  ;;  %v10861_v47 = vld [vmem:[#allocation51_spill] sm:$0xff]  ;;  %v10891_v0 = vld [vmem:[#allocation73_spill] sm:$0xff] }
 0x231   : > { %v8107_v49 = vadd.f32 %v7716_v21, %v1582_v58  ;;  %3440 = vmatmul.bf16.gmra.mxu2 %v8099_v35  ;;  %v8127_v58 = vpop.permute.xlu0 %6034  ;;  %10856 = vst [vmem:[#allocation18_spill] sm:$0xff] %v8130_v9  ;;  %v8133_v6 = vadd.f32 %v7675_v63, %v1594_v17  ;;  %v6153_v39 = vpack.i.bf16 %v10569_v12, %v10568_v54  ;;  %v5861_v17 = vld [vmem:[%s10463_s3 + $0xc8] sm:$0xf0]  ;;  %v10859_v54 = vld [vmem:[#allocation48_spill] sm:$0xff]  ;;  %v10892_v27 = vmax.f32 %v10891_v0, 0.0 }
 0x232   : > { %v8153_v18 = vadd.f32 %v7713_v16, %v1588_v31  ;;  %v1595_v12 = vmax.f32 %v10859_v54, %v7561_v20  ;;  %v10864_v54 = vunpack.i.h.bf16 %v8127_v58 }
 0x233   : > { %10854 = vst [vmem:[#allocation40_spill] sm:$0xff] %v8107_v49  ;;  %v10567_v48 = vmax.f32 %v8107_v49, 0.0  ;;  %v1602_v49 = vmax.f32 %v10861_v47, %v7608_v7  ;;  %v10579_v14 = vmax.f32 %v8133_v6, 0.0 }
 0x234   : > { %3471 = vmatpush.bf16.msrb.mxu3 %v5221_v10  ;;  %10857 = vst [vmem:[#allocation42_spill] sm:$0xff] %v8133_v6  ;;  %3514 = vmatpush.bf16.msra.mxu0 %v5317_v2  ;;  %v6036_v10 = vunpack.i.l.bf16 %v8127_v58  ;;  %v5209_v2 = vor.u32 %v5861_v17, %v5208_v37  ;;  %v10862_v37 = vld [vmem:[#allocation20_spill] sm:$0xff] }
 0x235   : > { %v6143_v59 = vpack.i.bf16 %v10567_v48, %v10570_v30  ;;  %10858 = vst [vmem:[#allocation16_spill] sm:$0xff] %v8153_v18  ;;  %v5885_v48 = vld [vmem:[%s10463_s3 + $0x188] sm:$0xf0]  ;;  %v10860_v30 = vld [vmem:[#allocation46_spill] sm:$0xff]  ;;  %v1614_v17 = vmax.f32 %v10862_v37, %v7659_v40  ;;  %v10580_v40 = vmax.f32 %v8130_v9, 0.0  ;;  %v8191_v47 = vadd.f32 %v7713_v16, %v1602_v49 }
 0x236   : > { %v1471_v45 = vpop.f32.mrf.mxu0  ;;  %v5305_v31 = vor.u32 %v5885_v48, %v5304_v46  ;;  %v2127_v48 = vsel %vm2090_vm1, %v6036_v10, %v10864_v54  ;;  %v8187_v46 = vadd.f32 %v7713_v16, %v1595_v12  ;;  %v10871_v54 = vld [vmem:[#allocation19_spill] sm:$0xff] }
 0x237   : > { %v1589_v44 = vmax.f32 %v10860_v30, %v1471_v45  ;;  %v8163_v35 = vpop.f32.mrf.mxu1  ;;  %6154 = vrot.lane.b32.xlu0 %v6153_v39, %s6232_s19  ;;  %6144 = vrot.lane.b32.xlu1 %v6143_v59, %s6232_s19  ;;  %v10584_v59 = vmax.f32 %v8153_v18, 0.0  ;;  %10866 = vst [vmem:[#allocation13_spill] sm:$0xff] %v8191_v47  ;;  %v8194_v45 = vadd.f32 %v7538_v32, %v1614_v17  ;;  %v10870_v32 = vmax.f32 %v7472_v29, 0.0 }
 0x238   : > { %3472 = vmatpush.bf16.msrb.mxu3 %v5209_v2  ;;  %3515 = vmatpush.bf16.msra.mxu0 %v5305_v31  ;;  %10865 = vst [vmem:[#allocation43_spill] sm:$0xff] %v8187_v46  ;;  %v6168_v2 = vpack.i.bf16 %v10579_v14, %v10580_v40  ;;  %v10868_v31 = vld [vmem:[#allocation69_spill] sm:$0xff]  ;;  %v1608_v24 = vmax.f32 %v10871_v54, %v7638_v60  ;;  %v10593_v14 = vmax.f32 %v8187_v46, 0.0  ;;  %v10872_v40 = vld [vmem:[#allocation54_spill] sm:$0xff]  ;;  %v10591_v60 = vmax.f32 %v8191_v47, 0.0 }
 0x239   : > { %v8175_v20 = vadd.f32 %v7716_v21, %v1589_v44  ;;  %v8177_v30 = vpop.permute.xlu1 %6039  ;;  %10867 = vst [vmem:[#allocation15_spill] sm:$0xff] %v8194_v45  ;;  %v10869_v49 = vmax.f32 %v10868_v31, 0.0  ;;  %v1609_v18 = vmax.f32 %v10872_v40, %v7650_v50  ;;  %v10876_v31 = vld [vmem:[#allocation26_spill] sm:$0xff]  ;;  %v5484_v40 = vld [vmem:[%s10463_s3 + $0x2e8] sm:$0xf] }
 0x23a   : > { %v10578_v7 = vunpack.i.h.bf16 %v8177_v30  ;;  %v6041_v39 = vunpack.i.l.bf16 %v8177_v30  ;;  %v1541_v50 = vmax.f32 %v10876_v31, %v7754_v41  ;;  %v10878_v41 = vld [vmem:[#allocation17_spill] sm:$0xff] }
 0x23b   : > { %10863 = vst [vmem:[#allocation66_spill] sm:$0xff] %v8175_v20  ;;  %v10583_v44 = vmax.f32 %v8175_v20, 0.0  ;;  %v2302_v37 = vmax.f32 %v10869_v49, %v2127_v48  ;;  %v10873_v20 = vld [vmem:[#allocation49_spill] sm:$0xff]  ;;  %v10875_v48 = vld [vmem:[#allocation23_spill] sm:$0xff]  ;;  %v8262_v54 = vadd.f32 %v7713_v16, %v1609_v18 }
 0x23c   : > { %v2133_v10 = vsel %vm2090_vm1, %v6041_v39, %v10578_v7  ;;  %v8214_v39 = vperm.slane %v7292_v55, 6  ;;  %v10590_v55 = vmax.f32 %v8194_v45, 0.0  ;;  %v10880_v45 = vld [vmem:[#allocation52_spill] sm:$0xff] }
 0x23d   : > { %v6158_v12 = vpack.i.bf16 %v10583_v44, %v10584_v59  ;;  %v2309_v17 = vmax.f32 %v10870_v32, %v2133_v10  ;;  %v1534_v10 = vmax.f32 %v10875_v48, %v7726_v23  ;;  %v5580_v23 = vld [vmem:[%s10463_s3 + $0x3a8] sm:$0xf]  ;;  %v5472_v32 = vld [vmem:[%s10463_s3 + $0x2d0] sm:$0xf] }
 0x23e   : > { %v1473_v7 = vpop.f32.mrf.mxu0  ;;  %v8277_v18 = vadd.f32 %v8214_v39, %v1541_v50 }
 0x23f   : > { %v1596_v44 = vmax.f32 %v10873_v20, %v1473_v7  ;;  %v8220_v59 = vpop.f32.mrf.mxu1  ;;  %6169 = vrot.lane.b32.xlu0 %v6168_v2, %s6232_s19  ;;  %6159 = vrot.lane.b32.xlu1 %v6158_v12, %s6232_s19  ;;  %v8224_v29 = vpack.c.bf16 %v2309_v17, %v2302_v37  ;;  %v5930_v2 = vld [vmem:[%s10463_s3 + $0x2f0] sm:$0xf0]  ;;  %v8250_v12 = vadd.f32 %v7675_v63, %v1608_v24  ;;  %v5927_v17 = vld [vmem:[%s10463_s3 + $0x2d8] sm:$0xf0] }
 0x240   : > { %v5485_v49 = vor.u32 %v5930_v2, %v5484_v40  ;;  %v5954_v37 = vld [vmem:[%s10463_s3 + $0x3b0] sm:$0xf0]  ;;  %v5568_v40 = vld [vmem:[%s10463_s3 + $0x390] sm:$0xf]  ;;  %v5951_v2 = vld [vmem:[%s10463_s3 + $0x398] sm:$0xf0] }
 0x241   : > { %10874 = vst [vmem:[#allocation45_spill] sm:$0xff] %v8224_v29  ;;  %v8233_v20 = vadd.f32 %v7716_v21, %v1596_v44  ;;  %3445 = vmatmul.bf16.gmra.mxu2 %v8224_v29  ;;  %v8236_v7 = vpop.permute.xlu2 %6059  ;;  %v1601_v44 = vmax.f32 %v10878_v41, %v7592_v38  ;;  %v10879_v38 = vld [vmem:[#allocation21_spill] sm:$0xff]  ;;  %v5581_v31 = vor.u32 %v5954_v37, %v5580_v23  ;;  %v10594_v37 = vunpack.i.h.bf16 %v8172_v43 }
 0x242   : > { %v1615_v24 = vmax.f32 %v10879_v38, %v7685_v53  ;;  %v8274_v41 = vadd.f32 %v8214_v39, %v1534_v10  ;;  %v6173_v53 = vpack.i.bf16 %v10591_v60, %v10590_v55  ;;  %3551 = vmatpush.bf16.msra.mxu1 %v5485_v49  ;;  %v5473_v23 = vor.u32 %v5927_v17, %v5472_v32  ;;  %v10881_v17 = vld [vmem:[#allocation57_spill] sm:$0xff]  ;;  %v5945_v49 = vld [vmem:[%s10463_s3 + $0x368] sm:$0xf0] }
 0x243   : > { %10877 = vst [vmem:[#allocation48_spill] sm:$0xff] %v8233_v20  ;;  %v10592_v48 = vmax.f32 %v8233_v20, 0.0  ;;  %v6046_v38 = vunpack.i.l.bf16 %v8172_v43  ;;  %3594 = vmatpush.bf16.msra.mxu2 %v5581_v31  ;;  %v5569_v29 = vor.u32 %v5951_v2, %v5568_v40  ;;  %v8290_v6 = vadd.f32 %v7675_v63, %v1601_v44  ;;  %v10882_v2 = vld [vmem:[#allocation29_spill] sm:$0xff]  ;;  %v5544_v40 = vld [vmem:[%s10463_s3 + $0x360] sm:$0xf] }
 0x244   : > { %v1616_v31 = vmax.f32 %v10881_v17, %v7701_v42  ;;  %v10888_v20 = vunpack.i.h.bf16 %v7854_v56 }
 0x245   : > { %v6163_v10 = vpack.i.bf16 %v10592_v48, %v10593_v14  ;;  %v5448_v48 = vld [vmem:[%s10463_s3 + $0x2a0] sm:$0xf]  ;;  %v5921_v14 = vld [vmem:[%s10463_s3 + $0x2a8] sm:$0xf0] }
 0x246   : > { %v1476_v50 = vpop.f32.mrf.mxu0  ;;  %3552 = vmatpush.bf16.msra.mxu1 %v5473_v23 }
 0x247   : > { %v1603_v47 = vmax.f32 %v10880_v45, %v1476_v50  ;;  %v8293_v55 = vpop.f32.mrf.mxu1  ;;  %6174 = vrot.lane.b32.xlu1 %v6173_v53, %s6232_s19  ;;  %6164 = vrot.lane.b32.xlu2 %v6163_v10, %s6232_s19  ;;  %v8304_v45 = vadd.f32 %v7675_v63, %v1615_v24  ;;  %v1548_v53 = vmax.f32 %v10882_v2, %v7792_v19  ;;  %v5460_v63 = vld [vmem:[%s10463_s3 + $0x2b8] sm:$0xf]  ;;  %v5924_v19 = vld [vmem:[%s10463_s3 + $0x2c0] sm:$0xf0] }
 0x248   : > { %v2139_v10 = vsel %vm2090_vm1, %v6046_v38, %v10594_v37  ;;  %3595 = vmatpush.bf16.msra.mxu2 %v5569_v29  ;;  %v5556_v24 = vld [vmem:[%s10463_s3 + $0x378] sm:$0xf]  ;;  %v5948_v2 = vld [vmem:[%s10463_s3 + $0x380] sm:$0xf0]  ;;  %v5461_v37 = vor.u32 %v5924_v19, %v5460_v63  ;;  %v10886_v63 = vmax.f32 %v7494_v33, 0.0 }
 0x249   : > { %v8312_v50 = vadd.f32 %v7716_v21, %v1603_v47  ;;  %v8314_v60 = vpop.permute.xlu0 %6049  ;;  %v8316_v42 = vpop.permute.xlu2 %6074  ;;  %v10884_v47 = vld [vmem:[#allocation32_spill] sm:$0xff]  ;;  %v5557_v44 = vor.u32 %v5948_v2, %v5556_v24  ;;  %v5449_v24 = vor.u32 %v5921_v14, %v5448_v48  ;;  %v10895_v33 = vld [vmem:[#allocation41_spill] sm:$0xff] }
 0x24a   : > { %v1555_v23 = vmax.f32 %v10884_v47, %v7843_v4  ;;  %v10598_v38 = vunpack.i.h.bf16 %v8314_v60  ;;  %v6051_v17 = vunpack.i.l.bf16 %v8314_v60  ;;  %v10602_v29 = vunpack.i.h.bf16 %v8316_v42  ;;  %3553 = vmatpush.bf16.msra.mxu1 %v5461_v37  ;;  %v10896_v48 = vld [vmem:[#allocation44_spill] sm:$0xff] }
 0x24b   : > { %10883 = vst [vmem:[#allocation46_spill] sm:$0xff] %v8312_v50  ;;  %v10885_v4 = vunpack.i.h.bf16 %v7899_v11  ;;  %v2316_v19 = vmax.f32 %v10886_v63, %v2139_v10  ;;  %v10887_v2 = vunpack.i.l.bf16 %v8316_v42  ;;  %v10889_v9 = vmax.f32 %v8312_v50, 0.0 }
 0x24c   : > { %v2145_v32 = vsel %vm2090_vm1, %v6051_v17, %v10598_v38  ;;  %v10890_v17 = vmax.f32 %v8262_v54, 0.0  ;;  %v1576_v14 = vmax.f32 %v10895_v33, %v8026_v36  ;;  %v1583_v56 = vmax.f32 %v10896_v48, %v8095_v13  ;;  %3596 = vmatpush.bf16.msra.mxu2 %v5557_v44  ;;  %v5918_v33 = vld [vmem:[%s10463_s3 + $0x290] sm:$0xf0] }
 0x24d   : > { %v2110_v47 = vsel %vm2090_vm1, %v10885_v4, %v10602_v29  ;;  %v2104_v46 = vsel %vm2090_vm1, %v10888_v20, %v10887_v2  ;;  %v2323_v11 = vmax.f32 %v10892_v27, %v2145_v32  ;;  %v10894_v4 = vmax.f32 %v10893_v28, 0.0  ;;  %v10897_v20 = vld [vmem:[#allocation64_spill] sm:$0xff] }
 0x24e   : > { %v6178_v38 = vpack.i.bf16 %v10890_v17, %v10889_v9  ;;  %v1478_v10 = vpop.f32.mrf.mxu0  ;;  %v10898_v63 = vmax.f32 %v10897_v20, 0.0  ;;  %v5545_v50 = vor.u32 %v5945_v49, %v5544_v40  ;;  %v10899_v9 = vld [vmem:[#allocation55_spill] sm:$0xff]  ;;  %v10900_v28 = vmax.f32 %v8250_v12, 0.0  ;;  %3554 = vmatpush.bf16.msra.mxu1 %v5449_v24 }
 0x24f   : > { %v2282_v29 = vmax.f32 %v10894_v4, %v2110_v47  ;;  %v1610_v17 = vmax.f32 %v10899_v9, %v1478_v10  ;;  %v8379_v0 = vpop.f32.mrf.mxu1  ;;  %v8385_v27 = vpack.c.bf16 %v2323_v11, %v2316_v19  ;;  %v10607_v36 = vmax.f32 %v8290_v6, 0.0 }
 0x250   : > { %v2275_v2 = vmax.f32 %v10898_v63, %v2104_v46  ;;  %2068 = vrot.lane.b32.xlu1 %v10900_v28, %s6232_s19  ;;  %6179 = vrot.lane.b32.xlu2 %v6178_v38, %s6232_s19  ;;  %v8389_v13 = vadd.f32 %v7713_v16, %v1616_v31  ;;  %v10902_v46 = vmax.f32 %v8274_v41, 0.0  ;;  %v10903_v37 = vmax.f32 %v8277_v18, 0.0  ;;  %v10906_v28 = vld [vmem:[#allocation62_spill] sm:$0xff] }
 0x251   : > { %10901 = vst [vmem:[#allocation51_spill] sm:$0xff] %v8385_v27  ;;  %v8399_v44 = vadd.f32 %v8214_v39, %v1548_v53  ;;  %v8402_v38 = vadd.f32 %v8214_v39, %v1555_v23  ;;  %v8405_v47 = vadd.f32 %v7716_v21, %v1610_v17  ;;  %v6065_v16 = vpop.permute.xlu0 %6064  ;;  %3450 = vmatmul.bf16.gmra.mxu2 %v8385_v27  ;;  %v8408_v31 = vpop.permute.xlu1 %6054  ;;  %v5436_v23 = vld [vmem:[%s10463_s3 + $0x288] sm:$0xf]  ;;  %v10904_v10 = vunpack.i.h.bf16 %v7803_v61 }
 0x252   : > { %v6188_v49 = vpack.i.bf16 %v10903_v37, %v10902_v46  ;;  %v8395_v32 = vpack.c.bf16 %v2282_v29, %v2275_v2  ;;  %v8411_v29 = vadd.f32 %v8214_v39, %v1576_v14  ;;  %v8414_v19 = vadd.f32 %v8214_v39, %v1583_v56  ;;  %v8416_v4 = vpop.permute.xlu2 %6089  ;;  %3597 = vmatpush.bf16.msra.mxu2 %v5545_v50 }
 0x253   : > { %v6067_v53 = vunpack.i.h.bf16 %v6065_v16  ;;  %v6066_v11 = vunpack.i.l.bf16 %v6065_v16  ;;  %v10606_v24 = vmax.f32 %v8405_v47, 0.0  ;;  %v10604_v48 = vunpack.i.h.bf16 %v8416_v4  ;;  %v10908_v16 = vld [vmem:[#allocation61_spill] sm:$0xff] }
 0x254   : > { %v10605_v56 = vunpack.i.l.bf16 %v8416_v4  ;;  %v10905_v20 = vunpack.i.h.bf16 %v7765_v22  ;;  %v6056_v2 = vunpack.i.l.bf16 %v8408_v31  ;;  %v5437_v9 = vor.u32 %v5918_v33, %v5436_v23  ;;  %v5532_v22 = vld [vmem:[%s10463_s3 + $0x348] sm:$0xf]  ;;  %v5942_v23 = vld [vmem:[%s10463_s3 + $0x350] sm:$0xf0] }
 0x255   : > { %v2098_v50 = vsel %vm2090_vm1, %v10904_v10, %v6067_v53  ;;  %v10907_v46 = vmax.f32 %v10906_v28, 0.0  ;;  %v10909_v14 = vmax.f32 %v10908_v16, 0.0  ;;  %v2099_v61 = vsel %vm2090_vm1, %v6067_v53, %v10604_v48  ;;  %v10919_v28 = vld [vmem:[#allocation38_spill] sm:$0xff] }
 0x256   : > { %v2092_v63 = vsel %vm2090_vm1, %v10905_v20, %v6066_v11  ;;  %v6061_v33 = vunpack.i.l.bf16 %v8236_v7  ;;  %v10910_v10 = vmax.f32 %v7547_v34, 0.0  ;;  %v1481_v20 = vpop.f32.mrf.mxu0  ;;  %v6183_v53 = vpack.i.bf16 %v10607_v36, %v10606_v24  ;;  %3555 = vmatpush.bf16.msra.mxu1 %v5437_v9  ;;  %v5915_v34 = vld [vmem:[%s10463_s3 + $0x278] sm:$0xf0]  ;;  %v5520_v24 = vld [vmem:[%s10463_s3 + $0x330] sm:$0xf] }
 0x257   : > { %v2268_v37 = vmax.f32 %v10907_v46, %v2098_v50  ;;  %v2261_v40 = vmax.f32 %v10909_v14, %v2092_v63  ;;  %v2093_v14 = vsel %vm2090_vm1, %v6066_v11, %v10605_v56  ;;  %v5424_v63 = vld [vmem:[%s10463_s3 + $0x270] sm:$0xf]  ;;  %v10911_v11 = vld [vmem:[#allocation75_spill] sm:$0xff]  ;;  %v1524_v56 = vpop.f32.mrf.mxu1  ;;  %v10914_v9 = vmax.f32 %v8304_v45, 0.0 }
 0x258   : > { %v2269_v50 = vmax.f32 %v10910_v10, %v2099_v61  ;;  %v10912_v16 = vmax.f32 %v10911_v11, 0.0  ;;  %v10913_v10 = vld [vmem:[#allocation58_spill] sm:$0xff]  ;;  %6189 = vrot.lane.b32.xlu2 %v6188_v49, %s6232_s19  ;;  %6184 = vrot.lane.b32.xlu0 %v6183_v53, %s6232_s19  ;;  %v10614_v17 = vmax.f32 %v8411_v29, 0.0 }
 0x259   : > { %v8466_v46 = vpack.c.bf16 %v2268_v37, %v2261_v40  ;;  %v1617_v48 = vmax.f32 %v10913_v10, %v1481_v20  ;;  %2082 = vrot.lane.b32.xlu1 %v10914_v9, %s6232_s19  ;;  %v5939_v40 = vld [vmem:[%s10463_s3 + $0x338] sm:$0xf0]  ;;  %v10915_v20 = vunpack.i.h.bf16 %v8408_v31  ;;  %v10916_v49 = vld [vmem:[#allocation50_spill] sm:$0xff]  ;;  %v5425_v37 = vor.u32 %v5915_v34, %v5424_v63  ;;  %v5508_v63 = vld [vmem:[%s10463_s3 + $0x318] sm:$0xf] }
 0x25a   : > { %v2262_v61 = vmax.f32 %v10912_v16, %v2093_v14  ;;  %v5533_v16 = vor.u32 %v5942_v23, %v5532_v22  ;;  %v1597_v10 = vmax.f32 %v10916_v49, %v8220_v59  ;;  %v1569_v14 = vmax.f32 %v10919_v28, %v7958_v52  ;;  %v5412_v59 = vld [vmem:[%s10463_s3 + $0x258] sm:$0xf]  ;;  %v10921_v52 = vld [vmem:[#allocation47_spill] sm:$0xff]  ;;  %v5936_v34 = vld [vmem:[%s10463_s3 + $0x320] sm:$0xf0] }
 0x25b   : > { %v2151_v11 = vsel %vm2090_vm1, %v6056_v2, %v10915_v20  ;;  %v8492_v36 = vadd.f32 %v7716_v21, %v1617_v48  ;;  %3473 = vmatmul.bf16.vlgmr.msrb.gmra.mxu3 %v8466_v46  ;;  %v10920_v2 = vunpack.i.h.bf16 %v8236_v7  ;;  %v5521_v23 = vor.u32 %v5939_v40, %v5520_v24  ;;  %v5912_v21 = vld [vmem:[%s10463_s3 + $0x260] sm:$0xf0]  ;;  %3556 = vmatpush.bf16.msra.mxu1 %v5425_v37  ;;  %v10923_v28 = vld [vmem:[#allocation35_spill] sm:$0xff] }
 0x25c   : > { %v8489_v9 = vpack.c.bf16 %v2269_v50, %v2262_v61  ;;  %3598 = vmatpush.bf16.msra.mxu2 %v5533_v16  ;;  %v10617_v48 = vmax.f32 %v8389_v13, 0.0  ;;  %v1590_v50 = vmax.f32 %v10921_v52, %v8163_v35  ;;  %v1562_v61 = vmax.f32 %v10923_v28, %v7885_v5  ;;  %v10928_v49 = vld [vmem:[#allocation59_spill] sm:$0xff] }
 0x25d   : > { %10918 = vst [vmem:[#allocation69_spill] sm:$0xff] %v8492_v36  ;;  %v2157_v22 = vsel %vm2090_vm1, %v6061_v33, %v10920_v2  ;;  %v10611_v53 = vmax.f32 %v8492_v36, 0.0  ;;  %v10922_v33 = vmax.f32 %v7564_v62, 0.0  ;;  %v10924_v35 = vmax.f32 %v8414_v19, 0.0 }
 0x25e   : > { %10917 = vst [vmem:[#allocation20_spill] sm:$0xff] %v8489_v9  ;;  %3516 = vmatmul.bf16.vlgmr.msra.gmra.mxu0 %v8489_v9  ;;  %v10925_v62 = vmax.f32 %v8399_v44, 0.0  ;;  %v10926_v37 = vmax.f32 %v8402_v38, 0.0  ;;  %v8531_v16 = vadd.f32 %v8214_v39, %v1597_v10  ;;  %v1618_v2 = vmax.f32 %v10928_v49, %v1524_v56  ;;  %v5400_v10 = vld [vmem:[%s10463_s3 + $0x240] sm:$0xf] }
 0x25f   : > { %v2330_v24 = vmax.f32 %v10922_v33, %v2151_v11  ;;  %v6208_v40 = vpack.i.bf16 %v10924_v35, %v10614_v17  ;;  %v5413_v11 = vor.u32 %v5912_v21, %v5412_v59  ;;  %v6193_v5 = vpack.i.bf16 %v10611_v53, %v10617_v48  ;;  %v1483_v35 = vpop.f32.mrf.mxu0  ;;  %v5909_v56 = vld [vmem:[%s10463_s3 + $0x248] sm:$0xf0] }
 0x260   : > { %v6198_v20 = vpack.i.bf16 %v10926_v37, %v10925_v62  ;;  %10927 = vst [vmem:[#allocation19_spill] sm:$0xff] %v8531_v16  ;;  %v10929_v52 = vmax.f32 %v7611_v57, 0.0  ;;  %v8541_v28 = vadd.f32 %v8214_v39, %v1569_v14  ;;  %3599 = vmatpush.bf16.msra.mxu2 %v5521_v23  ;;  %v5509_v62 = vor.u32 %v5936_v34, %v5508_v63  ;;  %v5496_v14 = vld [vmem:[%s10463_s3 + $0x300] sm:$0xf]  ;;  %v1526_v23 = vpop.f32.mrf.mxu1  ;;  %v10933_v37 = vld [vmem:[#allocation56_spill] sm:$0xff] }
 0x261   : > { %v8550_v59 = vadd.f32 %v8214_v39, %v1590_v50  ;;  %6209 = vrot.lane.b32.xlu1 %v6208_v40, %s6232_s19  ;;  %v8563_v21 = vadd.f32 %v8214_v39, %v1562_v61  ;;  %6194 = vrot.lane.b32.xlu0 %v6193_v5, %s6232_s19  ;;  %v5401_v50 = vor.u32 %v5909_v56, %v5400_v10  ;;  %v10613_v63 = vmax.f32 %v8531_v16, 0.0  ;;  %v8571_v34 = vpop.permute.xlu1 %6069  ;;  %v10934_v5 = vld [vmem:[#allocation53_spill] sm:$0xff]  ;;  %v11070_v16 = vld [vmem:[#allocation22_spill] sm:$0xff] }
 0x262   : > { %v2337_v33 = vmax.f32 %v10929_v52, %v2157_v22  ;;  %6199 = vrot.lane.b32.xlu2 %v6198_v20, %s6232_s19  ;;  %v5933_v22 = vld [vmem:[%s10463_s3 + $0x308] sm:$0xf0]  ;;  %3557 = vmatpush.bf16.msra.mxu1 %v5413_v11  ;;  %v10616_v40 = vmax.f32 %v8541_v28, 0.0  ;;  %v1611_v20 = vmax.f32 %v10933_v37, %v8379_v0  ;;  %v1604_v52 = vmax.f32 %v10934_v5, %v8293_v55 }
 0x263   : > { %10930 = vst [vmem:[#allocation54_spill] sm:$0xff] %v8550_v59  ;;  %v5497_v61 = vor.u32 %v5933_v22, %v5496_v14  ;;  %v10612_v49 = vmax.f32 %v8550_v59, 0.0  ;;  %v10615_v11 = vmax.f32 %v8563_v21, 0.0  ;;  %v10937_v22 = vld [vmem:[#allocation79_spill] sm:$0xff] }
 0x264   : > { %v8554_v57 = vpack.c.bf16 %v2337_v33, %v2330_v24  ;;  %v8568_v24 = vadd.f32 %v8214_v39, %v1618_v2  ;;  %3600 = vmatpush.bf16.msra.mxu2 %v5509_v62  ;;  %v10619_v2 = vunpack.i.h.bf16 %v8571_v34  ;;  %v6071_v33 = vunpack.i.l.bf16 %v8571_v34 }
 0x265   : > { %v6213_v0 = vpack.i.bf16 %v10613_v63, %v10612_v49  ;;  %v8588_v62 = vadd.f32 %v8214_v39, %v1611_v20  ;;  %v6203_v55 = vpack.i.bf16 %v10616_v40, %v10615_v11  ;;  %v8599_v10 = vadd.f32 %v8214_v39, %v1604_v52 }
 0x266   : > { %10931 = vst [vmem:[#allocation49_spill] sm:$0xff] %v8554_v57  ;;  %3455 = vmatmul.bf16.gmra.mxu2 %v8554_v57  ;;  %3558 = vmatpush.bf16.msra.mxu1 %v5401_v50  ;;  %v10608_v35 = vmax.f32 %v8568_v24, 0.0  ;;  %v2163_v56 = vsel %vm2090_vm1, %v6071_v33, %v10619_v2  ;;  %v10938_v23 = vmax.f32 %v10937_v22, 0.0  ;;  %v10940_v33 = vunpack.i.l.bf16 %v8416_v4  ;;  %v10950_v2 = vld [vmem:[#allocation24_spill] sm:$0xff] }
 0x267   : > { %10932 = vst [vmem:[#allocation23_spill] sm:$0xff] %v8568_v24  ;;  %v10610_v14 = vmax.f32 %v8588_v62, 0.0  ;;  %v10609_v37 = vmax.f32 %v8599_v10, 0.0  ;;  %v10944_v63 = vunpack.i.h.bf16 %v7882_v3  ;;  %v10945_v11 = vunpack.i.h.bf16 %v8416_v4  ;;  %v10952_v3 = vld [vmem:[#allocation67_spill] sm:$0xff] }
 0x268   : > { %10935 = vst [vmem:[#allocation26_spill] sm:$0xff] %v8588_v62  ;;  %3601 = vmatpush.bf16.msra.mxu2 %v5497_v61  ;;  %v2344_v50 = vmax.f32 %v10938_v23, %v2163_v56  ;;  %v10953_v24 = vmax.f32 %v10952_v3, 0.0 }
 0x269   : > { %2088 = vrot.lane.b32.xlu1 %v10608_v35, %s6232_s19  ;;  %10936 = vst [vmem:[#allocation17_spill] sm:$0xff] %v8599_v10  ;;  %6204 = vrot.lane.b32.xlu0 %v6203_v55, %s6232_s19  ;;  %v6218_v39 = vpack.i.bf16 %v10610_v14, %v10609_v37  ;;  %v10941_v37 = vld [vmem:[#allocation83_spill] sm:$0xff] }
 0x26a   : > { %6214 = vrot.lane.b32.xlu2 %v6213_v0, %s6232_s19  ;;  %v8614_v20 = vpack.c.bf16 %v2344_v50, %v2344_v50  ;;  %v10942_v14 = vmax.f32 %v10941_v37, 0.0  ;;  %v10946_v37 = vld [vmem:[#allocation84_spill] sm:$0xff] }
 0x26b   : > { %3478 = vmatmul.bf16.gmra.mxu3 %v8395_v32 }
 0x26c   : > { %10939 = vst [vmem:[#allocation21_spill] sm:$0xff] %v8614_v20 }
 0x271   : > { %6219 = vrot.lane.b32.xlu0 %v6218_v39, %s6232_s19  ;;  %v8618_v61 = vpop.permute.xlu0 %6079 }
 0x272   : > { %v6081_v5 = vunpack.i.l.bf16 %v8618_v61  ;;  %v10618_v52 = vunpack.i.h.bf16 %v8618_v61 }
 0x274   : > { %v2094_v0 = vsel %vm2090_vm1, %v10940_v33, %v6081_v5  ;;  %v2095_v55 = vsel %vm2090_vm1, %v6081_v5, %v10618_v52  ;;  %v8638_v33 = vpop.permute.xlu2 %6104  ;;  %v10943_v5 = vunpack.i.h.bf16 %v7969_v8  ;;  %v10948_v8 = vld [vmem:[#allocation82_spill] sm:$0xff] }
 0x275   : > { %v2263_v53 = vmax.f32 %v10942_v14, %v2094_v0  ;;  %v10947_v0 = vmax.f32 %v10946_v37, 0.0  ;;  %v10949_v52 = vmax.f32 %v10948_v8, 0.0  ;;  %v10962_v8 = vld [vmem:[#allocation78_spill] sm:$0xff] }
 0x276   : > { %3460 = vmatmul.bf16.gmra.mxu2 %v8614_v20 }
 0x277   : > { %v2264_v48 = vmax.f32 %v10947_v0, %v2095_v55  ;;  %v10960_v55 = vld [vmem:[#allocation80_spill] sm:$0xff]  ;;  %v6106_v0 = vunpack.i.l.bf16 %v8638_v33 }
 0x279   : > { %v8628_v56 = vpop.permute.xlu0 %6094  ;;  %v8630_v22 = vpop.permute.xlu1 %6084 }
 0x27a   : > { %v10620_v23 = vunpack.i.h.bf16 %v8628_v56  ;;  %v10624_v50 = vunpack.i.l.bf16 %v8628_v56  ;;  %v10631_v39 = vunpack.i.h.bf16 %v8630_v22  ;;  %v6086_v35 = vunpack.i.l.bf16 %v8630_v22 }
 0x27c   : > { %v2122_v49 = vsel %vm2090_vm1, %v10943_v5, %v10620_v23  ;;  %v2116_v17 = vsel %vm2090_vm1, %v10944_v63, %v10624_v50  ;;  %v2100_v40 = vsel %vm2090_vm1, %v10945_v11, %v6086_v35  ;;  %v2101_v14 = vsel %vm2090_vm1, %v6086_v35, %v10631_v39  ;;  %v10954_v50 = vld [vmem:[#allocation68_spill] sm:$0xff] }
 0x27d   : > { %v2270_v5 = vmax.f32 %v10949_v52, %v2100_v40  ;;  %v10951_v23 = vmax.f32 %v10950_v2, 0.0  ;;  %v2289_v63 = vmax.f32 %v10953_v24, %v2116_v17  ;;  %v10955_v4 = vmax.f32 %v10954_v50, 0.0 }
 0x27e   : > { %v10958_v17 = vunpack.i.h.bf16 %v8316_v42 }
 0x27f   : > { %v2271_v20 = vmax.f32 %v10951_v23, %v2101_v14  ;;  %v2296_v9 = vmax.f32 %v10955_v4, %v2122_v49  ;;  %v8666_v11 = vpack.c.bf16 %v2270_v5, %v2263_v53  ;;  %v10961_v23 = vmax.f32 %v10960_v55, 0.0  ;;  %v10966_v55 = vld [vmem:[#allocation3_spill] sm:$0xff] }
 0x280   : > { %v10630_v14 = vunpack.i.h.bf16 %v8638_v33  ;;  %v10963_v5 = vmax.f32 %v10962_v8, 0.0 }
 0x281   : > { %10956 = vst [vmem:[#allocation52_spill] sm:$0xff] %v8666_v11  ;;  %v8668_v57 = vpack.c.bf16 %v2271_v20, %v2264_v48  ;;  %v8670_v35 = vpack.c.bf16 %v2296_v9, %v2289_v63  ;;  %v6110_v37 = vpop.permute.xlu0 %6109  ;;  %3559 = vmatmul.bf16.vlgmr.msra.gmra.mxu1 %v8666_v11  ;;  %v8674_v40 = vpop.permute.xlu1 %6099  ;;  %v10959_v48 = vunpack.i.l.bf16 %v8316_v42 }
 0x282   : > { %v6112_v2 = vunpack.i.h.bf16 %v6110_v37  ;;  %v6111_v52 = vunpack.i.l.bf16 %v6110_v37  ;;  %v10629_v24 = vunpack.i.h.bf16 %v8674_v40  ;;  %v6101_v49 = vunpack.i.l.bf16 %v8674_v40  ;;  %v8685_v20 = vpop.permute.xlu2 %6119 }
 0x283   : > { %10957 = vst [vmem:[#allocation57_spill] sm:$0xff] %v8668_v57  ;;  %3483 = vmatmul.bf16.gmra.mxu3 %v8670_v35 }
 0x284   : > { %v2111_v53 = vsel %vm2090_vm1, %v10958_v17, %v6112_v2  ;;  %v2105_v9 = vsel %vm2090_vm1, %v10959_v48, %v6111_v52  ;;  %v2112_v42 = vsel %vm2090_vm1, %v6112_v2, %v6106_v0  ;;  %v2106_v63 = vsel %vm2090_vm1, %v6111_v52, %v6101_v49 }
 0x285   : > { %v2276_v50 = vmax.f32 %v10961_v23, %v2105_v9  ;;  %v2283_v3 = vmax.f32 %v10963_v5, %v2111_v53  ;;  %v2107_v4 = vsel %vm2090_vm1, %v6101_v49, %v10629_v24  ;;  %v2113_v48 = vsel %vm2090_vm1, %v6106_v0, %v10630_v14 }
 0x286   : > { %3602 = vmatmul.bf16.vlgmr.msra.gmra.mxu2 %v8668_v57  ;;  %v10965_v52 = vmax.f32 %v7776_v1, 0.0  ;;  %v10967_v23 = vmax.f32 %v10966_v55, 0.0  ;;  %v10971_v24 = vunpack.i.h.bf16 %v8127_v58  ;;  %v10972_v1 = vld [vmem:[#allocation70_spill] sm:$0xff]  ;;  %v10974_v55 = vld [vmem:[#allocation71_spill] sm:$0xff] }
 0x287   : > { %v8698_v37 = vpack.c.bf16 %v2283_v3, %v2276_v50  ;;  %v10968_v50 = vld [vmem:[#allocation2_spill] sm:$0xff]  ;;  %v10970_v3 = vunpack.i.h.bf16 %v8177_v30 }
 0x288   : > { %v2277_v9 = vmax.f32 %v10965_v52, %v2106_v63  ;;  %v2284_v49 = vmax.f32 %v10967_v23, %v2112_v42  ;;  %v10969_v8 = vmax.f32 %v10968_v50, 0.0  ;;  %v10973_v63 = vmax.f32 %v10972_v1, 0.0  ;;  %v10976_v50 = vld [vmem:[#allocation10_spill] sm:$0xff]  ;;  %v5664_v1 = vld [vmem:[%s10463_s3 + $0x450] sm:$0xf] }
 0x289   : > { %10964 = vst [vmem:[#allocation29_spill] sm:$0xff] %v8698_v37  ;;  %v8700_v17 = vpop.permute.xlu1 %6114  ;;  %3521 = vmatmul.bf16.gmra.mxu0 %v8698_v37  ;;  %v10975_v42 = vmax.f32 %v10974_v55, 0.0  ;;  %v10982_v55 = vunpack.i.l.bf16 %v8628_v56 }
 0x28a   : > { %v10632_v53 = vunpack.i.h.bf16 %v8700_v17  ;;  %v10633_v2 = vunpack.i.l.bf16 %v8700_v17  ;;  %v2278_v5 = vmax.f32 %v10969_v8, %v2107_v4  ;;  %v10977_v4 = vmax.f32 %v10976_v50, 0.0  ;;  %v8730_v39 = vpop.permute.xlu2 %6134 }
 0x28b   : > { %v10635_v50 = vunpack.i.h.bf16 %v8730_v39 }
 0x28c   : > { %v2134_v0 = vsel %vm2090_vm1, %v10970_v3, %v10632_v53  ;;  %v2128_v14 = vsel %vm2090_vm1, %v10971_v24, %v10633_v2  ;;  %v2285_v8 = vmax.f32 %v10977_v4, %v2113_v48  ;;  %v8734_v3 = vpack.c.bf16 %v2284_v49, %v2277_v9  ;;  %v5676_v48 = vld [vmem:[%s10463_s3 + $0x468] sm:$0xf]  ;;  %v5978_v9 = vld [vmem:[%s10463_s3 + $0x470] sm:$0xf0] }
 0x28d   : > { %v2303_v52 = vmax.f32 %v10973_v63, %v2128_v14  ;;  %v2310_v23 = vmax.f32 %v10975_v42, %v2134_v0  ;;  %v10634_v49 = vunpack.i.h.bf16 %v8685_v20  ;;  %v6121_v0 = vunpack.i.l.bf16 %v8685_v20  ;;  %v10983_v4 = vld [vmem:[#allocation4_spill] sm:$0xff] }
 0x28e   : > { %10979 = vst [vmem:[#allocation73_spill] sm:$0xff] %v8734_v3  ;;  %v8736_v53 = vpack.c.bf16 %v2285_v8, %v2278_v5  ;;  %v5677_v5 = vor.u32 %v5978_v9, %v5676_v48  ;;  %v10981_v63 = vunpack.i.h.bf16 %v8628_v56  ;;  %v10984_v8 = vmax.f32 %v10983_v4, 0.0  ;;  %v10985_v48 = vld [vmem:[#allocation6_spill] sm:$0xff]  ;;  %v5975_v56 = vld [vmem:[%s10463_s3 + $0x458] sm:$0xf0] }
 0x28f   : > { %v8732_v30 = vpack.c.bf16 %v2310_v23, %v2303_v52  ;;  %v10986_v9 = vmax.f32 %v10985_v48, 0.0  ;;  %v2119_v4 = vsel %vm2090_vm1, %v6121_v0, %v10634_v49 }
 0x290   : > { %10980 = vst [vmem:[#allocation65_spill] sm:$0xff] %v8736_v53  ;;  %3637 = vmatpush.bf16.msra.mxu3 %v5677_v5 }
 0x291   : > { %10978 = vst [vmem:[#allocation32_spill] sm:$0xff] %v8732_v30  ;;  %v6130_v58 = vpop.permute.xlu1 %6129  ;;  %3564 = vmatmul.bf16.gmra.mxu1 %v8734_v3 }
 0x292   : > { %v6132_v24 = vunpack.i.h.bf16 %v6130_v58  ;;  %v6131_v14 = vunpack.i.l.bf16 %v6130_v58 }
 0x293   : > { %3488 = vmatmul.bf16.gmra.mxu3 %v8732_v30 }
 0x294   : > { %v2123_v52 = vsel %vm2090_vm1, %v10981_v63, %v6132_v24  ;;  %v2117_v42 = vsel %vm2090_vm1, %v10982_v55, %v6131_v14  ;;  %v8756_v23 = vpop.f32.mrf.mxu2  ;;  %v5665_v55 = vor.u32 %v5975_v56, %v5664_v1  ;;  %v2118_v1 = vsel %vm2090_vm1, %v6131_v14, %v6121_v0  ;;  %v5652_v56 = vld [vmem:[%s10463_s3 + $0x438] sm:$0xf] }
 0x295   : > { %v2290_v58 = vmax.f32 %v10984_v8, %v2117_v42  ;;  %v2297_v2 = vmax.f32 %v10986_v9, %v2123_v52  ;;  %v10988_v42 = vunpack.i.l.bf16 %v8730_v39  ;;  %v10989_v52 = vunpack.i.h.bf16 %v8172_v43  ;;  %v8784_v9 = vpop.permute.xlu2 %6149 }
 0x296   : > { %3607 = vmatmul.bf16.gmra.mxu2 %v8736_v53  ;;  %v10990_v8 = vunpack.i.h.bf16 %v8314_v60  ;;  %3638 = vmatpush.bf16.msra.mxu3 %v5665_v55  ;;  %v5972_v60 = vld [vmem:[%s10463_s3 + $0x440] sm:$0xf0]  ;;  %v10993_v55 = vmax.f32 %v7880_v15, 0.0  ;;  %v6152_v49 = vunpack.i.h.bf16 %v8784_v9 }
 0x297   : > { %v8769_v63 = vpack.c.bf16 %v2297_v2, %v2290_v58  ;;  %v2140_v5 = vsel %vm2090_vm1, %v10989_v52, %v10988_v42  ;;  %v10991_v42 = vld [vmem:[#allocation72_spill] sm:$0xff]  ;;  %v5653_v0 = vor.u32 %v5972_v60, %v5652_v56  ;;  %v10998_v60 = vld [vmem:[#allocation5_spill] sm:$0xff] }
 0x298   : > { %v2146_v48 = vsel %vm2090_vm1, %v10990_v8, %v10635_v50  ;;  %v10992_v52 = vmax.f32 %v10991_v42, 0.0  ;;  %v2292_v14 = vmax.f32 %v10993_v55, %v2119_v4  ;;  %v6151_v42 = vunpack.i.l.bf16 %v8784_v9 }
 0x299   : > { %10987 = vst [vmem:[#allocation41_spill] sm:$0xff] %v8769_v63  ;;  %v8786_v2 = vpop.permute.xlu0 %6124  ;;  %3526 = vmatmul.bf16.gmra.mxu0 %v8769_v63  ;;  %v10994_v63 = vld [vmem:[#allocation74_spill] sm:$0xff]  ;;  %v10997_v4 = vmax.f32 %v7864_v26, 0.0  ;;  %v11003_v26 = vunpack.i.h.bf16 %v8700_v17 }
 0x29a   : > { %v10646_v58 = vunpack.i.h.bf16 %v8786_v2  ;;  %v6126_v43 = vunpack.i.l.bf16 %v8786_v2  ;;  %v2317_v8 = vmax.f32 %v10992_v52, %v2140_v5  ;;  %v10995_v57 = vmax.f32 %v10994_v63, 0.0  ;;  %3639 = vmatpush.bf16.msra.mxu3 %v5653_v0 }
 0x29b   : > { %v10996_v5 = vmax.f32 %v7877_v25, 0.0  ;;  %v10999_v52 = vmax.f32 %v10998_v60, 0.0 }
 0x29c   : > { %v2124_v50 = vsel %vm2090_vm1, %v6132_v24, %v6126_v43  ;;  %v2125_v53 = vsel %vm2090_vm1, %v6126_v43, %v10646_v58  ;;  %v8807_v3 = vpop.f32.mrf.mxu2  ;;  %v2324_v11 = vmax.f32 %v10995_v57, %v2146_v48  ;;  %v5640_v43 = vld [vmem:[%s10463_s3 + $0x420] sm:$0xf]  ;;  %v5969_v57 = vld [vmem:[%s10463_s3 + $0x428] sm:$0xf0] }
 0x29d   : > { %v2291_v15 = vmax.f32 %v10996_v5, %v2118_v1  ;;  %v2298_v56 = vmax.f32 %v10997_v4, %v2124_v50  ;;  %v2299_v24 = vmax.f32 %v10999_v52, %v2125_v53  ;;  %v5641_v25 = vor.u32 %v5969_v57, %v5640_v43  ;;  %v11005_v4 = vld [vmem:[#allocation30_spill] sm:$0xff]  ;;  %v11007_v52 = vld [vmem:[#allocation28_spill] sm:$0xff] }
 0x29e   : > { %v8828_v9 = vpack.c.bf16 %v2324_v11, %v2317_v8  ;;  %v2135_v53 = vsel %vm2090_vm1, %v11003_v26, %v6152_v49  ;;  %v11004_v50 = vunpack.i.l.bf16 %v8700_v17  ;;  %v5628_v11 = vld [vmem:[%s10463_s3 + $0x408] sm:$0xf]  ;;  %v5966_v17 = vld [vmem:[%s10463_s3 + $0x410] sm:$0xf0]  ;;  %v5616_v57 = vld [vmem:[%s10463_s3 + $0x3f0] sm:$0xf] }
 0x29f   : > { %v8824_v63 = vpack.c.bf16 %v2298_v56, %v2291_v15  ;;  %v8826_v48 = vpack.c.bf16 %v2299_v24, %v2292_v14  ;;  %3640 = vmatpush.bf16.msra.mxu3 %v5641_v25  ;;  %v5629_v8 = vor.u32 %v5966_v17, %v5628_v11  ;;  %v11006_v56 = vmax.f32 %v11005_v4, 0.0  ;;  %v5963_v25 = vld [vmem:[%s10463_s3 + $0x3f8] sm:$0xf0] }
 0x2a0   : > { %11002 = vst [vmem:[#allocation55_spill] sm:$0xff] %v8828_v9  ;;  %v2129_v1 = vsel %vm2090_vm1, %v11004_v50, %v6151_v42  ;;  %v11008_v24 = vmax.f32 %v11007_v52, 0.0  ;;  %v5617_v26 = vor.u32 %v5963_v25, %v5616_v57  ;;  %v11011_v57 = vld [vmem:[#allocation12_spill] sm:$0xff] }
 0x2a1   : > { %11000 = vst [vmem:[#allocation44_spill] sm:$0xff] %v8824_v63  ;;  %3569 = vmatmul.bf16.gmra.mxu1 %v8824_v63  ;;  %v8838_v55 = vpop.permute.xlu0 %6139  ;;  %v8840_v0 = vpop.permute.xlu2 %6164  ;;  %v2304_v60 = vmax.f32 %v11006_v56, %v2129_v1  ;;  %v11012_v25 = vmax.f32 %v11011_v57, 0.0  ;;  %v11015_v63 = vunpack.i.h.bf16 %v8408_v31  ;;  %v11023_v31 = vld [vmem:[#allocation9_spill] sm:$0xff] }
 0x2a2   : > { %11001 = vst [vmem:[#allocation64_spill] sm:$0xff] %v8826_v48  ;;  %v10647_v14 = vunpack.i.h.bf16 %v8838_v55  ;;  %v6141_v5 = vunpack.i.l.bf16 %v8838_v55  ;;  %v2311_v43 = vmax.f32 %v11008_v24, %v2135_v53  ;;  %v11010_v24 = vmax.f32 %v7993_v51, 0.0 }
 0x2a3   : > { %3493 = vmatmul.bf16.gmra.mxu3 %v8828_v9  ;;  %v11024_v10 = vmax.f32 %v11023_v31, 0.0  ;;  %v6166_v31 = vunpack.i.l.bf16 %v8840_v0 }
 0x2a4   : > { %v8851_v15 = vpop.f32.mrf.mxu2  ;;  %3641 = vmatpush.bf16.msra.mxu3 %v5629_v8  ;;  %v2130_v50 = vsel %vm2090_vm1, %v6151_v42, %v6141_v5  ;;  %v2131_v11 = vsel %vm2090_vm1, %v6141_v5, %v10647_v14  ;;  %v8867_v1 = vpack.c.bf16 %v2311_v43, %v2304_v60  ;;  %v5604_v5 = vld [vmem:[%s10463_s3 + $0x3d8] sm:$0xf]  ;;  %v5960_v60 = vld [vmem:[%s10463_s3 + $0x3e0] sm:$0xf0]  ;;  %v11013_v8 = vunpack.i.h.bf16 %v8236_v7 }
 0x2a5   : > { %v2305_v43 = vmax.f32 %v11010_v24, %v2130_v50  ;;  %v2306_v58 = vmax.f32 %v11012_v25, %v2131_v11  ;;  %v5605_v14 = vor.u32 %v5960_v60, %v5604_v5  ;;  %v11017_v5 = vld [vmem:[#allocation76_spill] sm:$0xff]  ;;  %v11019_v7 = vld [vmem:[#allocation77_spill] sm:$0xff] }
 0x2a6   : > { %3612 = vmatmul.bf16.gmra.mxu2 %v8826_v48  ;;  %11009 = vst [vmem:[#allocation62_spill] sm:$0xff] %v8867_v1  ;;  %v11018_v60 = vmax.f32 %v11017_v5, 0.0  ;;  %v11020_v57 = vmax.f32 %v11019_v7, 0.0  ;;  %v11021_v25 = vld [vmem:[#allocation36_spill] sm:$0xff] }
 0x2a8   : > { %3642 = vmatpush.bf16.msra.mxu3 %v5617_v26 }
 0x2a9   : > { %v8869_v17 = vpop.permute.xlu0 %6154  ;;  %v8871_v53 = vpop.permute.xlu1 %6144  ;;  %3531 = vmatmul.bf16.gmra.mxu0 %v8867_v1 }
 0x2aa   : > { %v10654_v4 = vunpack.i.h.bf16 %v8869_v17  ;;  %v6146_v42 = vunpack.i.l.bf16 %v8871_v53  ;;  %v8878_v52 = vpop.permute.xlu2 %6179  ;;  %v11014_v48 = vunpack.i.l.bf16 %v8869_v17  ;;  %v11016_v50 = vunpack.i.h.bf16 %v8871_v53 }
 0x2ab   : > { %v11067_v27 = vunpack.i.h.bf16 %v8869_v17 }
 0x2ac   : > { %v2158_v56 = vsel %vm2090_vm1, %v11013_v8, %v10654_v4  ;;  %v2152_v1 = vsel %vm2090_vm1, %v11015_v63, %v11014_v48  ;;  %v2136_v51 = vsel %vm2090_vm1, %v6152_v49, %v6146_v42  ;;  %v2137_v11 = vsel %vm2090_vm1, %v6146_v42, %v11016_v50  ;;  %v8904_v26 = vpop.f32.mrf.mxu2  ;;  %v5592_v49 = vld [vmem:[%s10463_s3 + $0x3c0] sm:$0xf]  ;;  %v5957_v48 = vld [vmem:[%s10463_s3 + $0x3c8] sm:$0xf0]  ;;  %3643 = vmatpush.bf16.msra.mxu3 %v5605_v14 }
 0x2ad   : > { %v2331_v24 = vmax.f32 %v11018_v60, %v2152_v1  ;;  %v2338_v8 = vmax.f32 %v11020_v57, %v2158_v56  ;;  %v11022_v4 = vmax.f32 %v11021_v25, 0.0  ;;  %v2313_v63 = vmax.f32 %v11024_v10, %v2137_v11 }
 0x2ae   : > { %v5593_v56 = vor.u32 %v5957_v48, %v5592_v49  ;;  %v5294_v49 = vld [vmem:[%s10463_s3 + $0x174] sm:$0xf0] }
 0x2af   : > { %v2312_v37 = vmax.f32 %v11022_v4, %v2136_v51  ;;  %v8920_v42 = vpack.c.bf16 %v2338_v8, %v2331_v24  ;;  %v8924_v50 = vpack.c.bf16 %v2313_v63, %v2306_v58  ;;  %v5198_v58 = vld [vmem:[%s10463_s3 + $0xb4] sm:$0xf0]  ;;  %v11029_v24 = vunpack.i.l.bf16 %v8730_v39  ;;  %v5881_v63 = vld [vmem:[%s10463_s3 + $0x16c] sm:$0xf] }
 0x2b0   : > { %3644 = vmatpush.bf16.msra.mxu3 %v5593_v56  ;;  %v11030_v48 = vld [vmem:[#allocation33_spill] sm:$0xff] }
 0x2b1   : > { %11025 = vst [vmem:[#allocation61_spill] sm:$0xff] %v8920_v42  ;;  %v8922_v1 = vpack.c.bf16 %v2312_v37, %v2305_v43  ;;  %v6170_v4 = vpop.permute.xlu0 %6169  ;;  %v8928_v10 = vpop.permute.xlu1 %6159  ;;  %v5857_v37 = vld [vmem:[%s10463_s3 + $0xac] sm:$0xf]  ;;  %v11028_v43 = vunpack.i.h.bf16 %v8730_v39  ;;  %v11031_v56 = vmax.f32 %v11030_v48, 0.0  ;;  %v5878_v39 = vld [vmem:[%s10463_s3 + $0x154] sm:$0xf] }
 0x2b2   : > { %11027 = vst [vmem:[#allocation58_spill] sm:$0xff] %v8924_v50  ;;  %v6172_v51 = vunpack.i.h.bf16 %v6170_v4  ;;  %v6171_v11 = vunpack.i.l.bf16 %v6170_v4  ;;  %v8931_v5 = vpop.permute.xlu2 %6189  ;;  %v5201_v14 = vor.u32 %v5857_v37, %v5198_v58  ;;  %v6161_v8 = vunpack.i.l.bf16 %v8928_v10  ;;  %v5854_v37 = vld [vmem:[%s10463_s3 + $0x94] sm:$0xf]  ;;  %v5186_v58 = vld [vmem:[%s10463_s3 + $0x9c] sm:$0xf0] }
 0x2b3   : > { %11026 = vst [vmem:[#allocation75_spill] sm:$0xff] %v8922_v1  ;;  %3574 = vmatmul.bf16.gmra.mxu1 %v8922_v1  ;;  %3498 = vmatmul.bf16.gmra.mxu3 %v8920_v42  ;;  %v5297_v1 = vor.u32 %v5881_v63, %v5294_v49  ;;  %v5189_v42 = vor.u32 %v5854_v37, %v5186_v58  ;;  %v11037_v63 = vld [vmem:[#allocation18_spill] sm:$0xff] }
 0x2b4   : > { %v2147_v60 = vsel %vm2090_vm1, %v11028_v43, %v6172_v51  ;;  %v2141_v7 = vsel %vm2090_vm1, %v11029_v24, %v6171_v11  ;;  %v8947_v25 = vpop.f32.mrf.mxu2  ;;  %3723 = vmatpush.bf16.msrb.mxu1 %v5201_v14  ;;  %v2148_v14 = vsel %vm2090_vm1, %v6172_v51, %v6166_v31  ;;  %v11032_v43 = vld [vmem:[#allocation7_spill] sm:$0xff]  ;;  %v2142_v48 = vsel %vm2090_vm1, %v6171_v11, %v6161_v8 }
 0x2b5   : > { %v2318_v4 = vmax.f32 %v11031_v56, %v2141_v7  ;;  %v11033_v24 = vmax.f32 %v11032_v43, 0.0  ;;  %v5282_v7 = vld [vmem:[%s10463_s3 + $0x15c] sm:$0xf0]  ;;  %v11034_v56 = vunpack.i.h.bf16 %v8928_v10  ;;  %3766 = vmatpush.bf16.msrb.mxu2 %v5297_v1  ;;  %v11038_v49 = vmax.f32 %v11037_v63, 0.0 }
 0x2b6   : > { %3617 = vmatmul.bf16.gmra.mxu2 %v8924_v50  ;;  %v5285_v11 = vor.u32 %v5878_v39, %v5282_v7  ;;  %v5875_v7 = vld [vmem:[%s10463_s3 + $0x13c] sm:$0xf] }
 0x2b7   : > { %v2325_v57 = vmax.f32 %v11033_v24, %v2147_v60  ;;  %v2143_v50 = vsel %vm2090_vm1, %v6161_v8, %v11034_v56  ;;  %v11036_v60 = vunpack.i.h.bf16 %v8840_v0  ;;  %v5851_v8 = vld [vmem:[%s10463_s3 + $0x7c] sm:$0xf]  ;;  %v11041_v56 = vld [vmem:[#allocation16_spill] sm:$0xff] }
 0x2b8   : > { %3724 = vmatpush.bf16.msrb.mxu1 %v5189_v42  ;;  %v11042_v1 = vmax.f32 %v11041_v56, 0.0 }
 0x2b9   : > { %v8978_v51 = vpack.c.bf16 %v2325_v57, %v2318_v4  ;;  %v8980_v43 = vpop.permute.xlu1 %6174  ;;  %v2149_v24 = vsel %vm2090_vm1, %v6166_v31, %v11036_v60  ;;  %v5174_v57 = vld [vmem:[%s10463_s3 + $0x84] sm:$0xf0]  ;;  %v2319_v31 = vmax.f32 %v11038_v49, %v2142_v48  ;;  %v11039_v4 = vld [vmem:[#allocation42_spill] sm:$0xff]  ;;  %v11045_v48 = vunpack.i.h.bf16 %v8571_v34  ;;  %3767 = vmatpush.bf16.msrb.mxu2 %v5285_v11  ;;  %v5258_v11 = vld [vmem:[%s10463_s3 + $0x12c] sm:$0xf0] }
 0x2ba   : > { %v11040_v37 = vmax.f32 %v11039_v4, 0.0  ;;  %v2320_v42 = vmax.f32 %v11042_v1, %v2143_v50  ;;  %v5177_v39 = vor.u32 %v5851_v8, %v5174_v57  ;;  %v5270_v60 = vld [vmem:[%s10463_s3 + $0x144] sm:$0xf0]  ;;  %v11044_v63 = vunpack.i.l.bf16 %v8980_v43  ;;  %v11048_v8 = vld [vmem:[#allocation81_spill] sm:$0xff]  ;;  %v5848_v1 = vld [vmem:[%s10463_s3 + $0x64] sm:$0xf] }
 0x2bb   : > { %11035 = vst [vmem:[#allocation50_spill] sm:$0xff] %v8978_v51  ;;  %3536 = vmatmul.bf16.gmra.mxu0 %v8978_v51  ;;  %v11046_v49 = vld [vmem:[#allocation43_spill] sm:$0xff]  ;;  %v11049_v57 = vmax.f32 %v11048_v8, 0.0  ;;  %v5273_v56 = vor.u32 %v5875_v7, %v5270_v60  ;;  %v5162_v51 = vld [vmem:[%s10463_s3 + $0x6c] sm:$0xf0] }
 0x2bc   : > { %v8986_v9 = vpop.permute.xlu2 %6199  ;;  %v2326_v58 = vmax.f32 %v11040_v37, %v2148_v14  ;;  %v9007_v62 = vpop.f32.mrf.mxu2  ;;  %v2164_v14 = vsel %vm2090_vm1, %v11045_v48, %v11044_v63  ;;  %v11047_v4 = vmax.f32 %v11046_v49, 0.0  ;;  %3725 = vmatpush.bf16.msrb.mxu1 %v5177_v39  ;;  %v5165_v48 = vor.u32 %v5848_v1, %v5162_v51  ;;  %v5869_v49 = vld [vmem:[%s10463_s3 + $0x10c] sm:$0xf] }
 0x2bd   : > { %11043 = vst [vmem:[#allocation38_spill] sm:$0xff] %v9007_v62  ;;  %v2345_v37 = vmax.f32 %v11049_v57, %v2164_v14  ;;  %3768 = vmatpush.bf16.msrb.mxu2 %v5273_v56  ;;  %v6177_v56 = vunpack.i.h.bf16 %v8980_v43  ;;  %v11055_v1 = vunpack.i.h.bf16 %v8840_v0  ;;  %v5866_v0 = vld [vmem:[%s10463_s3 + $0xf4] sm:$0xf] }
 0x2be   : > { %v2327_v50 = vmax.f32 %v11047_v4, %v2149_v24  ;;  %v9024_v34 = vpack.c.bf16 %v2326_v58, %v2319_v31  ;;  %v5872_v24 = vld [vmem:[%s10463_s3 + $0x124] sm:$0xf]  ;;  %v5845_v58 = vld [vmem:[%s10463_s3 + $0x4c] sm:$0xf]  ;;  %v5246_v4 = vld [vmem:[%s10463_s3 + $0x114] sm:$0xf0] }
 0x2bf   : > { %v9034_v39 = vpack.c.bf16 %v2345_v37, %v2345_v37  ;;  %v5261_v51 = vor.u32 %v5872_v24, %v5258_v11  ;;  %v11056_v24 = vunpack.i.h.bf16 %v8928_v10  ;;  %v11059_v10 = vld [vmem:[#allocation48_spill] sm:$0xff] }
 0x2c0   : > { %11050 = vst [vmem:[#allocation47_spill] sm:$0xff] %v9024_v34  ;;  %v9026_v63 = vpack.c.bf16 %v2327_v50, %v2320_v42  ;;  %v5150_v42 = vld [vmem:[%s10463_s3 + $0x54] sm:$0xf0]  ;;  %3726 = vmatpush.bf16.msrb.mxu1 %v5165_v48  ;;  %v5249_v50 = vor.u32 %v5869_v49, %v5246_v4  ;;  %v5234_v4 = vld [vmem:[%s10463_s3 + $0xfc] sm:$0xf0] }
 0x2c1   : > { %11052 = vst [vmem:[#allocation59_spill] sm:$0xff] %v9034_v39  ;;  %v5153_v57 = vor.u32 %v5845_v58, %v5150_v42  ;;  %3769 = vmatpush.bf16.msrb.mxu2 %v5261_v51  ;;  %v5842_v58 = vld [vmem:[%s10463_s3 + $0x34] sm:$0xf]  ;;  %v5138_v42 = vld [vmem:[%s10463_s3 + $0x3c] sm:$0xf0]  ;;  %v11064_v51 = vunpack.i.l.bf16 %v8931_v5 }
 0x2c2   : > { %11051 = vst [vmem:[#allocation35_spill] sm:$0xff] %v9026_v63  ;;  %v2069_v7 = vpop.permute.xlu1 %2068  ;;  %v5141_v49 = vor.u32 %v5842_v58, %v5138_v42  ;;  %v11062_v58 = vunpack.i.h.bf16 %v8931_v5  ;;  %v11063_v42 = vunpack.i.h.bf16 %v8630_v22 }
 0x2c3   : > { %3579 = vmatmul.bf16.gmra.mxu1 %v9024_v34  ;;  %3503 = vmatmul.bf16.gmra.mxu3 %v9034_v39  ;;  %v11066_v34 = vunpack.i.l.bf16 %v8878_v52 }
 0x2c4   : > { %v9039_v31 = vpop.permute.xlu2 %6214  ;;  %v9056_v8 = vpop.f32.mrf.mxu2  ;;  %3727 = vmatpush.bf16.msrb.mxu1 %v5153_v57  ;;  %v5126_v57 = vld [vmem:[%s10463_s3 + $0x24] sm:$0xf0] }
 0x2c5   : > { %11053 = vst [vmem:[#allocation56_spill] sm:$0xff] %v9039_v31  ;;  %v10669_v60 = vunpack.i.h.bf16 %v9039_v31  ;;  %v10672_v14 = vunpack.i.l.bf16 %v9039_v31  ;;  %v2155_v39 = vsel %vm2090_vm1, %v6177_v56, %v11066_v34  ;;  %3770 = vmatpush.bf16.msrb.mxu2 %v5249_v50  ;;  %v11068_v34 = vld [vmem:[#allocation25_spill] sm:$0xff] }
 0x2c6   : > { %3622 = vmatmul.bf16.gmra.mxu2 %v9026_v63  ;;  %11054 = vst [vmem:[#allocation53_spill] sm:$0xff] %v9056_v8  ;;  %v11060_v63 = vmax.f32 %v11059_v10, 0.0  ;;  %v2102_v10 = vsel %vm2090_vm1, %v11063_v42, %v11062_v58  ;;  %v5237_v58 = vor.u32 %v5866_v0, %v5234_v4  ;;  %v11072_v8 = vld [vmem:[#allocation37_spill] sm:$0xff] }
 0x2c7   : > { %v2150_v48 = vsel %vm2090_vm1, %v11055_v1, %v10669_v60  ;;  %v2144_v11 = vsel %vm2090_vm1, %v11056_v24, %v10672_v14  ;;  %v11057_v1 = vld [vmem:[#allocation66_spill] sm:$0xff]  ;;  %v5700_v14 = vld [vmem:[%s10463_s3 + $0x498] sm:$0xf]  ;;  %v11073_v30 = vmax.f32 %v11072_v8, 0.0 }
 0x2c8   : > { %v11058_v60 = vmax.f32 %v11057_v1, 0.0  ;;  %v2328_v24 = vmax.f32 %v11060_v63, %v2150_v48  ;;  %v5984_v1 = vld [vmem:[%s10463_s3 + $0x4a0] sm:$0xf0]  ;;  %v5839_v63 = vld [vmem:[%s10463_s3 + $0x1c] sm:$0xf]  ;;  %3728 = vmatpush.bf16.msrb.mxu1 %v5141_v49  ;;  %v11076_v49 = vmax.f32 %v8250_v12, 0.0 }
 0x2c9   : > { %v5129_v42 = vor.u32 %v5839_v63, %v5126_v57  ;;  %v11074_v50 = vld [vmem:[#allocation13_spill] sm:$0xff]  ;;  %v11077_v57 = vunpack.i.l.bf16 %v8869_v17  ;;  %v5688_v8 = vld [vmem:[%s10463_s3 + $0x480] sm:$0xf]  ;;  %v5981_v12 = vld [vmem:[%s10463_s3 + $0x488] sm:$0xf0]  ;;  %3771 = vmatpush.bf16.msrb.mxu2 %v5237_v58 }
 0x2ca   : > { %v2321_v37 = vmax.f32 %v11058_v60, %v2144_v11  ;;  %v6182_v60 = vunpack.i.h.bf16 %v8878_v52  ;;  %v5701_v11 = vor.u32 %v5984_v1, %v5700_v14  ;;  %v11065_v14 = vunpack.i.h.bf16 %v8618_v61  ;;  %v9121_v36 = vpop.permute.xlu0 %6184  ;;  %v11078_v17 = vld [vmem:[#allocation11_spill] sm:$0xff] }
 0x2cb   : > { %v6187_v61 = vunpack.i.h.bf16 %v9121_v36  ;;  %v11075_v0 = vmax.f32 %v11074_v50, 0.0 }
 0x2cc   : > { %v9100_v48 = vpack.c.bf16 %v2328_v24, %v2321_v37  ;;  %v2096_v1 = vsel %vm2090_vm1, %v11065_v14, %v11064_v51  ;;  %v2159_v37 = vsel %vm2090_vm1, %v11067_v27, %v2069_v7  ;;  %v9118_v24 = vpop.permute.xlu1 %2082  ;;  %v2160_v22 = vsel %vm2090_vm1, %v2069_v7, %v6182_v60  ;;  %3686 = vmatpush.bf16.msrb.mxu0 %v5701_v11  ;;  %v9131_v62 = vpop.f32.mrf.mxu2  ;;  %v5863_v11 = vld [vmem:[%s10463_s3 + $0xdc] sm:$0xf] }
 0x2cd   : > { %v6186_v51 = vunpack.i.l.bf16 %v9121_v36  ;;  %v11069_v14 = vmax.f32 %v11068_v34, 0.0  ;;  %v11071_v27 = vmax.f32 %v11070_v16, 0.0  ;;  %v2339_v7 = vmax.f32 %v11073_v30, %v2159_v37  ;;  %3729 = vmatpush.bf16.msrb.mxu1 %v5129_v42  ;;  %v5210_v42 = vld [vmem:[%s10463_s3 + $0xcc] sm:$0xf0] }
 0x2ce   : > { %11061 = vst [vmem:[#allocation79_spill] sm:$0xff] %v9100_v48  ;;  %v2334_v4 = vmax.f32 %v11075_v0, %v2155_v39  ;;  %v2340_v63 = vmax.f32 %v11076_v49, %v2160_v22  ;;  %v2153_v16 = vsel %vm2090_vm1, %v11077_v57, %v6187_v61  ;;  %v5222_v39 = vld [vmem:[%s10463_s3 + $0xe4] sm:$0xf0]  ;;  %v5689_v34 = vor.u32 %v5981_v12, %v5688_v8 }
 0x2cf   : > { %v2272_v59 = vmax.f32 %v11069_v14, %v2102_v10  ;;  %v2265_v31 = vmax.f32 %v11071_v27, %v2096_v1  ;;  %v2154_v10 = vsel %vm2090_vm1, %v6187_v61, %v6177_v56  ;;  %v2161_v30 = vsel %vm2090_vm1, %v6182_v60, %v6186_v51  ;;  %v5836_v14 = vld [vmem:[%s10463_s3 + $0x4] sm:$0xf]  ;;  %v5114_v27 = vld [vmem:[%s10463_s3 + $0xc] sm:$0xf0]  ;;  %v11085_v12 = vld [vmem:[#allocation63_spill] sm:$0xff] }
 0x2d0   : > { %v11079_v1 = vmax.f32 %v11078_v17, 0.0  ;;  %v11080_v56 = vmax.f32 %v8290_v6, 0.0  ;;  %v11081_v60 = vmax.f32 %v8262_v54, 0.0  ;;  %v5225_v49 = vor.u32 %v5863_v11, %v5222_v39  ;;  %3687 = vmatpush.bf16.msrb.mxu0 %v5689_v34 }
 0x2d1   : > { %v9174_v54 = vpack.c.bf16 %v2272_v59, %v2265_v31  ;;  %v5117_v57 = vor.u32 %v5836_v14, %v5114_v27  ;;  %v11083_v31 = vunpack.i.h.bf16 %v8871_v53  ;;  %v11086_v17 = vmax.f32 %v11085_v12, 0.0  ;;  %v11096_v12 = vld [vmem:[#allocation27_spill] sm:$0xff] }
 0x2d2   : > { %v2332_v37 = vmax.f32 %v11079_v1, %v2153_v16  ;;  %v2333_v22 = vmax.f32 %v11080_v56, %v2154_v10  ;;  %v2341_v61 = vmax.f32 %v11081_v60, %v2161_v30  ;;  %v5860_v16 = vld [vmem:[%s10463_s3 + $0xc4] sm:$0xf]  ;;  %3772 = vmatpush.bf16.msrb.mxu2 %v5225_v49  ;;  %v6201_v60 = vunpack.i.l.bf16 %v8986_v9 }
 0x2d3   : > { %11082 = vst [vmem:[#allocation83_spill] sm:$0xff] %v9174_v54  ;;  %v9188_v59 = vpop.permute.xlu0 %6194  ;;  %3645 = vmatmul.bf16.vlgmr.msra.gmra.mxu3 %v9174_v54  ;;  %v5213_v39 = vor.u32 %v5860_v16, %v5210_v42  ;;  %3730 = vmatpush.bf16.msrb.mxu1 %v5117_v57  ;;  %v11090_v34 = vunpack.i.l.bf16 %v8980_v43  ;;  %v11091_v49 = vunpack.i.h.bf16 %v8638_v33  ;;  %v11092_v16 = vunpack.i.h.bf16 %v8674_v40  ;;  %v11093_v43 = vld [vmem:[#allocation15_spill] sm:$0xff] }
 0x2d4   : > { %v9168_v50 = vpack.c.bf16 %v2339_v7, %v2332_v37  ;;  %v9170_v0 = vpack.c.bf16 %v2340_v63, %v2333_v22  ;;  %v9172_v6 = vpack.c.bf16 %v2341_v61, %v2334_v4  ;;  %v9176_v58 = vpop.permute.xlu1 %6209  ;;  %v11084_v63 = vunpack.i.h.bf16 %v8838_v55  ;;  %v9202_v30 = vpop.f32.mrf.mxu2  ;;  %v11087_v37 = vld [vmem:[#allocation40_spill] sm:$0xff] }
 0x2d5   : > { %v6212_v7 = vunpack.i.h.bf16 %v9176_v58  ;;  %v6211_v4 = vunpack.i.l.bf16 %v9176_v58  ;;  %v6196_v8 = vunpack.i.l.bf16 %v9188_v59  ;;  %v11088_v53 = vmax.f32 %v11087_v37, 0.0 }
 0x2d6   : > { %3541 = vmatmul.bf16.gmra.mxu0 %v9168_v50  ;;  %3584 = vmatmul.bf16.gmra.mxu1 %v9170_v0  ;;  %v6202_v22 = vunpack.i.h.bf16 %v8986_v9  ;;  %v6197_v55 = vunpack.i.h.bf16 %v9188_v59  ;;  %v2165_v14 = vsel %vm2090_vm1, %v11090_v34, %v9118_v24  ;;  %v2108_v9 = vsel %vm2090_vm1, %v11092_v16, %v6201_v60 }
 0x2d7   : > { %3627 = vmatmul.bf16.gmra.mxu2 %v9172_v6  ;;  %v2138_v11 = vsel %vm2090_vm1, %v11083_v31, %v6212_v7  ;;  %v2132_v10 = vsel %vm2090_vm1, %v11084_v63, %v6211_v4  ;;  %v2166_v27 = vsel %vm2090_vm1, %v9118_v24, %v6196_v8  ;;  %v11095_v33 = vmax.f32 %v8304_v45, 0.0 }
 0x2d8   : > { %v2307_v1 = vmax.f32 %v11086_v17, %v2132_v10  ;;  %v2314_v56 = vmax.f32 %v11088_v53, %v2138_v11  ;;  %3773 = vmatpush.bf16.msrb.mxu2 %v5213_v39  ;;  %v2114_v57 = vsel %vm2090_vm1, %v11091_v49, %v6202_v22  ;;  %v2167_v31 = vsel %vm2090_vm1, %v6196_v8, %v6197_v55 }
 0x2d9   : > { %v11094_v11 = vmax.f32 %v11093_v43, 0.0  ;;  %v2347_v39 = vmax.f32 %v11095_v33, %v2166_v27  ;;  %v11097_v17 = vmax.f32 %v11096_v12, 0.0 }
 0x2da   : > { %v9212_v61 = vpack.c.bf16 %v2314_v56, %v2307_v1  ;;  %v11098_v1 = vld [vmem:[#allocation60_spill] sm:$0xff]  ;;  %v11100_v56 = vmax.f32 %v8389_v13, 0.0 }
 0x2db   : > { %v9226_v42 = vpop.permute.xlu0 %6204  ;;  %v2346_v63 = vmax.f32 %v11094_v11, %v2165_v14  ;;  %v2279_v40 = vmax.f32 %v11097_v17, %v2108_v9  ;;  %v11099_v37 = vmax.f32 %v11098_v1, 0.0  ;;  %v3517_v49 = vpop.f32.mrf.mxu0  ;;  %v9246_v14 = vpack.c.bf16 %v2347_v39, %v2347_v39  ;;  %v11103_v39 = vld [vmem:[#allocation46_spill] sm:$0xff] }
 0x2dc   : > { %11089 = vst [vmem:[#allocation84_spill] sm:$0xff] %v9212_v61  ;;  %v9233_v10 = vpop.f32.mrf.mxu2  ;;  %v2348_v34 = vmax.f32 %v11100_v56, %v2167_v31  ;;  %v11102_v31 = vunpack.i.l.bf16 %v8878_v52  ;;  %v6206_v33 = vunpack.i.l.bf16 %v9226_v42  ;;  %v11104_v12 = vmax.f32 %v11103_v39, 0.0 }
 0x2dd   : > { %v2286_v53 = vmax.f32 %v11099_v37, %v2114_v57  ;;  %v9244_v16 = vpack.c.bf16 %v2346_v63, %v2346_v63  ;;  %v11107_v52 = vunpack.i.h.bf16 %v8685_v20 }
 0x2de   : > { %v3474_v24 = vpop.f32.mrf.mxu3  ;;  %v9250_v45 = vpack.c.bf16 %v2348_v34, %v2348_v34  ;;  %v11108_v34 = vunpack.i.h.bf16 %v8931_v5 }
 0x2df   : > { %v3475_v8 = vadd.f32 %v3474_v24, %v8756_v23  ;;  %v9248_v11 = vpack.c.bf16 %v2286_v53, %v2279_v40  ;;  %v6207_v24 = vunpack.i.h.bf16 %v9226_v42  ;;  %v11105_v40 = vmax.f32 %v8405_v47, 0.0 }
 0x2e0   : > { %v2120_v56 = vsel %vm2090_vm1, %v11107_v52, %v6206_v33  ;;  %v11109_v42 = vmax.f32 %v8277_v18, 0.0  ;;  %v11111_v47 = vmax.f32 %v8274_v41, 0.0  ;;  %v11117_v18 = vld [vmem:[#allocation8_spill] sm:$0xff]  ;;  %v11119_v52 = vmax.f32 %v8399_v44, 0.0  ;;  %v5390_v44 = vld [vmem:[%s10463_s3 + $0x234] sm:$0xf0] }
 0x2e1   : > { %v3518_v43 = vadd.f32 %v3517_v49, %v3475_v8  ;;  %11101 = vst [vmem:[#allocation82_spill] sm:$0xff] %v9248_v11  ;;  %v11110_v49 = vunpack.i.l.bf16 %v8931_v5 }
 0x2e2   : > { %v2273_v8 = vmax.f32 %v11109_v42, %v11108_v34 }
 0x2e3   : > { %v9253_v27 = vpop.permute.xlu0 %6219  ;;  %3650 = vmatmul.bf16.gmra.mxu3 %v9248_v11 }
 0x2e4   : > { %v10687_v13 = vunpack.i.h.bf16 %v9253_v27  ;;  %v10686_v23 = vunpack.i.l.bf16 %v9253_v27 }
 0x2e6   : > { %3546 = vmatmul.bf16.gmra.mxu0 %v9244_v16  ;;  %3589 = vmatmul.bf16.gmra.mxu1 %v9246_v14  ;;  %v2162_v9 = vsel %vm2090_vm1, %v6186_v51, %v10687_v13  ;;  %v2156_v63 = vsel %vm2090_vm1, %v11102_v31, %v10686_v23  ;;  %v3476_v36 = vpop.f32.mrf.mxu3  ;;  %v11106_v51 = vunpack.i.h.bf16 %v8786_v2  ;;  %v11138_v13 = vld [vmem:[#allocation69_spill] sm:$0xff] }
 0x2e7   : > { %3632 = vmatmul.bf16.gmra.mxu2 %v9250_v45  ;;  %v2335_v17 = vmax.f32 %v11104_v12, %v2156_v63  ;;  %v2342_v1 = vmax.f32 %v11105_v40, %v2162_v9  ;;  %v2266_v9 = vmax.f32 %v11111_v47, %v11110_v49  ;;  %v11112_v63 = vld [vmem:[#allocation31_spill] sm:$0xff]  ;;  %v11114_v12 = vld [vmem:[#allocation14_spill] sm:$0xff]  ;;  %v3519_v49 = vpop.f32.mrf.mxu0 }
 0x2e8   : > { %v2126_v53 = vsel %vm2090_vm1, %v11106_v51, %v6207_v24  ;;  %v11113_v2 = vmax.f32 %v11112_v63, 0.0  ;;  %v11118_v51 = vmax.f32 %v8402_v38, 0.0  ;;  %v3477_v63 = vadd.f32 %v3476_v36, %v8807_v3  ;;  %v5905_v38 = vld [vmem:[%s10463_s3 + $0x22c] sm:$0xf] }
 0x2e9   : > { %v9260_v57 = vpop.f32.mrf.mxu2  ;;  %v9278_v37 = vpack.c.bf16 %v2342_v1, %v2335_v17  ;;  %v11115_v17 = vmax.f32 %v11114_v12, 0.0  ;;  %v9300_v40 = vpack.c.bf16 %v2273_v8, %v2266_v9 }
 0x2ea   : > { %v2293_v39 = vmax.f32 %v11113_v2, %v2120_v56  ;;  %v2280_v56 = vmax.f32 %v11119_v52, %v6201_v60  ;;  %v11120_v2 = vld [vmem:[#allocation34_spill] sm:$0xff]  ;;  %v3520_v36 = vadd.f32 %v3519_v49, %v3477_v63 }
 0x2eb   : > { %v2300_v20 = vmax.f32 %v11115_v17, %v2126_v53  ;;  %v2287_v53 = vmax.f32 %v11118_v51, %v6202_v22  ;;  %v5393_v22 = vor.u32 %v5905_v38, %v5390_v44  ;;  %v5902_v17 = vld [vmem:[%s10463_s3 + $0x214] sm:$0xf] }
 0x2ed   : > { %v9302_v1 = vpack.c.bf16 %v2300_v20, %v2293_v39  ;;  %v9315_v9 = vpack.c.bf16 %v2287_v53, %v2280_v56  ;;  %3809 = vmatpush.bf16.msrb.mxu3 %v5393_v22  ;;  %v5378_v20 = vld [vmem:[%s10463_s3 + $0x21c] sm:$0xf0] }
 0x2ee   : > { %v3479_v41 = vpop.f32.mrf.mxu3  ;;  %v5381_v52 = vor.u32 %v5902_v17, %v5378_v20  ;;  %v5342_v20 = vld [vmem:[%s10463_s3 + $0x1d4] sm:$0xf0] }
 0x2ef   : > { %11116 = vst [vmem:[#allocation24_spill] sm:$0xff] %v9302_v1  ;;  %v3480_v39 = vadd.f32 %v3479_v41, %v8851_v15  ;;  %v5366_v15 = vld [vmem:[%s10463_s3 + $0x204] sm:$0xf0] }
 0x2f1   : > { %v9294_v31 = vpop.f32.mrf.mxu2  ;;  %3810 = vmatpush.bf16.msrb.mxu3 %v5381_v52 }
 0x2f3   : > { %3655 = vmatmul.bf16.gmra.mxu3 %v9302_v1 }
 0x2f6   : > { %5710 = vmatmul.msk.bf16.vlgmr.msrb.gmra.mxu0 %vm3400_vm2, %v9300_v40  ;;  %3731 = vmatmul.bf16.vlgmr.msrb.gmra.mxu1 %v11117_v18  ;;  %v3481_v42 = vpop.f32.mrf.mxu3 }
 0x2f7   : > { %3774 = vmatmul.bf16.vlgmr.msrb.gmra.mxu2 %v8466_v46 }
 0x2f9   : > { %v9309_v5 = vpop.f32.mrf.mxu2 }
 0x2fe   : > { %v3560_v8 = vpop.f32.mrf.mxu1 }
 0x2ff   : > { %v3561_v47 = vadd.f32 %v3560_v8, %v3518_v43  ;;  %v11121_v8 = vmax.f32 %v8541_v28, 0.0 }
 0x301   : > { %v3463_v34 = vpop.f32.mrf.mxu2  ;;  %v2301_v49 = vmax.f32 %v11121_v8, %v6207_v24 }
 0x302   : > { %v5899_v34 = vld [vmem:[%s10463_s3 + $0x1fc] sm:$0xf] }
 0x303   : > { %3660 = vmatmul.bf16.gmra.mxu3 %v9212_v61  ;;  %v5369_v41 = vor.u32 %v5899_v34, %v5366_v15 }
 0x305   : > { %3811 = vmatpush.bf16.msrb.mxu3 %v5369_v41 }
 0x306   : > { %5711 = vmatmul.msk.bf16.gmra.mxu0 %vm3400_vm2, %v9315_v9  ;;  %3736 = vmatmul.bf16.gmra.mxu1 %v11120_v2  ;;  %v3484_v3 = vpop.f32.mrf.mxu3  ;;  %v3562_v12 = vpop.f32.mrf.mxu1 }
 0x307   : > { %3779 = vmatmul.bf16.gmra.mxu2 %v8395_v32  ;;  %v3522_v51 = vpop.f32.mrf.mxu0  ;;  %v3563_v53 = vadd.f32 %v3562_v12, %v3520_v36  ;;  %v5896_v36 = vld [vmem:[%s10463_s3 + $0x1e4] sm:$0xf]  ;;  %v3485_v41 = vadd.f32 %v3484_v3, %v8947_v25  ;;  %v5318_v25 = vld [vmem:[%s10463_s3 + $0x1a4] sm:$0xf0] }
 0x308   : > { %v3523_v56 = vadd.f32 %v3522_v51, %v3480_v39  ;;  %v5354_v39 = vld [vmem:[%s10463_s3 + $0x1ec] sm:$0xf0]  ;;  %v3482_v51 = vadd.f32 %v3481_v42, %v8904_v26  ;;  %v5330_v26 = vld [vmem:[%s10463_s3 + $0x1bc] sm:$0xf0] }
 0x309   : > { %v3603_v60 = vpop.f32.mrf.mxu2  ;;  %v5357_v24 = vor.u32 %v5896_v36, %v5354_v39  ;;  %v11124_v36 = vmax.f32 %v8414_v19, 0.0  ;;  %v5306_v19 = vld [vmem:[%s10463_s3 + $0x18c] sm:$0xf0] }
 0x30a   : > { %v9329_v43 = vadd.f32 %v3603_v60, %v3561_v47  ;;  %v11122_v47 = vmax.f32 %v8563_v21, 0.0  ;;  %v11123_v21 = vld [vmem:[#allocation39_spill] sm:$0xff] }
 0x30b   : > { %3812 = vmatpush.bf16.msrb.mxu3 %v5357_v24  ;;  %v2315_v39 = vmax.f32 %v11124_v36, %v6212_v7 }
 0x30c   : > { %v2294_v63 = vmax.f32 %v11122_v47, %v6206_v33  ;;  %v5893_v33 = vld [vmem:[%s10463_s3 + $0x1cc] sm:$0xf] }
 0x30e   : > { %v3486_v44 = vpop.f32.mrf.mxu3  ;;  %v3565_v60 = vpop.f32.mrf.mxu1  ;;  %v9356_v17 = vpack.c.bf16 %v2301_v49, %v2294_v63  ;;  %v5890_v49 = vld [vmem:[%s10463_s3 + $0x1b4] sm:$0xf] }
 0x30f   : > { %v3524_v12 = vpop.f32.mrf.mxu0  ;;  %v3566_v28 = vadd.f32 %v3565_v60, %v3523_v56  ;;  %v5333_v63 = vor.u32 %v5890_v49, %v5330_v26  ;;  %v5887_v60 = vld [vmem:[%s10463_s3 + $0x19c] sm:$0xf]  ;;  %v11128_v49 = vld [vmem:[#allocation38_spill] sm:$0xff] }
 0x310   : > { %v3525_v56 = vadd.f32 %v3524_v12, %v3482_v51  ;;  %v5321_v3 = vor.u32 %v5887_v60, %v5318_v25  ;;  %v11125_v12 = vmax.f32 %v8411_v29, 0.0  ;;  %v3487_v26 = vadd.f32 %v3486_v44, %v11128_v49  ;;  %v5678_v60 = vld [vmem:[%s10463_s3 + $0x474] sm:$0xf0]  ;;  %v5666_v49 = vld [vmem:[%s10463_s3 + $0x45c] sm:$0xf0] }
 0x311   : > { %v3605_v38 = vpop.f32.mrf.mxu2 }
 0x312   : > { %v9348_v22 = vadd.f32 %v3605_v38, %v3563_v53  ;;  %v5345_v53 = vor.u32 %v5893_v33, %v5342_v20 }
 0x313   : > { %3665 = vmatmul.bf16.gmra.mxu3 %v9100_v48 }
 0x314   : > { %3813 = vmatpush.bf16.msrb.mxu3 %v5345_v53  ;;  %v5884_v53 = vld [vmem:[%s10463_s3 + $0x184] sm:$0xf] }
 0x316   : > { %5712 = vmatmul.msk.bf16.gmra.mxu0 %vm3400_vm2, %v9356_v17  ;;  %3741 = vmatmul.bf16.gmra.mxu1 %v11123_v21  ;;  %v3489_v34 = vpop.f32.mrf.mxu3  ;;  %v3567_v8 = vpop.f32.mrf.mxu1 }
 0x317   : > { %3784 = vmatmul.bf16.gmra.mxu2 %v8670_v35  ;;  %v3527_v42 = vpop.f32.mrf.mxu0  ;;  %v3568_v47 = vadd.f32 %v3567_v8, %v3525_v56  ;;  %v5929_v56 = vld [vmem:[%s10463_s3 + $0x2ec] sm:$0xf] }
 0x318   : > { %v3528_v38 = vadd.f32 %v3527_v42, %v3485_v41  ;;  %3814 = vmatpush.bf16.msrb.mxu3 %v5333_v63  ;;  %v5486_v41 = vld [vmem:[%s10463_s3 + $0x2f4] sm:$0xf0]  ;;  %v5953_v8 = vld [vmem:[%s10463_s3 + $0x3ac] sm:$0xf]  ;;  %v11129_v42 = vld [vmem:[#allocation32_spill] sm:$0xff] }
 0x319   : > { %v3608_v52 = vpop.f32.mrf.mxu2  ;;  %v5582_v63 = vld [vmem:[%s10463_s3 + $0x3b4] sm:$0xf0] }
 0x31a   : > { %v9370_v15 = vadd.f32 %v3608_v52, %v3566_v28  ;;  %v2308_v28 = vmax.f32 %v11125_v12, %v6211_v4  ;;  %v5309_v52 = vor.u32 %v5884_v53, %v5306_v19  ;;  %v11127_v4 = vld [vmem:[#allocation45_spill] sm:$0xff]  ;;  %v5926_v53 = vld [vmem:[%s10463_s3 + $0x2d4] sm:$0xf]  ;;  %v5474_v19 = vld [vmem:[%s10463_s3 + $0x2dc] sm:$0xf0] }
 0x31c   : > { %3815 = vmatpush.bf16.msrb.mxu3 %v5321_v3  ;;  %v9403_v29 = vpack.c.bf16 %v2315_v39, %v2308_v28  ;;  %v5585_v3 = vor.u32 %v5953_v8, %v5582_v63  ;;  %v11130_v28 = vld [vmem:[#allocation53_spill] sm:$0xff]  ;;  %v5974_v8 = vld [vmem:[%s10463_s3 + $0x454] sm:$0xf] }
 0x31d   : > { %v5669_v63 = vor.u32 %v5974_v8, %v5666_v49 }
 0x31e   : > { %v9393_v33 = vpop.f32.mrf.mxu3  ;;  %v3570_v51 = vpop.f32.mrf.mxu1  ;;  %11126 = vst [vmem:[#allocation67_spill] sm:$0xff] %v9403_v29  ;;  %3895 = vmatpush.bf16.msra.mxu1 %v5585_v3 }
 0x31f   : > { %v3529_v7 = vpop.f32.mrf.mxu0  ;;  %v3571_v58 = vadd.f32 %v3570_v51, %v3528_v38  ;;  %v5977_v38 = vld [vmem:[%s10463_s3 + $0x46c] sm:$0xf] }
 0x320   : > { %3816 = vmatpush.bf16.msrb.mxu3 %v5309_v52  ;;  %v5681_v44 = vor.u32 %v5977_v38, %v5678_v60  ;;  %v3530_v36 = vadd.f32 %v3529_v7, %v3487_v26  ;;  %v5950_v7 = vld [vmem:[%s10463_s3 + $0x394] sm:$0xf]  ;;  %v5923_v38 = vld [vmem:[%s10463_s3 + $0x2bc] sm:$0xf]  ;;  %v5462_v60 = vld [vmem:[%s10463_s3 + $0x2c4] sm:$0xf0] }
 0x321   : > { %v3610_v24 = vpop.f32.mrf.mxu2  ;;  %v5465_v3 = vor.u32 %v5923_v38, %v5462_v60  ;;  %v11136_v38 = vld [vmem:[#allocation54_spill] sm:$0xff] }
 0x322   : > { %v9395_v20 = vadd.f32 %v3610_v24, %v3568_v47  ;;  %v5489_v47 = vor.u32 %v5929_v56, %v5486_v41  ;;  %v3490_v24 = vadd.f32 %v3489_v34, %v11130_v28  ;;  %3938 = vmatpush.bf16.msra.mxu2 %v5681_v44  ;;  %v5477_v34 = vor.u32 %v5926_v53, %v5474_v19  ;;  %v5570_v41 = vld [vmem:[%s10463_s3 + $0x39c] sm:$0xf0]  ;;  %v5558_v44 = vld [vmem:[%s10463_s3 + $0x384] sm:$0xf0]  ;;  %v11131_v19 = vld [vmem:[#allocation56_spill] sm:$0xff] }
 0x323   : > { %3670 = vmatmul.bf16.gmra.mxu3 %v9278_v37  ;;  %v5654_v28 = vld [vmem:[%s10463_s3 + $0x444] sm:$0xf0]  ;;  %v11135_v49 = vunpack.i.l.bf16 %v11131_v19  ;;  %v11137_v60 = vmax.f32 %v11136_v38, 0.0  ;;  %v5534_v38 = vld [vmem:[%s10463_s3 + $0x354] sm:$0xf0] }
 0x324   : > { %3852 = vmatpush.bf16.msra.mxu0 %v5489_v47  ;;  %5986 = vmatpush.bf16.msra.mxu3 %v5489_v47  ;;  %v5573_v47 = vor.u32 %v5950_v7, %v5570_v41  ;;  %v11132_v7 = vunpack.i.h.bf16 %v11131_v19 }
 0x325   : > { %v2322_v23 = vmax.f32 %v11137_v60, %v11135_v49  ;;  %v5965_v60 = vld [vmem:[%s10463_s3 + $0x40c] sm:$0xf] }
 0x326   : > { %5713 = vmatmul.msk.bf16.gmra.mxu0 %vm3400_vm2, %v9403_v29  ;;  %3746 = vmatmul.bf16.gmra.mxu1 %v11127_v4  ;;  %v9429_v39 = vpop.f32.mrf.mxu3  ;;  %v3572_v51 = vpop.f32.mrf.mxu1 }
 0x327   : > { %3789 = vmatmul.bf16.gmra.mxu2 %v11129_v42  ;;  %v3532_v52 = vpop.f32.mrf.mxu0  ;;  %v3573_v56 = vadd.f32 %v3572_v51, %v3530_v36  ;;  %v5971_v36 = vld [vmem:[%s10463_s3 + $0x43c] sm:$0xf]  ;;  %3896 = vmatpush.bf16.msra.mxu1 %v5573_v47  ;;  %v11139_v42 = vmax.f32 %v11138_v13, 0.0  ;;  %v5944_v13 = vld [vmem:[%s10463_s3 + $0x364] sm:$0xf] }
 0x328   : > { %v3533_v26 = vadd.f32 %v3532_v52, %v3490_v24  ;;  %3853 = vmatpush.bf16.msra.mxu0 %v5477_v34  ;;  %5987 = vmatpush.bf16.msra.mxu3 %v5477_v34  ;;  %v5657_v53 = vor.u32 %v5971_v36, %v5654_v28  ;;  %v11133_v52 = vld [vmem:[#allocation19_spill] sm:$0xff]  ;;  %v5968_v36 = vld [vmem:[%s10463_s3 + $0x424] sm:$0xf]  ;;  %v5642_v28 = vld [vmem:[%s10463_s3 + $0x42c] sm:$0xf0] }
 0x329   : > { %v3613_v25 = vpop.f32.mrf.mxu2  ;;  %3939 = vmatpush.bf16.msra.mxu2 %v5669_v63  ;;  %v11134_v41 = vmax.f32 %v11133_v52, 0.0  ;;  %v5920_v63 = vld [vmem:[%s10463_s3 + $0x2a4] sm:$0xf]  ;;  %v5941_v52 = vld [vmem:[%s10463_s3 + $0x34c] sm:$0xf] }
 0x32a   : > { %v9431_v12 = vadd.f32 %v3613_v25, %v3571_v58  ;;  %v9443_v58 = vpop.permute.xlu1 %2088  ;;  %v5947_v25 = vld [vmem:[%s10463_s3 + $0x37c] sm:$0xf] }
 0x32b   : > { %v2168_v24 = vsel %vm2090_vm1, %v6197_v55, %v9443_v58  ;;  %v5561_v51 = vor.u32 %v5947_v25, %v5558_v44  ;;  %v2329_v8 = vmax.f32 %v11134_v41, %v11132_v7  ;;  %v5450_v25 = vld [vmem:[%s10463_s3 + $0x2ac] sm:$0xf0]  ;;  %v5917_v7 = vld [vmem:[%s10463_s3 + $0x28c] sm:$0xf]  ;;  %v3492_v41 = vadd.f32 %v9393_v33, %v9131_v62 }
 0x32c   : > { %v2349_v59 = vmax.f32 %v11139_v42, %v2168_v24  ;;  %3854 = vmatpush.bf16.msra.mxu0 %v5465_v3  ;;  %5988 = vmatpush.bf16.msra.mxu3 %v5465_v3  ;;  %v5453_v44 = vor.u32 %v5920_v63, %v5450_v25  ;;  %v5546_v3 = vld [vmem:[%s10463_s3 + $0x36c] sm:$0xf0]  ;;  %v5537_v62 = vor.u32 %v5941_v52, %v5534_v38  ;;  %v5935_v38 = vld [vmem:[%s10463_s3 + $0x31c] sm:$0xf] }
 0x32d   : > { %3897 = vmatpush.bf16.msra.mxu1 %v5561_v51  ;;  %3940 = vmatpush.bf16.msra.mxu2 %v5657_v53  ;;  %v9508_v24 = vpack.c.bf16 %v2329_v8, %v2322_v23  ;;  %v5549_v51 = vor.u32 %v5944_v13, %v5546_v3  ;;  %v5645_v53 = vor.u32 %v5968_v36, %v5642_v28  ;;  %v5438_v23 = vld [vmem:[%s10463_s3 + $0x294] sm:$0xf0]  ;;  %v11141_v8 = vld [vmem:[#allocation55_spill] sm:$0xff]  ;;  %v5426_v3 = vld [vmem:[%s10463_s3 + $0x27c] sm:$0xf0] }
 0x32e   : > { %v9486_v29 = vpop.f32.mrf.mxu3  ;;  %v9510_v19 = vpack.c.bf16 %v2349_v59, %v2349_v59  ;;  %v5441_v49 = vor.u32 %v5917_v7, %v5438_v23  ;;  %v5938_v36 = vld [vmem:[%s10463_s3 + $0x334] sm:$0xf]  ;;  %v5618_v7 = vld [vmem:[%s10463_s3 + $0x3fc] sm:$0xf0] }
 0x32f   : > { %v3534_v42 = vpop.f32.mrf.mxu0 }
 0x330   : > { %v3575_v47 = vpop.f32.mrf.mxu1  ;;  %3855 = vmatpush.bf16.msra.mxu0 %v5453_v44  ;;  %5989 = vmatpush.bf16.msra.mxu3 %v5453_v44  ;;  %v5914_v44 = vld [vmem:[%s10463_s3 + $0x274] sm:$0xf] }
 0x331   : > { %v3615_v34 = vpop.f32.mrf.mxu2  ;;  %3898 = vmatpush.bf16.msra.mxu1 %v5549_v51  ;;  %3941 = vmatpush.bf16.msra.mxu2 %v5645_v53  ;;  %v5429_v28 = vor.u32 %v5914_v44, %v5426_v3  ;;  %v5522_v51 = vld [vmem:[%s10463_s3 + $0x33c] sm:$0xf0]  ;;  %v5962_v53 = vld [vmem:[%s10463_s3 + $0x3f4] sm:$0xf]  ;;  %v5606_v44 = vld [vmem:[%s10463_s3 + $0x3e4] sm:$0xf0]  ;;  %v11145_v3 = vunpack.i.l.bf16 %v9253_v27 }
 0x332   : > { %v9488_v55 = vadd.f32 %v3615_v34, %v3573_v56  ;;  %v3576_v56 = vadd.f32 %v3575_v47, %v3533_v26  ;;  %v11140_v26 = vld [vmem:[#allocation51_spill] sm:$0xff]  ;;  %v5630_v34 = vld [vmem:[%s10463_s3 + $0x414] sm:$0xf0]  ;;  %v3535_v47 = vadd.f32 %v3534_v42, %v3492_v41  ;;  %v3495_v42 = vadd.f32 %v9429_v39, %v9202_v30  ;;  %v5911_v39 = vld [vmem:[%s10463_s3 + $0x25c] sm:$0xf] }
 0x333   : > { %3675 = vmatmul.bf16.gmra.mxu3 %v9510_v19  ;;  %v5633_v33 = vor.u32 %v5965_v60, %v5630_v34  ;;  %v5525_v52 = vor.u32 %v5938_v36, %v5522_v51  ;;  %v5621_v41 = vor.u32 %v5962_v53, %v5618_v7  ;;  %v11142_v60 = vunpack.i.h.bf16 %v9253_v27  ;;  %v11143_v34 = vld [vmem:[#allocation26_spill] sm:$0xff]  ;;  %v11146_v36 = vld [vmem:[#allocation17_spill] sm:$0xff]  ;;  %v5402_v27 = vld [vmem:[%s10463_s3 + $0x24c] sm:$0xf0] }
 0x334   : > { %3856 = vmatpush.bf16.msra.mxu0 %v5441_v49  ;;  %5990 = vmatpush.bf16.msra.mxu3 %v5441_v49  ;;  %v5414_v49 = vld [vmem:[%s10463_s3 + $0x264] sm:$0xf0] }
 0x335   : > { %3899 = vmatpush.bf16.msra.mxu1 %v5537_v62  ;;  %3942 = vmatpush.bf16.msra.mxu2 %v5633_v33  ;;  %v5417_v33 = vor.u32 %v5911_v39, %v5414_v49 }
 0x336   : > { %5714 = vmatmul.msk.bf16.gmra.mxu0 %vm3400_vm2, %v9508_v24  ;;  %3751 = vmatmul.bf16.gmra.mxu1 %v11140_v26  ;;  %v9537_v63 = vpop.f32.mrf.mxu3 }
 0x337   : > { %3794 = vmatmul.bf16.gmra.mxu2 %v11141_v8 }
 0x338   : > { %v3577_v13 = vpop.f32.mrf.mxu1  ;;  %v3537_v23 = vpop.f32.mrf.mxu0  ;;  %3857 = vmatpush.bf16.msra.mxu0 %v5429_v28  ;;  %5991 = vmatpush.bf16.msra.mxu3 %v5429_v28 }
 0x339   : > { %v3618_v59 = vpop.f32.mrf.mxu2  ;;  %v3538_v30 = vadd.f32 %v3537_v23, %v3495_v42  ;;  %v11147_v42 = vmax.f32 %v11146_v36, 0.0  ;;  %3900 = vmatpush.bf16.msra.mxu1 %v5525_v52  ;;  %3943 = vmatpush.bf16.msra.mxu2 %v5621_v41  ;;  %v5932_v52 = vld [vmem:[%s10463_s3 + $0x304] sm:$0xf]  ;;  %v11149_v36 = vld [vmem:[#allocation61_spill] sm:$0xff] }
 0x33a   : > { %v9539_v25 = vadd.f32 %v3618_v59, %v3576_v56  ;;  %v3578_v56 = vadd.f32 %v3577_v13, %v3535_v47  ;;  %v11144_v59 = vmax.f32 %v11143_v34, 0.0  ;;  %v5510_v47 = vld [vmem:[%s10463_s3 + $0x324] sm:$0xf0]  ;;  %v5959_v13 = vld [vmem:[%s10463_s3 + $0x3dc] sm:$0xf] }
 0x33b   : > { %v2336_v28 = vmax.f32 %v11147_v42, %v11145_v3  ;;  %v5513_v53 = vor.u32 %v5935_v38, %v5510_v47  ;;  %v5609_v7 = vor.u32 %v5959_v13, %v5606_v44  ;;  %v5956_v34 = vld [vmem:[%s10463_s3 + $0x3c4] sm:$0xf]  ;;  %v11148_v44 = vld [vmem:[#allocation49_spill] sm:$0xff]  ;;  %v3497_v3 = vadd.f32 %v9486_v29, %v9233_v10  ;;  %v11150_v42 = vld [vmem:[#allocation20_spill] sm:$0xff] }
 0x33c   : > { %v2343_v62 = vmax.f32 %v11144_v59, %v11142_v60  ;;  %3858 = vmatpush.bf16.msra.mxu0 %v5417_v33  ;;  %5992 = vmatpush.bf16.msra.mxu3 %v5417_v33  ;;  %v5908_v60 = vld [vmem:[%s10463_s3 + $0x244] sm:$0xf]  ;;  %v5594_v59 = vld [vmem:[%s10463_s3 + $0x3cc] sm:$0xf0]  ;;  %v3500_v29 = vadd.f32 %v9537_v63, %v9260_v57 }
 0x33d   : > { %v5405_v38 = vor.u32 %v5908_v60, %v5402_v27  ;;  %3901 = vmatpush.bf16.msra.mxu1 %v5513_v53  ;;  %3944 = vmatpush.bf16.msra.mxu2 %v5609_v7  ;;  %v5597_v13 = vor.u32 %v5956_v34, %v5594_v59  ;;  %v11151_v60 = vld [vmem:[#allocation23_spill] sm:$0xff] }
 0x33e   : > { %v3501_v23 = vpop.f32.mrf.mxu3  ;;  %v9607_v33 = vpack.c.bf16 %v2343_v62, %v2336_v28  ;;  %v11152_v27 = vmax.f32 %v11151_v60, 0.0 }
 0x340   : > { %v3580_v49 = vpop.f32.mrf.mxu1  ;;  %3859 = vmatpush.bf16.msra.mxu0 %v5405_v38  ;;  %5993 = vmatpush.bf16.msra.mxu3 %v5405_v38 }
 0x341   : > { %v3620_v51 = vpop.f32.mrf.mxu2  ;;  %v3581_v41 = vadd.f32 %v3580_v49, %v3538_v30  ;;  %v3539_v30 = vpop.f32.mrf.mxu0  ;;  %3945 = vmatpush.bf16.msra.mxu2 %v5597_v13 }
 0x342   : > { %v9587_v39 = vadd.f32 %v3620_v51, %v3578_v56  ;;  %v5498_v56 = vld [vmem:[%s10463_s3 + $0x30c] sm:$0xf0]  ;;  %v3540_v28 = vadd.f32 %v3539_v30, %v3497_v3  ;;  %v11153_v30 = vld [vmem:[#allocation21_spill] sm:$0xff]  ;;  %v11154_v3 = vld [vmem:[#allocation59_spill] sm:$0xff] }
 0x343   : > { %v5501_v47 = vor.u32 %v5932_v52, %v5498_v56  ;;  %3817 = vmatmul.bf16.vlgmr.msrb.gmra.mxu3 %v11150_v42  ;;  %v2350_v52 = vmax.f32 %v11152_v27, %v9443_v58  ;;  %v11155_v58 = vld [vmem:[#allocation29_spill] sm:$0xff] }
 0x345   : > { %3902 = vmatpush.bf16.msra.mxu1 %v5501_v47  ;;  %v9625_v47 = vpack.c.bf16 %v2350_v52, %v2350_v52 }
 0x346   : > { %5715 = vmatmul.msk.bf16.gmra.mxu0 %vm3400_vm2, %v9607_v33  ;;  %3756 = vmatmul.bf16.gmra.mxu1 %v11148_v44  ;;  %v3504_v51 = vpop.f32.mrf.mxu3 }
 0x347   : > { %3799 = vmatmul.bf16.gmra.mxu2 %v11149_v36 }
 0x348   : > { %v3582_v7 = vpop.f32.mrf.mxu1 }
 0x349   : > { %v3623_v62 = vpop.f32.mrf.mxu2  ;;  %v3583_v49 = vadd.f32 %v3582_v7, %v3540_v28 }
 0x34a   : > { %v9616_v53 = vadd.f32 %v3623_v62, %v3581_v41  ;;  %v3502_v62 = vadd.f32 %v3501_v23, %v9294_v31 }
 0x34e   : > { %v3506_v56 = vpop.f32.mrf.mxu3 }
 0x351   : > { %v3625_v38 = vpop.f32.mrf.mxu2 }
 0x352   : > { %v9621_v10 = vadd.f32 %v3625_v38, %v3583_v49  ;;  %v3505_v38 = vadd.f32 %v3504_v51, %v9309_v5 }
 0x353   : > { %v3542_v34 = vpop.f32.mrf.mxu0  ;;  %v3585_v59 = vpop.f32.mrf.mxu1  ;;  %3822 = vmatmul.bf16.gmra.mxu3 %v11155_v58 }
 0x354   : > { %v3543_v13 = vadd.f32 %v3542_v34, %v3500_v29 }
 0x356   : > { %v3586_v41 = vadd.f32 %v3585_v59, %v3543_v13  ;;  %5716 = vmatmul.msk.bf16.gmra.mxu0 %vm3400_vm2, %v9625_v47  ;;  %3761 = vmatmul.bf16.gmra.mxu1 %v11153_v30  ;;  %v3646_v7 = vpop.f32.mrf.mxu3 }
 0x357   : > { %3804 = vmatmul.bf16.gmra.mxu2 %v11154_v3  ;;  %v3647_v63 = vadd.f32 %v3646_v7, %v9329_v43  ;;  %v11158_v43 = vld [vmem:[#allocation41_spill] sm:$0xff] }
 0x35a   : > { %v3628_v28 = vpop.f32.mrf.mxu2 }
 0x35b   : > { %v9633_v57 = vadd.f32 %v3628_v28, %v3586_v41  ;;  %v3544_v49 = vpop.f32.mrf.mxu0  ;;  %v3587_v60 = vpop.f32.mrf.mxu1  ;;  %v11156_v41 = vld [vmem:[#allocation52_spill] sm:$0xff]  ;;  %v11157_v28 = vld [vmem:[#allocation57_spill] sm:$0xff] }
 0x35c   : > { %v3545_v27 = vadd.f32 %v3544_v49, %v3502_v62 }
 0x35e   : > { %v3588_v52 = vadd.f32 %v3587_v60, %v3545_v27  ;;  %v3648_v29 = vpop.f32.mrf.mxu3 }
 0x35f   : > { %v3649_v59 = vadd.f32 %v3648_v29, %v9348_v22 }
 0x362   : > { %v3630_v56 = vpop.f32.mrf.mxu2 }
 0x363   : > { %v9637_v34 = vadd.f32 %v3630_v56, %v3588_v52  ;;  %v3547_v13 = vpop.f32.mrf.mxu0  ;;  %v3590_v31 = vpop.f32.mrf.mxu1  ;;  %3827 = vmatmul.bf16.gmra.mxu3 %v11158_v43 }
 0x364   : > { %v3548_v23 = vadd.f32 %v3547_v13, %v3505_v38  ;;  %v11160_v13 = vld [vmem:[#allocation73_spill] sm:$0xff] }
 0x366   : > { %v3591_v3 = vadd.f32 %v3590_v31, %v3548_v23  ;;  %3860 = vmatmul.bf16.vlgmr.msra.gmra.mxu0 %v11156_v41  ;;  %3903 = vmatmul.bf16.vlgmr.msra.gmra.mxu1 %v11157_v28  ;;  %v3651_v5 = vpop.f32.mrf.mxu3  ;;  %v11161_v31 = vld [vmem:[#allocation65_spill] sm:$0xff]  ;;  %v11162_v23 = vld [vmem:[#allocation62_spill] sm:$0xff] }
 0x367   : > { %3946 = vmatmul.bf16.vlgmr.msra.gmra.mxu2 %v9174_v54  ;;  %v3652_v7 = vadd.f32 %v3651_v5, %v9370_v15  ;;  %v11165_v54 = vld [vmem:[#allocation44_spill] sm:$0xff] }
 0x36a   : > { %v3633_v62 = vpop.f32.mrf.mxu2 }
 0x36b   : > { %v9644_v51 = vadd.f32 %v3633_v62, %v3591_v3  ;;  %v3549_v49 = vpop.f32.mrf.mxu0  ;;  %v3592_v22 = vpop.f32.mrf.mxu1 }
 0x36e   : > { %v3653_v27 = vpop.f32.mrf.mxu3 }
 0x36f   : > { %v3654_v52 = vadd.f32 %v3653_v27, %v9395_v20 }
 0x372   : > { %v3635_v60 = vpop.f32.mrf.mxu2 }
 0x373   : > { %v3689_v38 = vpop.f32.mrf.mxu0  ;;  %v3732_v56 = vpop.f32.mrf.mxu1  ;;  %3832 = vmatmul.bf16.gmra.mxu3 %v11162_v23 }
 0x374   : > { %v9648_v29 = vadd.f32 %v3689_v38, %v3647_v63 }
 0x376   : > { %11159 = vst [vmem:[#allocation68_spill] sm:$0xff] %v9648_v29  ;;  %3865 = vmatmul.bf16.gmra.mxu0 %v11160_v13  ;;  %3908 = vmatmul.bf16.gmra.mxu1 %v11161_v31  ;;  %v3656_v3 = vpop.f32.mrf.mxu3 }
 0x377   : > { %3951 = vmatmul.bf16.gmra.mxu2 %v9248_v11  ;;  %v3657_v62 = vadd.f32 %v3656_v3, %v9431_v12  ;;  %v11166_v12 = vld [vmem:[#allocation64_spill] sm:$0xff] }
 0x37a   : > { %v3775_v15 = vpop.f32.mrf.mxu2 }
 0x37b   : > { %v9655_v5 = vadd.f32 %v3775_v15, %v3732_v56  ;;  %v3691_v49 = vpop.f32.mrf.mxu0  ;;  %v3734_v20 = vpop.f32.mrf.mxu1  ;;  %v5859_v56 = vld [vmem:[%s10463_s3 + $0xb8] sm:$0xf0]  ;;  %v5192_v15 = vld [vmem:[%s10463_s3 + $0x98] sm:$0xf] }
 0x37c   : > { %v9657_v22 = vadd.f32 %v3691_v49, %v3649_v59  ;;  %v5204_v59 = vld [vmem:[%s10463_s3 + $0xb0] sm:$0xf]  ;;  %v5856_v49 = vld [vmem:[%s10463_s3 + $0xa0] sm:$0xf0] }
 0x37d   : > { %v5205_v3 = vor.u32 %v5859_v56, %v5204_v59  ;;  %v5180_v56 = vld [vmem:[%s10463_s3 + $0x80] sm:$0xf] }
 0x37e   : > { %11163 = vst [vmem:[#allocation80_spill] sm:$0xff] %v9657_v22  ;;  %v3658_v63 = vpop.f32.mrf.mxu3 }
 0x37f   : > { %v9660_v27 = vadd.f32 %v3658_v63, %v9488_v55  ;;  %v11167_v55 = vld [vmem:[#allocation50_spill] sm:$0xff]  ;;  %4024 = vmatpush.bf16.msrb.mxu0 %v5205_v3  ;;  %v5853_v3 = vld [vmem:[%s10463_s3 + $0x88] sm:$0xf0] }
 0x380   : > { %v5181_v22 = vor.u32 %v5853_v3, %v5180_v56  ;;  %v11171_v3 = vld [vmem:[#allocation58_spill] sm:$0xff] }
 0x382   : > { %v3777_v60 = vpop.f32.mrf.mxu2 }
 0x383   : > { %v9662_v38 = vadd.f32 %v3777_v60, %v3734_v20  ;;  %v3694_v29 = vpop.f32.mrf.mxu0  ;;  %v3737_v13 = vpop.f32.mrf.mxu1  ;;  %3837 = vmatmul.bf16.gmra.mxu3 %v11167_v55 }
 0x384   : > { %v9664_v11 = vadd.f32 %v3694_v29, %v3652_v7 }
 0x386   : > { %11164 = vst [vmem:[#allocation78_spill] sm:$0xff] %v9664_v11  ;;  %3870 = vmatmul.bf16.gmra.mxu0 %v11165_v54  ;;  %3913 = vmatmul.bf16.gmra.mxu1 %v11166_v12  ;;  %v3661_v7 = vpop.f32.mrf.mxu3  ;;  %v11175_v54 = vld [vmem:[#allocation35_spill] sm:$0xff] }
 0x387   : > { %3956 = vmatmul.bf16.gmra.mxu2 %v9302_v1  ;;  %v9683_v20 = vadd.f32 %v3661_v7, %v9539_v25  ;;  %v5193_v1 = vor.u32 %v5856_v49, %v5192_v15 }
 0x389   : > { %4025 = vmatpush.bf16.msrb.mxu0 %v5193_v1 }
 0x38a   : > { %v3780_v29 = vpop.f32.mrf.mxu2 }
 0x38b   : > { %v9685_v63 = vadd.f32 %v3780_v29, %v3737_v13  ;;  %v3696_v60 = vpop.f32.mrf.mxu0  ;;  %v3739_v11 = vpop.f32.mrf.mxu1  ;;  %v5168_v13 = vld [vmem:[%s10463_s3 + $0x68] sm:$0xf] }
 0x38c   : > { %v9687_v59 = vadd.f32 %v3696_v60, %v3654_v52  ;;  %v5850_v52 = vld [vmem:[%s10463_s3 + $0x70] sm:$0xf0] }
 0x38d   : > { %4026 = vmatpush.bf16.msrb.mxu0 %v5181_v22  ;;  %v5169_v1 = vor.u32 %v5850_v52, %v5168_v13  ;;  %v11170_v22 = vld [vmem:[#allocation75_spill] sm:$0xff]  ;;  %v5907_v13 = vld [vmem:[%s10463_s3 + $0x238] sm:$0xf0] }
 0x38e   : > { %11168 = vst [vmem:[#allocation3_spill] sm:$0xff] %v9687_v59  ;;  %v3663_v25 = vpop.f32.mrf.mxu3  ;;  %v5156_v59 = vld [vmem:[%s10463_s3 + $0x50] sm:$0xf] }
 0x38f   : > { %v9702_v29 = vadd.f32 %v3663_v25, %v9587_v39  ;;  %v5847_v39 = vld [vmem:[%s10463_s3 + $0x58] sm:$0xf0] }
 0x390   : > { %v5883_v25 = vld [vmem:[%s10463_s3 + $0x178] sm:$0xf0] }
 0x391   : > { %4027 = vmatpush.bf16.msrb.mxu0 %v5169_v1 }
 0x392   : > { %v3782_v7 = vpop.f32.mrf.mxu2 }
 0x393   : > { %v9704_v15 = vadd.f32 %v3782_v7, %v3739_v11  ;;  %v3699_v49 = vpop.f32.mrf.mxu0  ;;  %v3742_v60 = vpop.f32.mrf.mxu1  ;;  %v5300_v11 = vld [vmem:[%s10463_s3 + $0x170] sm:$0xf]  ;;  %3842 = vmatmul.bf16.gmra.mxu3 %v9168_v50 }
 0x394   : > { %v9706_v56 = vadd.f32 %v3699_v49, %v3657_v62  ;;  %v5157_v62 = vor.u32 %v5847_v39, %v5156_v59  ;;  %v5396_v7 = vld [vmem:[%s10463_s3 + $0x230] sm:$0xf]  ;;  %v5301_v52 = vor.u32 %v5883_v25, %v5300_v11  ;;  %v5144_v59 = vld [vmem:[%s10463_s3 + $0x38] sm:$0xf]  ;;  %v5844_v39 = vld [vmem:[%s10463_s3 + $0x40] sm:$0xf0] }
 0x395   : > { %v5397_v49 = vor.u32 %v5907_v13, %v5396_v7  ;;  %v5145_v13 = vor.u32 %v5844_v39, %v5144_v59  ;;  %v5702_v59 = vld [vmem:[%s10463_s3 + $0x4a4] sm:$0xf0]  ;;  %v5132_v39 = vld [vmem:[%s10463_s3 + $0x20] sm:$0xf] }
 0x396   : > { %11169 = vst [vmem:[#allocation2_spill] sm:$0xff] %v9706_v56  ;;  %3875 = vmatmul.bf16.gmra.mxu0 %v11170_v22  ;;  %3918 = vmatmul.bf16.gmra.mxu1 %v11171_v3  ;;  %v3666_v1 = vpop.f32.mrf.mxu3  ;;  %v5904_v22 = vld [vmem:[%s10463_s3 + $0x220] sm:$0xf0] }
 0x397   : > { %3961 = vmatmul.bf16.gmra.mxu2 %v9212_v61  ;;  %4028 = vmatpush.bf16.msrb.mxu0 %v5157_v62  ;;  %v5288_v61 = vld [vmem:[%s10463_s3 + $0x158] sm:$0xf]  ;;  %v9740_v11 = vadd.f32 %v3666_v1, %v9616_v53  ;;  %v5983_v1 = vld [vmem:[%s10463_s3 + $0x49c] sm:$0xf] }
 0x398   : > { %4067 = vmatpush.bf16.msrb.mxu1 %v5301_v52  ;;  %4110 = vmatpush.bf16.msrb.mxu2 %v5397_v49  ;;  %v5880_v52 = vld [vmem:[%s10463_s3 + $0x160] sm:$0xf0]  ;;  %v5384_v49 = vld [vmem:[%s10463_s3 + $0x218] sm:$0xf]  ;;  %v5705_v3 = vor.u32 %v5983_v1, %v5702_v59 }
 0x39a   : > { %v3785_v56 = vpop.f32.mrf.mxu2  ;;  %3987 = vmatpush.bf16.msrb.mxu3 %v5705_v3 }
 0x39b   : > { %v9742_v62 = vadd.f32 %v3785_v56, %v3742_v60  ;;  %v3701_v25 = vpop.f32.mrf.mxu0  ;;  %v3744_v7 = vpop.f32.mrf.mxu1  ;;  %v5289_v60 = vor.u32 %v5880_v52, %v5288_v61  ;;  %v5385_v56 = vor.u32 %v5904_v22, %v5384_v49  ;;  %4029 = vmatpush.bf16.msrb.mxu0 %v5145_v13  ;;  %v5276_v61 = vld [vmem:[%s10463_s3 + $0x140] sm:$0xf]  ;;  %v5877_v22 = vld [vmem:[%s10463_s3 + $0x148] sm:$0xf0] }
 0x39c   : > { %v9754_v53 = vadd.f32 %v3701_v25, %v9660_v27  ;;  %v5841_v27 = vld [vmem:[%s10463_s3 + $0x28] sm:$0xf0]  ;;  %v5277_v52 = vor.u32 %v5877_v22, %v5276_v61  ;;  %v5372_v13 = vld [vmem:[%s10463_s3 + $0x200] sm:$0xf] }
 0x39d   : > { %4068 = vmatpush.bf16.msrb.mxu1 %v5289_v60  ;;  %4111 = vmatpush.bf16.msrb.mxu2 %v5385_v56  ;;  %v5133_v25 = vor.u32 %v5841_v27, %v5132_v39  ;;  %v5901_v49 = vld [vmem:[%s10463_s3 + $0x208] sm:$0xf0]  ;;  %v5980_v60 = vld [vmem:[%s10463_s3 + $0x484] sm:$0xf]  ;;  %v5690_v56 = vld [vmem:[%s10463_s3 + $0x48c] sm:$0xf0] }
 0x39e   : > { %11172 = vst [vmem:[#allocation70_spill] sm:$0xff] %v9754_v53  ;;  %v5373_v1 = vor.u32 %v5901_v49, %v5372_v13  ;;  %v3668_v59 = vpop.f32.mrf.mxu3  ;;  %v5120_v39 = vld [vmem:[%s10463_s3 + $0x8] sm:$0xf]  ;;  %v5874_v49 = vld [vmem:[%s10463_s3 + $0x130] sm:$0xf0] }
 0x39f   : > { %4030 = vmatpush.bf16.msrb.mxu0 %v5133_v25  ;;  %v9790_v3 = vadd.f32 %v3668_v59, %v9621_v10  ;;  %v5693_v25 = vor.u32 %v5980_v60, %v5690_v56  ;;  %v5264_v13 = vld [vmem:[%s10463_s3 + $0x128] sm:$0xf]  ;;  %v5898_v59 = vld [vmem:[%s10463_s3 + $0x1f0] sm:$0xf0] }
 0x3a0   : > { %v11174_v56 = vld [vmem:[#allocation47_spill] sm:$0xff] }
 0x3a1   : > { %4069 = vmatpush.bf16.msrb.mxu1 %v5277_v52  ;;  %4112 = vmatpush.bf16.msrb.mxu2 %v5373_v1  ;;  %v5838_v52 = vld [vmem:[%s10463_s3 + $0x10] sm:$0xf0]  ;;  %v5360_v1 = vld [vmem:[%s10463_s3 + $0x1e8] sm:$0xf] }
 0x3a2   : > { %v3787_v53 = vpop.f32.mrf.mxu2  ;;  %3988 = vmatpush.bf16.msrb.mxu3 %v5693_v25  ;;  %v5361_v60 = vor.u32 %v5898_v59, %v5360_v1  ;;  %v5895_v25 = vld [vmem:[%s10463_s3 + $0x1d8] sm:$0xf0]  ;;  %v5240_v59 = vld [vmem:[%s10463_s3 + $0xf8] sm:$0xf] }
 0x3a3   : > { %v9792_v27 = vadd.f32 %v3787_v53, %v3744_v7  ;;  %v3704_v61 = vpop.f32.mrf.mxu0  ;;  %v3747_v22 = vpop.f32.mrf.mxu1  ;;  %v5121_v7 = vor.u32 %v5838_v52, %v5120_v39  ;;  %v5265_v53 = vor.u32 %v5874_v49, %v5264_v13  ;;  %v5871_v39 = vld [vmem:[%s10463_s3 + $0x118] sm:$0xf0]  ;;  %3847 = vmatmul.bf16.gmra.mxu3 %v9244_v16 }
 0x3a4   : > { %v9804_v10 = vadd.f32 %v3704_v61, %v9683_v20  ;;  %v5252_v20 = vld [vmem:[%s10463_s3 + $0x110] sm:$0xf] }
 0x3a5   : > { %v5348_v61 = vld [vmem:[%s10463_s3 + $0x1d0] sm:$0xf]  ;;  %4031 = vmatpush.bf16.msrb.mxu0 %v5121_v7  ;;  %4070 = vmatpush.bf16.msrb.mxu1 %v5265_v53  ;;  %v5253_v52 = vor.u32 %v5871_v39, %v5252_v20  ;;  %v5892_v39 = vld [vmem:[%s10463_s3 + $0x1c0] sm:$0xf0] }
 0x3a6   : > { %11173 = vst [vmem:[#allocation71_spill] sm:$0xff] %v9804_v10  ;;  %3880 = vmatmul.bf16.gmra.mxu0 %v11174_v56  ;;  %3923 = vmatmul.bf16.gmra.mxu1 %v11175_v54  ;;  %v5349_v13 = vor.u32 %v5895_v25, %v5348_v61  ;;  %v3671_v49 = vpop.f32.mrf.mxu3  ;;  %v5868_v10 = vld [vmem:[%s10463_s3 + $0x100] sm:$0xf0]  ;;  %v5228_v54 = vld [vmem:[%s10463_s3 + $0xe0] sm:$0xf] }
 0x3a7   : > { %3966 = vmatmul.bf16.gmra.mxu2 %v9100_v48  ;;  %v5336_v48 = vld [vmem:[%s10463_s3 + $0x1b8] sm:$0xf]  ;;  %v3672_v7 = vadd.f32 %v3671_v49, %v9633_v57  ;;  %v5241_v25 = vor.u32 %v5868_v10, %v5240_v59  ;;  %v5865_v57 = vld [vmem:[%s10463_s3 + $0xe8] sm:$0xf0]  ;;  %v5216_v49 = vld [vmem:[%s10463_s3 + $0xc8] sm:$0xf] }
 0x3a8   : > { %4113 = vmatpush.bf16.msrb.mxu2 %v5361_v60  ;;  %v5337_v56 = vor.u32 %v5892_v39, %v5336_v48  ;;  %v5229_v10 = vor.u32 %v5865_v57, %v5228_v54  ;;  %v5312_v59 = vld [vmem:[%s10463_s3 + $0x188] sm:$0xf] }
 0x3a9   : > { %4071 = vmatpush.bf16.msrb.mxu1 %v5253_v52 }
 0x3aa   : > { %v3790_v1 = vpop.f32.mrf.mxu2 }
 0x3ab   : > { %v9838_v53 = vadd.f32 %v3790_v1, %v3747_v22  ;;  %v3706_v60 = vpop.f32.mrf.mxu0  ;;  %v3749_v20 = vpop.f32.mrf.mxu1  ;;  %v5324_v22 = vld [vmem:[%s10463_s3 + $0x1a0] sm:$0xf]  ;;  %v5862_v1 = vld [vmem:[%s10463_s3 + $0xd0] sm:$0xf0] }
 0x3ac   : > { %v9844_v61 = vadd.f32 %v3706_v60, %v9702_v29  ;;  %4114 = vmatpush.bf16.msrb.mxu2 %v5349_v13  ;;  %v5889_v29 = vld [vmem:[%s10463_s3 + $0x1a8] sm:$0xf0] }
 0x3ad   : > { %4072 = vmatpush.bf16.msrb.mxu1 %v5241_v25  ;;  %v5325_v48 = vor.u32 %v5889_v29, %v5324_v22  ;;  %v5886_v25 = vld [vmem:[%s10463_s3 + $0x190] sm:$0xf0]  ;;  %v5217_v22 = vor.u32 %v5862_v1, %v5216_v49 }
 0x3ae   : > { %v3673_v52 = vpop.f32.mrf.mxu3  ;;  %v5313_v29 = vor.u32 %v5886_v25, %v5312_v59 }
 0x3af   : > { %v3674_v60 = vadd.f32 %v3673_v52, %v9637_v34 }
 0x3b0   : > { %4115 = vmatpush.bf16.msrb.mxu2 %v5337_v56 }
 0x3b1   : > { %4073 = vmatpush.bf16.msrb.mxu1 %v5229_v10 }
 0x3b2   : > { %v3792_v13 = vpop.f32.mrf.mxu2 }
 0x3b3   : > { %v9868_v39 = vadd.f32 %v3792_v13, %v3749_v20  ;;  %v3709_v54 = vpop.f32.mrf.mxu0  ;;  %v3752_v56 = vpop.f32.mrf.mxu1  ;;  %3890 = vmatmul.bf16.vlgmr.msra.gmra.mxu3 %v9246_v14 }
 0x3b4   : > { %v9874_v57 = vadd.f32 %v3709_v54, %v9740_v11  ;;  %4116 = vmatpush.bf16.msrb.mxu2 %v5325_v48 }
 0x3b5   : > { %4074 = vmatpush.bf16.msrb.mxu1 %v5217_v22 }
 0x3b6   : > { %11176 = vst [vmem:[#allocation10_spill] sm:$0xff] %v9874_v57  ;;  %3885 = vmatmul.bf16.gmra.mxu0 %v9170_v0  ;;  %3928 = vmatmul.bf16.gmra.mxu1 %v9172_v6  ;;  %v3676_v34 = vpop.f32.mrf.mxu3 }
 0x3b7   : > { %3971 = vmatmul.bf16.gmra.mxu2 %v9278_v37  ;;  %v3677_v52 = vadd.f32 %v3676_v34, %v9644_v51 }
 0x3b8   : > { %4117 = vmatpush.bf16.msrb.mxu2 %v5313_v29 }
 0x3ba   : > { %v3795_v20 = vpop.f32.mrf.mxu2 }
 0x3bb   : > { %v9881_v11 = vadd.f32 %v3795_v20, %v3752_v56  ;;  %v3711_v10 = vpop.f32.mrf.mxu0  ;;  %v3754_v13 = vpop.f32.mrf.mxu1 }
 0x3bc   : > { %v9884_v48 = vadd.f32 %v3711_v10, %v9790_v3 }
 0x3be   : > { %v3678_v49 = vpop.f32.mrf.mxu3 }
 0x3c2   : > { %v3797_v1 = vpop.f32.mrf.mxu2 }
 0x3c3   : > { %v9886_v59 = vadd.f32 %v3797_v1, %v3754_v13  ;;  %v3714_v54 = vpop.f32.mrf.mxu0  ;;  %v3757_v25 = vpop.f32.mrf.mxu1  ;;  %5717 = vmatmul.msk.bf16.vlgmr.msrb.gmra.mxu3 %vm3400_vm2, %v9300_v40 }
 0x3c4   : > { %v9888_v57 = vadd.f32 %v3714_v54, %v3672_v7 }
 0x3c6   : > { %3933 = vmatmul.bf16.gmra.mxu1 %v9250_v45  ;;  %4032 = vmatmul.bf16.vlgmr.msrb.gmra.mxu0 %v11117_v18  ;;  %v3818_v3 = vpop.f32.mrf.mxu3 }
 0x3c7   : > { %3976 = vmatmul.bf16.gmra.mxu2 %v9510_v19  ;;  %v3819_v22 = vadd.f32 %v3818_v3, %v9655_v5 }
 0x3ca   : > { %v3800_v51 = vpop.f32.mrf.mxu2 }
 0x3cb   : > { %v9895_v56 = vadd.f32 %v3800_v51, %v3757_v25  ;;  %v3716_v29 = vpop.f32.mrf.mxu0  ;;  %v3759_v34 = vpop.f32.mrf.mxu1 }
 0x3cc   : > { %v9898_v20 = vadd.f32 %v3716_v29, %v3674_v60 }
 0x3ce   : > { %v3820_v10 = vpop.f32.mrf.mxu3 }
 0x3cf   : > { %v3821_v18 = vadd.f32 %v3820_v10, %v9662_v38 }
 0x3d2   : > { %v3802_v7 = vpop.f32.mrf.mxu2 }
 0x3d3   : > { %v9900_v13 = vadd.f32 %v3802_v7, %v3759_v34  ;;  %v3719_v49 = vpop.f32.mrf.mxu0  ;;  %v3762_v1 = vpop.f32.mrf.mxu1  ;;  %5718 = vmatmul.msk.bf16.gmra.mxu3 %vm3400_vm2, %v9315_v9 }
 0x3d4   : > { %v9903_v54 = vadd.f32 %v3719_v49, %v3677_v52 }
 0x3d6   : > { %4037 = vmatmul.bf16.gmra.mxu0 %v11120_v2  ;;  %4075 = vmatmul.bf16.vlgmr.msrb.gmra.mxu1 %v8466_v46  ;;  %v3823_v60 = vpop.f32.mrf.mxu3 }
 0x3d7   : > { %4118 = vmatmul.bf16.vlgmr.msrb.gmra.mxu2 %v11150_v42  ;;  %v3824_v51 = vadd.f32 %v3823_v60, %v9685_v63 }
 0x3da   : > { %v3805_v5 = vpop.f32.mrf.mxu2 }
 0x3db   : > { %v9910_v25 = vadd.f32 %v3805_v5, %v3762_v1  ;;  %v3721_v38 = vpop.f32.mrf.mxu0  ;;  %v3764_v3 = vpop.f32.mrf.mxu1 }
 0x3de   : > { %v3825_v52 = vpop.f32.mrf.mxu3 }
 0x3df   : > { %v3826_v34 = vadd.f32 %v3825_v52, %v9704_v15 }
 0x3e2   : > { %v3807_v29 = vpop.f32.mrf.mxu2 }
 0x3e3   : > { %v3861_v2 = vpop.f32.mrf.mxu0  ;;  %v3904_v7 = vpop.f32.mrf.mxu1  ;;  %5719 = vmatmul.msk.bf16.gmra.mxu3 %vm3400_vm2, %v9356_v17 }
 0x3e4   : > { %v3862_v46 = vadd.f32 %v3861_v2, %v3819_v22 }
 0x3e6   : > { %v3905_v10 = vadd.f32 %v3904_v7, %v3862_v46  ;;  %4042 = vmatmul.bf16.gmra.mxu0 %v11123_v21  ;;  %4080 = vmatmul.bf16.gmra.mxu1 %v8395_v32  ;;  %v3828_v42 = vpop.f32.mrf.mxu3  ;;  %v11177_v7 = vld [vmem:[#allocation67_spill] sm:$0xff] }
 0x3e7   : > { %4123 = vmatmul.bf16.gmra.mxu2 %v11155_v58  ;;  %v3829_v49 = vadd.f32 %v3828_v42, %v9742_v62  ;;  %v5492_v62 = vld [vmem:[%s10463_s3 + $0x2f0] sm:$0xf]  ;;  %v5480_v42 = vld [vmem:[%s10463_s3 + $0x2d8] sm:$0xf] }
 0x3ea   : > { %v3947_v63 = vpop.f32.mrf.mxu2 }
 0x3eb   : > { %v9920_v1 = vadd.f32 %v3947_v63, %v3905_v10  ;;  %v3863_v15 = vpop.f32.mrf.mxu0  ;;  %v3906_v5 = vpop.f32.mrf.mxu1  ;;  %v5928_v63 = vld [vmem:[%s10463_s3 + $0x2e0] sm:$0xf0] }
 0x3ec   : > { %v3864_v60 = vadd.f32 %v3863_v15, %v3821_v18  ;;  %v5931_v18 = vld [vmem:[%s10463_s3 + $0x2f8] sm:$0xf0] }
 0x3ee   : > { %v3907_v22 = vadd.f32 %v3906_v5, %v3864_v60  ;;  %v3830_v38 = vpop.f32.mrf.mxu3 }
 0x3ef   : > { %v9923_v21 = vadd.f32 %v3830_v38, %v9792_v27  ;;  %v5588_v27 = vld [vmem:[%s10463_s3 + $0x3b0] sm:$0xf]  ;;  %v5481_v38 = vor.u32 %v5928_v63, %v5480_v42 }
 0x3f2   : > { %v3949_v3 = vpop.f32.mrf.mxu2 }
 0x3f3   : > { %v9925_v32 = vadd.f32 %v3949_v3, %v3907_v22  ;;  %v3866_v29 = vpop.f32.mrf.mxu0  ;;  %v3909_v52 = vpop.f32.mrf.mxu1  ;;  %5720 = vmatmul.msk.bf16.gmra.mxu3 %vm3400_vm2, %v11177_v7  ;;  %v5952_v3 = vld [vmem:[%s10463_s3 + $0x3a0] sm:$0xf0] }
 0x3f4   : > { %v3867_v58 = vadd.f32 %v3866_v29, %v3824_v51 }
 0x3f6   : > { %v3910_v2 = vadd.f32 %v3909_v52, %v3867_v58  ;;  %4047 = vmatmul.bf16.gmra.mxu0 %v11127_v4  ;;  %4085 = vmatmul.bf16.gmra.mxu1 %v8670_v35  ;;  %v5493_v4 = vor.u32 %v5931_v18, %v5492_v62  ;;  %v5955_v35 = vld [vmem:[%s10463_s3 + $0x3b8] sm:$0xf0]  ;;  %v3833_v46 = vpop.f32.mrf.mxu3  ;;  %v5468_v62 = vld [vmem:[%s10463_s3 + $0x2c0] sm:$0xf] }
 0x3f7   : > { %4128 = vmatmul.bf16.gmra.mxu2 %v11158_v43  ;;  %v5589_v51 = vor.u32 %v5955_v35, %v5588_v27  ;;  %v5576_v43 = vld [vmem:[%s10463_s3 + $0x398] sm:$0xf]  ;;  %v9954_v15 = vadd.f32 %v3833_v46, %v9838_v53  ;;  %v5925_v53 = vld [vmem:[%s10463_s3 + $0x2c8] sm:$0xf0]  ;;  %v5922_v46 = vld [vmem:[%s10463_s3 + $0x2b0] sm:$0xf0] }
 0x3f8   : > { %4153 = vmatpush.bf16.msra.mxu3 %v5493_v4  ;;  %v5577_v52 = vor.u32 %v5952_v3, %v5576_v43  ;;  %v5469_v18 = vor.u32 %v5925_v53, %v5468_v62  ;;  %v11178_v62 = vld [vmem:[#allocation32_spill] sm:$0xff] }
 0x3f9   : > { %4196 = vmatpush.bf16.msra.mxu0 %v5589_v51  ;;  %v5456_v51 = vld [vmem:[%s10463_s3 + $0x2a8] sm:$0xf]  ;;  %v5540_v53 = vld [vmem:[%s10463_s3 + $0x350] sm:$0xf] }
 0x3fa   : > { %v3952_v10 = vpop.f32.mrf.mxu2 }
 0x3fb   : > { %v9956_v5 = vadd.f32 %v3952_v10, %v3910_v2  ;;  %v3868_v60 = vpop.f32.mrf.mxu0  ;;  %v3911_v22 = vpop.f32.mrf.mxu1  ;;  %v5564_v2 = vld [vmem:[%s10463_s3 + $0x380] sm:$0xf]  ;;  %v5552_v10 = vld [vmem:[%s10463_s3 + $0x368] sm:$0xf] }
 0x3fc   : > { %v3869_v29 = vadd.f32 %v3868_v60, %v3826_v34  ;;  %4154 = vmatpush.bf16.msra.mxu3 %v5481_v38  ;;  %v5949_v34 = vld [vmem:[%s10463_s3 + $0x388] sm:$0xf0]  ;;  %v5946_v38 = vld [vmem:[%s10463_s3 + $0x370] sm:$0xf0] }
 0x3fd   : > { %4197 = vmatpush.bf16.msra.mxu0 %v5577_v52  ;;  %v5565_v27 = vor.u32 %v5949_v34, %v5564_v2  ;;  %v5684_v2 = vld [vmem:[%s10463_s3 + $0x470] sm:$0xf] }
 0x3fe   : > { %v3912_v58 = vadd.f32 %v3911_v22, %v3869_v29  ;;  %v3835_v4 = vpop.f32.mrf.mxu3  ;;  %v5457_v22 = vor.u32 %v5922_v46, %v5456_v51  ;;  %v5553_v29 = vor.u32 %v5946_v38, %v5552_v10  ;;  %v5916_v51 = vld [vmem:[%s10463_s3 + $0x280] sm:$0xf0]  ;;  %v5528_v46 = vld [vmem:[%s10463_s3 + $0x338] sm:$0xf] }
 0x3ff   : > { %v9983_v42 = vadd.f32 %v3835_v4, %v9868_v39  ;;  %v5444_v39 = vld [vmem:[%s10463_s3 + $0x290] sm:$0xf] }
 0x400   : > { %4155 = vmatpush.bf16.msra.mxu3 %v5469_v18  ;;  %v5979_v18 = vld [vmem:[%s10463_s3 + $0x478] sm:$0xf0] }
 0x401   : > { %4198 = vmatpush.bf16.msra.mxu0 %v5565_v27  ;;  %v5685_v27 = vor.u32 %v5979_v18, %v5684_v2  ;;  %v5516_v18 = vld [vmem:[%s10463_s3 + $0x320] sm:$0xf] }
 0x402   : > { %v3954_v35 = vpop.f32.mrf.mxu2 }
 0x403   : > { %v9985_v63 = vadd.f32 %v3954_v35, %v3912_v58  ;;  %v3871_v43 = vpop.f32.mrf.mxu0  ;;  %v3914_v60 = vpop.f32.mrf.mxu1  ;;  %v5919_v58 = vld [vmem:[%s10463_s3 + $0x298] sm:$0xf0]  ;;  %5721 = vmatmul.msk.bf16.gmra.mxu3 %vm3400_vm2, %v9508_v24  ;;  %4239 = vmatpush.bf16.msra.mxu1 %v5685_v27 }
 0x404   : > { %v3872_v3 = vadd.f32 %v3871_v43, %v3829_v49  ;;  %4156 = vmatpush.bf16.msra.mxu3 %v5457_v22  ;;  %v5943_v49 = vld [vmem:[%s10463_s3 + $0x358] sm:$0xf0] }
 0x405   : > { %4199 = vmatpush.bf16.msra.mxu0 %v5553_v29  ;;  %v5541_v34 = vor.u32 %v5943_v49, %v5540_v53  ;;  %v5672_v29 = vld [vmem:[%s10463_s3 + $0x458] sm:$0xf]  ;;  %v5708_v53 = vld [vmem:[%s10463_s3 + $0x4a0] sm:$0xf] }
 0x406   : > { %v3915_v52 = vadd.f32 %v3914_v60, %v3872_v3  ;;  %4052 = vmatmul.bf16.gmra.mxu0 %v11140_v26  ;;  %4090 = vmatmul.bf16.gmra.mxu1 %v11178_v62  ;;  %v5445_v26 = vor.u32 %v5919_v58, %v5444_v39  ;;  %v3838_v4 = vpop.f32.mrf.mxu3  ;;  %v5940_v3 = vld [vmem:[%s10463_s3 + $0x340] sm:$0xf0]  ;;  %v5420_v49 = vld [vmem:[%s10463_s3 + $0x260] sm:$0xf] }
 0x407   : > { %4133 = vmatmul.bf16.gmra.mxu2 %v11162_v23  ;;  %v5432_v23 = vld [vmem:[%s10463_s3 + $0x278] sm:$0xf]  ;;  %v10023_v10 = vadd.f32 %v3838_v4, %v9881_v11  ;;  %v5976_v62 = vld [vmem:[%s10463_s3 + $0x460] sm:$0xf0] }
 0x408   : > { %4157 = vmatpush.bf16.msra.mxu3 %v5445_v26  ;;  %v5433_v38 = vor.u32 %v5916_v51, %v5432_v23  ;;  %v5673_v39 = vor.u32 %v5976_v62, %v5672_v29  ;;  %v5985_v26 = vld [vmem:[%s10463_s3 + $0x4a8] sm:$0xf0] }
 0x409   : > { %4200 = vmatpush.bf16.msra.mxu0 %v5541_v34  ;;  %v5709_v2 = vor.u32 %v5985_v26, %v5708_v53  ;;  %v5937_v34 = vld [vmem:[%s10463_s3 + $0x328] sm:$0xf0]  ;;  %v5648_v53 = vld [vmem:[%s10463_s3 + $0x428] sm:$0xf]  ;;  %v5970_v26 = vld [vmem:[%s10463_s3 + $0x430] sm:$0xf0] }
 0x40a   : > { %v3957_v35 = vpop.f32.mrf.mxu2  ;;  %4240 = vmatpush.bf16.msra.mxu1 %v5673_v39  ;;  %v5517_v4 = vor.u32 %v5937_v34, %v5516_v18  ;;  %v5973_v23 = vld [vmem:[%s10463_s3 + $0x448] sm:$0xf0]  ;;  %v5934_v39 = vld [vmem:[%s10463_s3 + $0x310] sm:$0xf0]  ;;  %v5636_v18 = vld [vmem:[%s10463_s3 + $0x410] sm:$0xf] }
 0x40b   : > { %v10025_v43 = vadd.f32 %v3957_v35, %v3915_v52  ;;  %v3873_v60 = vpop.f32.mrf.mxu0  ;;  %v3916_v22 = vpop.f32.mrf.mxu1  ;;  %v5529_v52 = vor.u32 %v5940_v3, %v5528_v46  ;;  %v5660_v35 = vld [vmem:[%s10463_s3 + $0x440] sm:$0xf]  ;;  %4288 = vmatpush.bf16.msra.mxu2 %v5709_v2  ;;  %v5504_v3 = vld [vmem:[%s10463_s3 + $0x308] sm:$0xf]  ;;  %v5649_v2 = vor.u32 %v5970_v26, %v5648_v53  ;;  %v5967_v34 = vld [vmem:[%s10463_s3 + $0x418] sm:$0xf0] }
 0x40c   : > { %v3874_v11 = vadd.f32 %v3873_v60, %v9923_v21  ;;  %4158 = vmatpush.bf16.msra.mxu3 %v5433_v38  ;;  %v5913_v21 = vld [vmem:[%s10463_s3 + $0x268] sm:$0xf0]  ;;  %v5661_v51 = vor.u32 %v5973_v23, %v5660_v35  ;;  %v5910_v38 = vld [vmem:[%s10463_s3 + $0x250] sm:$0xf0]  ;;  %v5696_v53 = vld [vmem:[%s10463_s3 + $0x488] sm:$0xf] }
 0x40d   : > { %4201 = vmatpush.bf16.msra.mxu0 %v5529_v52  ;;  %v5421_v27 = vor.u32 %v5913_v21, %v5420_v49  ;;  %v5505_v49 = vor.u32 %v5934_v39, %v5504_v3  ;;  %v5961_v3 = vld [vmem:[%s10463_s3 + $0x3e8] sm:$0xf0]  ;;  %v5600_v39 = vld [vmem:[%s10463_s3 + $0x3c8] sm:$0xf] }
 0x40e   : > { %v3917_v58 = vadd.f32 %v3916_v22, %v3874_v11  ;;  %v3840_v46 = vpop.f32.mrf.mxu3  ;;  %v5408_v22 = vld [vmem:[%s10463_s3 + $0x248] sm:$0xf]  ;;  %4241 = vmatpush.bf16.msra.mxu1 %v5661_v51 }
 0x40f   : > { %v10071_v29 = vadd.f32 %v3840_v46, %v9886_v59 }
 0x410   : > { %4159 = vmatpush.bf16.msra.mxu3 %v5421_v27 }
 0x411   : > { %4202 = vmatpush.bf16.msra.mxu0 %v5517_v4  ;;  %v5964_v4 = vld [vmem:[%s10463_s3 + $0x400] sm:$0xf0] }
 0x412   : > { %v3959_v60 = vpop.f32.mrf.mxu2  ;;  %4242 = vmatpush.bf16.msra.mxu1 %v5649_v2  ;;  %v5982_v2 = vld [vmem:[%s10463_s3 + $0x490] sm:$0xf0] }
 0x413   : > { %v10073_v62 = vadd.f32 %v3959_v60, %v3917_v58  ;;  %v3876_v11 = vpop.f32.mrf.mxu0  ;;  %v3919_v52 = vpop.f32.mrf.mxu1  ;;  %v5409_v58 = vor.u32 %v5910_v38, %v5408_v22  ;;  %5722 = vmatmul.msk.bf16.gmra.mxu3 %vm3400_vm2, %v9607_v33  ;;  %v5612_v38 = vld [vmem:[%s10463_s3 + $0x3e0] sm:$0xf] }
 0x414   : > { %v3877_v59 = vadd.f32 %v3876_v11, %v9954_v15  ;;  %v5637_v15 = vor.u32 %v5967_v34, %v5636_v18  ;;  %v5613_v11 = vor.u32 %v5961_v3, %v5612_v38  ;;  %v5697_v18 = vor.u32 %v5982_v2, %v5696_v53  ;;  %v11179_v3 = vld [vmem:[#allocation59_spill] sm:$0xff] }
 0x415   : > { %4160 = vmatpush.bf16.msra.mxu3 %v5409_v58  ;;  %4203 = vmatpush.bf16.msra.mxu0 %v5505_v49 }
 0x416   : > { %v3920_v21 = vadd.f32 %v3919_v52, %v3877_v59  ;;  %4057 = vmatmul.bf16.gmra.mxu0 %v11148_v44  ;;  %4095 = vmatmul.bf16.gmra.mxu1 %v11141_v8  ;;  %v3843_v44 = vpop.f32.mrf.mxu3  ;;  %v5624_v8 = vld [vmem:[%s10463_s3 + $0x3f8] sm:$0xf] }
 0x417   : > { %4138 = vmatmul.bf16.gmra.mxu2 %v11167_v55  ;;  %v3844_v35 = vadd.f32 %v3843_v44, %v9895_v56  ;;  %4243 = vmatpush.bf16.msra.mxu1 %v5637_v15  ;;  %v5625_v60 = vor.u32 %v5964_v4, %v5624_v8 }
 0x418   : > { %4289 = vmatpush.bf16.msra.mxu2 %v5697_v18 }
 0x41a   : > { %v3962_v27 = vpop.f32.mrf.mxu2 }
 0x41b   : > { %v10103_v23 = vadd.f32 %v3962_v27, %v3920_v21  ;;  %v3878_v51 = vpop.f32.mrf.mxu0  ;;  %v3921_v55 = vpop.f32.mrf.mxu1  ;;  %4244 = vmatpush.bf16.msra.mxu1 %v5625_v60 }
 0x41c   : > { %v3879_v46 = vadd.f32 %v3878_v51, %v9983_v42  ;;  %v5958_v42 = vld [vmem:[%s10463_s3 + $0x3d0] sm:$0xf0] }
 0x41d   : > { %v5601_v34 = vor.u32 %v5958_v42, %v5600_v39 }
 0x41e   : > { %v3922_v22 = vadd.f32 %v3921_v55, %v3879_v46  ;;  %v3845_v56 = vpop.f32.mrf.mxu3 }
 0x41f   : > { %v3846_v26 = vadd.f32 %v3845_v56, %v9900_v13  ;;  %4245 = vmatpush.bf16.msra.mxu1 %v5613_v11 }
 0x422   : > { %v3964_v52 = vpop.f32.mrf.mxu2 }
 0x423   : > { %v10122_v59 = vadd.f32 %v3964_v52, %v3922_v22  ;;  %v3881_v58 = vpop.f32.mrf.mxu0  ;;  %v3924_v49 = vpop.f32.mrf.mxu1  ;;  %5723 = vmatmul.msk.bf16.gmra.mxu3 %vm3400_vm2, %v9625_v47  ;;  %4246 = vmatpush.bf16.msra.mxu1 %v5601_v34 }
 0x424   : > { %v3882_v21 = vadd.f32 %v3881_v58, %v10023_v10 }
 0x426   : > { %v3925_v15 = vadd.f32 %v3924_v49, %v3882_v21  ;;  %4062 = vmatmul.bf16.gmra.mxu0 %v11153_v30  ;;  %4100 = vmatmul.bf16.gmra.mxu1 %v11149_v36  ;;  %v3848_v13 = vpop.f32.mrf.mxu3 }
 0x427   : > { %4143 = vmatmul.bf16.gmra.mxu2 %v9168_v50  ;;  %v3849_v27 = vadd.f32 %v3848_v13, %v9910_v25 }
 0x42a   : > { %v3967_v44 = vpop.f32.mrf.mxu2 }
 0x42b   : > { %v10134_v10 = vadd.f32 %v3967_v44, %v3925_v15  ;;  %v3883_v8 = vpop.f32.mrf.mxu0  ;;  %v3926_v4 = vpop.f32.mrf.mxu1 }
 0x42c   : > { %v3884_v51 = vadd.f32 %v3883_v8, %v10071_v29 }
 0x42e   : > { %v3927_v30 = vadd.f32 %v3926_v4, %v3884_v51  ;;  %v3850_v55 = vpop.f32.mrf.mxu3 }
 0x432   : > { %v3969_v36 = vpop.f32.mrf.mxu2 }
 0x433   : > { %v10137_v46 = vadd.f32 %v3969_v36, %v3927_v30  ;;  %v3886_v60 = vpop.f32.mrf.mxu0  ;;  %v3929_v22 = vpop.f32.mrf.mxu1  ;;  %4161 = vmatmul.bf16.vlgmr.msra.gmra.mxu3 %v11156_v41  ;;  %v11181_v41 = vld [vmem:[#allocation73_spill] sm:$0xff] }
 0x434   : > { %v3887_v50 = vadd.f32 %v3886_v60, %v3844_v35 }
 0x436   : > { %v3930_v38 = vadd.f32 %v3929_v22, %v3887_v50  ;;  %4105 = vmatmul.bf16.gmra.mxu1 %v11179_v3  ;;  %4204 = vmatmul.bf16.vlgmr.msra.gmra.mxu0 %v11157_v28  ;;  %v3891_v25 = vpop.f32.mrf.mxu3  ;;  %v11183_v50 = vld [vmem:[#allocation44_spill] sm:$0xff] }
 0x437   : > { %4148 = vmatmul.bf16.gmra.mxu2 %v9244_v16  ;;  %v3892_v29 = vadd.f32 %v3891_v25, %v3849_v27  ;;  %v11180_v16 = vld [vmem:[#allocation83_spill] sm:$0xff]  ;;  %v4338_v27 = vlaneseq }
 0x439   : > { %v10157_v8 = vshrl.u32 %v4338_v27, 7  ;;  %v11188_v27 = vld [vmem:[#allocation75_spill] sm:$0xff] }
 0x43a   : > { %v3972_v11 = vpop.f32.mrf.mxu2 }
 0x43b   : > { %v10143_v56 = vadd.f32 %v3972_v11, %v3930_v38  ;;  %v3888_v52 = vpop.f32.mrf.mxu0  ;;  %v3931_v39 = vpop.f32.mrf.mxu1  ;;  %vm4340_vm3 = vcmp.lt.s32.totalorder %v10157_v8, 7  ;;  %vm4380_vm4 = vcmp.lt.s32.totalorder %v10157_v8, 6 }
 0x43c   : > { %v3889_v42 = vadd.f32 %v3888_v52, %v3846_v26 }
 0x43e   : > { %v3932_v53 = vadd.f32 %v3931_v39, %v3889_v42  ;;  %v3893_v58 = vpop.f32.mrf.mxu3 }
 0x43f   : > { %v11185_v58 = vld [vmem:[#allocation80_spill] sm:$0xff] }
 0x442   : > { %v3974_v35 = vpop.f32.mrf.mxu2 }
 0x443   : > { %v10145_v49 = vadd.f32 %v3974_v35, %v3932_v53  ;;  %v3934_v2 = vpop.f32.mrf.mxu1  ;;  %v4033_v21 = vpop.f32.mrf.mxu0  ;;  %4166 = vmatmul.bf16.gmra.mxu3 %v11181_v41 }
 0x444   : > { %v3935_v28 = vadd.f32 %v3934_v2, %v3892_v29 }
 0x446   : > { %4209 = vmatmul.bf16.gmra.mxu0 %v11161_v31  ;;  %4247 = vmatmul.bf16.vlgmr.msra.gmra.mxu1 %v11180_v16  ;;  %v3990_v34 = vpop.f32.mrf.mxu3 }
 0x447   : > { %5724 = vmatmul.msk.bf16.vlgmr.msra.gmra.mxu2 %vm3400_vm2, %v9300_v40  ;;  %v10155_v15 = vadd.f32 %v3990_v34, %v9920_v1  ;;  %v11182_v1 = vld [vmem:[#allocation82_spill] sm:$0xff] }
 0x448   : > { %v11186_v34 = vld [vmem:[#allocation58_spill] sm:$0xff] }
 0x449   : > { %v4325_v36 = vrot.slane %v10155_v15, 1 }
 0x44a   : > { %v3977_v18 = vpop.f32.mrf.mxu2 }
 0x44b   : > { %v10152_v26 = vadd.f32 %v3977_v18, %v3935_v28  ;;  %v3936_v13 = vpop.f32.mrf.mxu1  ;;  %v4035_v44 = vpop.f32.mrf.mxu0 }
 0x44c   : > { %v11187_v13 = vld [vmem:[#allocation24_spill] sm:$0xff] }
 0x44e   : > { %v3992_v4 = vpop.f32.mrf.mxu3 }
 0x44f   : > { %v3993_v51 = vadd.f32 %v3992_v4, %v9925_v32  ;;  %v11184_v32 = vld [vmem:[#allocation68_spill] sm:$0xff] }
 0x451   : > { %v4326_v60 = vrot.slane %v3993_v51, 1 }
 0x452   : > { %v3979_v31 = vpop.f32.mrf.mxu2 }
 0x453   : > { %v4038_v30 = vpop.f32.mrf.mxu0  ;;  %v4076_v55 = vpop.f32.mrf.mxu1  ;;  %v4352_v22 = vsel %vm4340_vm3, %v4325_v36, %v4326_v60  ;;  %4171 = vmatmul.bf16.gmra.mxu3 %v11183_v50  ;;  %v11189_v31 = vld [vmem:[#allocation78_spill] sm:$0xff] }
 0x454   : > { %v4077_v40 = vadd.f32 %v4076_v55, %v4033_v21  ;;  %v10172_v38 = vadd.f32 %v4352_v22, %v11184_v32  ;;  %v11190_v32 = vld [vmem:[#allocation3_spill] sm:$0xff] }
 0x456   : > { %4214 = vmatmul.bf16.gmra.mxu0 %v11166_v12  ;;  %4252 = vmatmul.bf16.gmra.mxu1 %v11182_v1  ;;  %v3995_v3 = vpop.f32.mrf.mxu3 }
 0x457   : > { %5725 = vmatmul.msk.bf16.gmra.mxu2 %vm3400_vm2, %v9315_v9  ;;  %v3996_v11 = vadd.f32 %v3995_v3, %v9956_v5 }
 0x459   : > { %v4327_v42 = vrot.slane %v3996_v11, 1 }
 0x45a   : > { %v4119_v25 = vpop.f32.mrf.mxu2 }
 0x45b   : > { %v10175_v12 = vadd.f32 %v4119_v25, %v4077_v40  ;;  %v4040_v29 = vpop.f32.mrf.mxu0  ;;  %v4078_v52 = vpop.f32.mrf.mxu1  ;;  %v4351_v53 = vsel %vm4340_vm3, %v4326_v60, %v4327_v42 }
 0x45c   : > { %v4079_v39 = vadd.f32 %v4078_v52, %v4035_v44  ;;  %v10180_v35 = vadd.f32 %v4351_v53, %v11185_v58  ;;  %v11191_v58 = vld [vmem:[#allocation35_spill] sm:$0xff] }
 0x45e   : > { %v3997_v9 = vpop.f32.mrf.mxu3 }
 0x45f   : > { %v3998_v21 = vadd.f32 %v3997_v9, %v9985_v63 }
 0x461   : > { %v4328_v18 = vrot.slane %v3998_v21, 1  ;;  %v11194_v21 = vld [vmem:[#allocation2_spill] sm:$0xff] }
 0x462   : > { %v4121_v2 = vpop.f32.mrf.mxu2 }
 0x463   : > { %v10183_v28 = vadd.f32 %v4121_v2, %v4079_v39  ;;  %v4043_v16 = vpop.f32.mrf.mxu0  ;;  %v4081_v5 = vpop.f32.mrf.mxu1  ;;  %v4350_v44 = vsel %vm4340_vm3, %v4327_v42, %v4328_v18  ;;  %4176 = vmatmul.bf16.gmra.mxu3 %v11188_v27  ;;  %v11193_v2 = vld [vmem:[#allocation47_spill] sm:$0xff] }
 0x464   : > { %v4082_v41 = vadd.f32 %v4081_v5, %v4038_v30  ;;  %v10193_v63 = vadd.f32 %v4350_v44, %v11189_v31 }
 0x466   : > { %4219 = vmatmul.bf16.gmra.mxu0 %v11186_v34  ;;  %4257 = vmatmul.bf16.gmra.mxu1 %v11187_v13  ;;  %v4000_v4 = vpop.f32.mrf.mxu3 }
 0x467   : > { %5726 = vmatmul.msk.bf16.gmra.mxu2 %vm3400_vm2, %v9356_v17  ;;  %v4001_v30 = vadd.f32 %v4000_v4, %v10025_v43  ;;  %v11195_v4 = vld [vmem:[#allocation70_spill] sm:$0xff] }
 0x469   : > { %v4329_v22 = vrot.slane %v4001_v30, 1 }
 0x46a   : > { %v4124_v51 = vpop.f32.mrf.mxu2 }
 0x46b   : > { %v10196_v55 = vadd.f32 %v4124_v51, %v4082_v41  ;;  %v4045_v40 = vpop.f32.mrf.mxu0  ;;  %v4083_v60 = vpop.f32.mrf.mxu1  ;;  %v4349_v50 = vsel %vm4340_vm3, %v4328_v18, %v4329_v22 }
 0x46c   : > { %v4084_v1 = vadd.f32 %v4083_v60, %v4040_v29  ;;  %v10201_v3 = vadd.f32 %v4349_v50, %v11190_v32  ;;  %v11192_v29 = vld [vmem:[#allocation84_spill] sm:$0xff] }
 0x46e   : > { %v4002_v17 = vpop.f32.mrf.mxu3 }
 0x46f   : > { %v4003_v11 = vadd.f32 %v4002_v17, %v10073_v62 }
 0x471   : > { %v4330_v53 = vrot.slane %v4003_v11, 1 }
 0x472   : > { %v4126_v25 = vpop.f32.mrf.mxu2 }
 0x473   : > { %v10204_v52 = vadd.f32 %v4126_v25, %v4084_v1  ;;  %v4048_v39 = vpop.f32.mrf.mxu0  ;;  %v4086_v43 = vpop.f32.mrf.mxu1  ;;  %v4348_v9 = vsel %vm4340_vm3, %v4329_v22, %v4330_v53  ;;  %4181 = vmatmul.bf16.gmra.mxu3 %v11193_v2  ;;  %v11197_v25 = vld [vmem:[#allocation71_spill] sm:$0xff] }
 0x474   : > { %v4087_v42 = vadd.f32 %v4086_v43, %v4043_v16  ;;  %v10214_v62 = vadd.f32 %v4348_v9, %v11194_v21 }
 0x476   : > { %4224 = vmatmul.bf16.gmra.mxu0 %v11191_v58  ;;  %4262 = vmatmul.bf16.gmra.mxu1 %v11192_v29  ;;  %v4005_v5 = vpop.f32.mrf.mxu3 }
 0x477   : > { %5727 = vmatmul.msk.bf16.gmra.mxu2 %vm3400_vm2, %v11177_v7  ;;  %v4006_v16 = vadd.f32 %v4005_v5, %v10103_v23 }
 0x479   : > { %v4331_v27 = vrot.slane %v4006_v16, 1 }
 0x47a   : > { %v4129_v41 = vpop.f32.mrf.mxu2 }
 0x47b   : > { %v10217_v18 = vadd.f32 %v4129_v41, %v4087_v42  ;;  %v4050_v34 = vpop.f32.mrf.mxu0  ;;  %v4088_v13 = vpop.f32.mrf.mxu1  ;;  %v4347_v31 = vsel %vm4340_vm3, %v4330_v53, %v4331_v27 }
 0x47c   : > { %v4089_v44 = vadd.f32 %v4088_v13, %v4045_v40  ;;  %v10222_v51 = vadd.f32 %v4347_v31, %v11195_v4  ;;  %v11196_v40 = vld [vmem:[#allocation79_spill] sm:$0xff] }
 0x47e   : > { %v4007_v7 = vpop.f32.mrf.mxu3 }
 0x47f   : > { %v4008_v60 = vadd.f32 %v4007_v7, %v10122_v59 }
 0x481   : > { %v4332_v32 = vrot.slane %v4008_v60, 1 }
 0x482   : > { %v4131_v30 = vpop.f32.mrf.mxu2 }
 0x483   : > { %v10225_v1 = vadd.f32 %v4131_v30, %v4089_v44  ;;  %v4053_v22 = vpop.f32.mrf.mxu0  ;;  %v4091_v23 = vpop.f32.mrf.mxu1  ;;  %v4346_v17 = vsel %vm4340_vm3, %v4331_v27, %v4332_v32  ;;  %4186 = vmatmul.bf16.gmra.mxu3 %v9170_v0 }
 0x484   : > { %v4092_v50 = vadd.f32 %v4091_v23, %v4048_v39  ;;  %v10235_v59 = vadd.f32 %v4346_v17, %v11197_v25 }
 0x486   : > { %4229 = vmatmul.bf16.gmra.mxu0 %v9172_v6  ;;  %4267 = vmatmul.bf16.gmra.mxu1 %v11196_v40  ;;  %v4010_v11 = vpop.f32.mrf.mxu3 }
 0x487   : > { %5728 = vmatmul.msk.bf16.gmra.mxu2 %vm3400_vm2, %v9508_v24  ;;  %v4011_v39 = vadd.f32 %v4010_v11, %v10134_v10 }
 0x489   : > { %v4333_v29 = vrot.slane %v4011_v39, 1 }
 0x48a   : > { %v4134_v43 = vpop.f32.mrf.mxu2 }
 0x48b   : > { %v10238_v42 = vadd.f32 %v4134_v43, %v4092_v50  ;;  %v4055_v6 = vpop.f32.mrf.mxu0  ;;  %v4093_v53 = vpop.f32.mrf.mxu1  ;;  %v4345_v9 = vsel %vm4340_vm3, %v4332_v32, %v4333_v29 }
 0x48c   : > { %v4094_v58 = vadd.f32 %v4093_v53, %v4050_v34  ;;  %v10243_v0 = vadd.f32 %v4345_v9, %v9844_v61  ;;  %v11198_v61 = vld [vmem:[#allocation10_spill] sm:$0xff] }
 0x48e   : > { %v4012_v24 = vpop.f32.mrf.mxu3 }
 0x48f   : > { %v4013_v21 = vadd.f32 %v4012_v24, %v10137_v46 }
 0x491   : > { %v4334_v13 = vrot.slane %v4013_v21, 1 }
 0x492   : > { %v4136_v2 = vpop.f32.mrf.mxu2 }
 0x493   : > { %v10246_v5 = vadd.f32 %v4136_v2, %v4094_v58  ;;  %v4058_v41 = vpop.f32.mrf.mxu0  ;;  %v4096_v10 = vpop.f32.mrf.mxu1  ;;  %v4344_v34 = vsel %vm4340_vm3, %v4333_v29, %v4334_v13  ;;  %4191 = vmatmul.bf16.gmra.mxu3 %v9246_v14 }
 0x494   : > { %v4097_v16 = vadd.f32 %v4096_v10, %v4053_v22  ;;  %v10256_v46 = vadd.f32 %v4344_v34, %v11198_v61 }
 0x496   : > { %4234 = vmatmul.bf16.gmra.mxu0 %v9250_v45  ;;  %4272 = vmatmul.bf16.gmra.mxu1 %v9278_v37  ;;  %v4015_v44 = vpop.f32.mrf.mxu3 }
 0x497   : > { %5729 = vmatmul.msk.bf16.gmra.mxu2 %vm3400_vm2, %v9607_v33  ;;  %v4016_v31 = vadd.f32 %v4015_v44, %v10143_v56 }
 0x499   : > { %v4335_v30 = vrot.slane %v4016_v31, 1 }
 0x49a   : > { %v4139_v27 = vpop.f32.mrf.mxu2 }
 0x49b   : > { %v10259_v4 = vadd.f32 %v4139_v27, %v4097_v16  ;;  %v4060_v45 = vpop.f32.mrf.mxu0  ;;  %v4098_v7 = vpop.f32.mrf.mxu1  ;;  %v4343_v60 = vsel %vm4340_vm3, %v4334_v13, %v4335_v30 }
 0x49c   : > { %v4099_v37 = vadd.f32 %v4098_v7, %v4055_v6  ;;  %v10264_v14 = vadd.f32 %v4343_v60, %v9884_v48 }
 0x49e   : > { %v4017_v33 = vpop.f32.mrf.mxu3 }
 0x49f   : > { %v4018_v23 = vadd.f32 %v4017_v33, %v10145_v49 }
 0x4a1   : > { %v4336_v17 = vrot.slane %v4018_v23, 1 }
 0x4a2   : > { %v4141_v22 = vpop.f32.mrf.mxu2 }
 0x4a3   : > { %v10267_v50 = vadd.f32 %v4141_v22, %v4099_v37  ;;  %v4063_v32 = vpop.f32.mrf.mxu0  ;;  %v4101_v56 = vpop.f32.mrf.mxu1  ;;  %v4342_v25 = vsel %vm4340_vm3, %v4335_v30, %v4336_v17 }
 0x4a4   : > { %v4102_v40 = vadd.f32 %v4101_v56, %v4058_v41  ;;  %v10275_v48 = vadd.f32 %v4342_v25, %v9888_v57 }
 0x4a6   : > { %4277 = vmatmul.bf16.gmra.mxu1 %v9510_v19  ;;  %v4020_v11 = vpop.f32.mrf.mxu3 }
 0x4a7   : > { %5730 = vmatmul.msk.bf16.gmra.mxu2 %vm3400_vm2, %v9625_v47  ;;  %v4021_v49 = vadd.f32 %v4020_v11, %v10152_v26 }
 0x4a9   : > { %v4337_v29 = vrot.slane %v4021_v49, 1  ;;  %v10306_v49 = vld [vmem:[%s10464_s4] ss:$0 sm:$0xff] }
 0x4aa   : > { %v4144_v43 = vpop.f32.mrf.mxu2 }
 0x4ab   : > { %v10278_v39 = vadd.f32 %v4144_v43, %v4102_v40  ;;  %v4065_v6 = vpop.f32.mrf.mxu0  ;;  %v4103_v53 = vpop.f32.mrf.mxu1  ;;  %v4341_v19 = vsel %vm4340_vm3, %v4336_v17, %v4337_v29  ;;  %v4353_v47 = vsel %vm4340_vm3, %v4337_v29, %v4325_v36 }
 0x4ac   : > { %v4104_v58 = vadd.f32 %v4103_v53, %v4060_v45  ;;  %v10287_v57 = vadd.f32 %v4341_v19, %v9898_v20  ;;  %v10290_v9 = vadd.f32 %v4353_v47, %v9903_v54 }
 0x4ae   : > { %v4022_v26 = vpop.f32.mrf.mxu3 }
 0x4b2   : > { %v4146_v24 = vpop.f32.mrf.mxu2 }
 0x4b3   : > { %v10292_v2 = vadd.f32 %v4146_v24, %v4104_v58  ;;  %v4106_v21 = vpop.f32.mrf.mxu1  ;;  %v4205_v41 = vpop.f32.mrf.mxu0 }
 0x4b4   : > { %v4107_v10 = vadd.f32 %v4106_v21, %v4063_v32 }
 0x4b6   : > { %v4162_v13 = vpop.f32.mrf.mxu3 }
 0x4b7   : > { %v4163_v54 = vadd.f32 %v4162_v13, %v10175_v12 }
 0x4b9   : > { %v4206_v60 = vadd.f32 %v4205_v41, %v4163_v54 }
 0x4ba   : > { %v4149_v16 = vpop.f32.mrf.mxu2 }
 0x4bb   : > { %v10294_v34 = vadd.f32 %v4149_v16, %v4107_v10  ;;  %v4108_v15 = vpop.f32.mrf.mxu1  ;;  %v4207_v61 = vpop.f32.mrf.mxu0 }
 0x4be   : > { %v4164_v44 = vpop.f32.mrf.mxu3 }
 0x4bf   : > { %v4165_v7 = vadd.f32 %v4164_v44, %v10183_v28 }
 0x4c1   : > { %v4208_v22 = vadd.f32 %v4207_v61, %v4165_v7 }
 0x4c2   : > { %v4151_v36 = vpop.f32.mrf.mxu2 }
 0x4c3   : > { %v4210_v20 = vpop.f32.mrf.mxu0  ;;  %v4248_v27 = vpop.f32.mrf.mxu1 }
 0x4c4   : > { %v4249_v33 = vadd.f32 %v4248_v27, %v4206_v60 }
 0x4c6   : > { %v4167_v31 = vpop.f32.mrf.mxu3 }
 0x4c7   : > { %v4168_v17 = vadd.f32 %v4167_v31, %v10196_v55 }
 0x4c9   : > { %v4211_v55 = vadd.f32 %v4210_v20, %v4168_v17 }
 0x4ca   : > { %v4291_v45 = vpop.f32.mrf.mxu2 }
 0x4cb   : > { %v4212_v37 = vpop.f32.mrf.mxu0  ;;  %v4250_v30 = vpop.f32.mrf.mxu1  ;;  %v10298_v23 = vadd.f32 %v4291_v45, %v4249_v33 }
 0x4cc   : > { %v4251_v32 = vadd.f32 %v4250_v30, %v4208_v22 }
 0x4cd   : > { %v4367_v12 = vrot.slane %v10298_v23, 2 }
 0x4ce   : > { %v4169_v56 = vpop.f32.mrf.mxu3 }
 0x4cf   : > { %v4170_v26 = vadd.f32 %v4169_v56, %v10204_v52 }
 0x4d1   : > { %v4213_v52 = vadd.f32 %v4212_v37, %v4170_v26 }
 0x4d2   : > { %v4293_v40 = vpop.f32.mrf.mxu2 }
 0x4d3   : > { %v4294_v25 = vadd.f32 %v4293_v40, %v4251_v32  ;;  %v4215_v11 = vpop.f32.mrf.mxu0  ;;  %v4253_v43 = vpop.f32.mrf.mxu1 }
 0x4d4   : > { %v4254_v58 = vadd.f32 %v4253_v43, %v4211_v55 }
 0x4d5   : > { %v4368_v28 = vrot.slane %v4294_v25, 2 }
 0x4d6   : > { %v4172_v29 = vpop.f32.mrf.mxu3 }
 0x4d7   : > { %v4392_v6 = vsel %vm4380_vm4, %v4367_v12, %v4368_v28  ;;  %v4173_v20 = vadd.f32 %v4172_v29, %v10217_v18 }
 0x4d8   : > { %v4394_v53 = vadd.f32 %v4392_v6, %v10172_v38 }
 0x4da   : > { %v4296_v19 = vpop.f32.mrf.mxu2  ;;  %v4411_v47 = vadd.f32 %v10306_v49, %v4394_v53 }
 0x4db   : > { %v4297_v24 = vadd.f32 %v4296_v19, %v4254_v58  ;;  %v4217_v21 = vpop.f32.mrf.mxu0  ;;  %v4255_v41 = vpop.f32.mrf.mxu1 }
 0x4dc   : > { %v10322_v10 = vmax.f32 %v4411_v47, 0.0  ;;  %v4256_v15 = vadd.f32 %v4255_v41, %v4213_v52 }
 0x4dd   : > { %v4369_v38 = vrot.slane %v4297_v24, 2 }
 0x4de   : > { %4437 = vst [vmem:[%s10320_s23] sm:$0xff] %v10322_v10  ;;  %v4174_v61 = vpop.f32.mrf.mxu3 }
 0x4df   : > { %v4391_v16 = vsel %vm4380_vm4, %v4368_v28, %v4369_v38  ;;  %v4175_v32 = vadd.f32 %v4174_v61, %v10225_v1 }
 0x4e0   : > { %v4395_v13 = vadd.f32 %v4391_v16, %v10180_v35  ;;  %v4216_v35 = vadd.f32 %v4215_v11, %v4173_v20 }
 0x4e2   : > { %v4298_v36 = vpop.f32.mrf.mxu2  ;;  %v4412_v44 = vadd.f32 %v10306_v49, %v4395_v13 }
 0x4e3   : > { %v4299_v27 = vadd.f32 %v4298_v36, %v4256_v15  ;;  %v4220_v54 = vpop.f32.mrf.mxu0  ;;  %v4258_v31 = vpop.f32.mrf.mxu1 }
 0x4e4   : > { %v10331_v45 = vmax.f32 %v4412_v44, 0.0  ;;  %v4259_v60 = vadd.f32 %v4258_v31, %v4216_v35 }
 0x4e5   : > { %v4370_v7 = vrot.slane %v4299_v27, 2 }
 0x4e6   : > { %4438 = vst [vmem:[%s10320_s23 + $0x8] sm:$0xff] %v10331_v45  ;;  %v4177_v33 = vpop.f32.mrf.mxu3 }
 0x4e7   : > { %v4390_v37 = vsel %vm4380_vm4, %v4369_v38, %v4370_v7  ;;  %v4178_v58 = vadd.f32 %v4177_v33, %v10238_v42 }
 0x4e8   : > { %v4396_v30 = vadd.f32 %v4390_v37, %v10193_v63  ;;  %v4218_v63 = vadd.f32 %v4217_v21, %v4175_v32 }
 0x4ea   : > { %v4301_v22 = vpop.f32.mrf.mxu2  ;;  %v4413_v18 = vadd.f32 %v10306_v49, %v4396_v30 }
 0x4eb   : > { %v4302_v56 = vadd.f32 %v4301_v22, %v4259_v60  ;;  %v4222_v40 = vpop.f32.mrf.mxu0  ;;  %v4260_v17 = vpop.f32.mrf.mxu1 }
 0x4ec   : > { %v10340_v25 = vmax.f32 %v4413_v18, 0.0  ;;  %v4261_v6 = vadd.f32 %v4260_v17, %v4218_v63 }
 0x4ed   : > { %v4371_v43 = vrot.slane %v4302_v56, 2 }
 0x4ee   : > { %4439 = vst [vmem:[%s10320_s23 + $0x10] sm:$0xff] %v10340_v25  ;;  %v4179_v55 = vpop.f32.mrf.mxu3 }
 0x4ef   : > { %v4389_v11 = vsel %vm4380_vm4, %v4370_v7, %v4371_v43  ;;  %v4180_v13 = vadd.f32 %v4179_v55, %v10246_v5 }
 0x4f0   : > { %v4397_v28 = vadd.f32 %v4389_v11, %v10201_v3  ;;  %v4221_v3 = vadd.f32 %v4220_v54, %v4178_v58 }
 0x4f2   : > { %v4303_v53 = vpop.f32.mrf.mxu2  ;;  %v4414_v1 = vadd.f32 %v10306_v49, %v4397_v28 }
 0x4f3   : > { %v4304_v29 = vadd.f32 %v4303_v53, %v4261_v6  ;;  %v4225_v19 = vpop.f32.mrf.mxu0  ;;  %v4263_v47 = vpop.f32.mrf.mxu1 }
 0x4f4   : > { %v10349_v26 = vmax.f32 %v4414_v1, 0.0  ;;  %v4264_v38 = vadd.f32 %v4263_v47, %v4221_v3 }
 0x4f5   : > { %v4372_v24 = vrot.slane %v4304_v29, 2 }
 0x4f6   : > { %4440 = vst [vmem:[%s10320_s23 + $0x18] sm:$0xff] %v10349_v26  ;;  %v4182_v16 = vpop.f32.mrf.mxu3 }
 0x4f7   : > { %v4388_v21 = vsel %vm4380_vm4, %v4371_v43, %v4372_v24  ;;  %v4183_v35 = vadd.f32 %v4182_v16, %v10259_v4 }
 0x4f8   : > { %v4398_v41 = vadd.f32 %v4388_v21, %v10214_v62  ;;  %v4223_v62 = vadd.f32 %v4222_v40, %v4180_v13 }
 0x4fa   : > { %v4306_v52 = vpop.f32.mrf.mxu2  ;;  %v4415_v42 = vadd.f32 %v10306_v49, %v4398_v41 }
 0x4fb   : > { %v4307_v15 = vadd.f32 %v4306_v52, %v4264_v38  ;;  %v4227_v61 = vpop.f32.mrf.mxu0  ;;  %v4265_v36 = vpop.f32.mrf.mxu1 }
 0x4fc   : > { %v10358_v44 = vmax.f32 %v4415_v42, 0.0  ;;  %v4266_v31 = vadd.f32 %v4265_v36, %v4223_v62 }
 0x4fd   : > { %v4373_v20 = vrot.slane %v4307_v15, 2 }
 0x4fe   : > { %4441 = vst [vmem:[%s10320_s23 + $0x20] sm:$0xff] %v10358_v44  ;;  %v4184_v7 = vpop.f32.mrf.mxu3 }
 0x4ff   : > { %v4387_v27 = vsel %vm4380_vm4, %v4372_v24, %v4373_v20  ;;  %v4185_v11 = vadd.f32 %v4184_v7, %v10267_v50 }
 0x500   : > { %v4399_v54 = vadd.f32 %v4387_v27, %v10222_v51  ;;  %v4226_v51 = vadd.f32 %v4225_v19, %v4183_v35 }
 0x502   : > { %v4308_v37 = vpop.f32.mrf.mxu2  ;;  %v4416_v5 = vadd.f32 %v10306_v49, %v4399_v54 }
 0x503   : > { %v4309_v30 = vadd.f32 %v4308_v37, %v4266_v31  ;;  %v4230_v60 = vpop.f32.mrf.mxu0  ;;  %v4268_v33 = vpop.f32.mrf.mxu1 }
 0x504   : > { %v10367_v22 = vmax.f32 %v4416_v5, 0.0  ;;  %v4269_v40 = vadd.f32 %v4268_v33, %v4226_v51 }
 0x505   : > { %v4374_v18 = vrot.slane %v4309_v30, 2 }
 0x506   : > { %4442 = vst [vmem:[%s10320_s23 + $0x28] sm:$0xff] %v10367_v22  ;;  %v4187_v17 = vpop.f32.mrf.mxu3 }
 0x507   : > { %v4386_v32 = vsel %vm4380_vm4, %v4373_v20, %v4374_v18  ;;  %v4188_v24 = vadd.f32 %v4187_v17, %v10278_v39 }
 0x508   : > { %v4400_v56 = vadd.f32 %v4386_v32, %v10235_v59  ;;  %v4228_v59 = vadd.f32 %v4227_v61, %v4185_v11 }
 0x50a   : > { %v4311_v43 = vpop.f32.mrf.mxu2  ;;  %v4417_v4 = vadd.f32 %v10306_v49, %v4400_v56 }
 0x50b   : > { %v4312_v63 = vadd.f32 %v4311_v43, %v4269_v40  ;;  %v4232_v28 = vpop.f32.mrf.mxu0  ;;  %v4270_v6 = vpop.f32.mrf.mxu1 }
 0x50c   : > { %v10376_v55 = vmax.f32 %v4417_v4, 0.0  ;;  %v4271_v29 = vadd.f32 %v4270_v6, %v4228_v59 }
 0x50d   : > { %v4375_v53 = vrot.slane %v4312_v63, 2 }
 0x50e   : > { %4443 = vst [vmem:[%s10320_s23 + $0x30] sm:$0xff] %v10376_v55  ;;  %v4189_v19 = vpop.f32.mrf.mxu3 }
 0x50f   : > { %v4385_v1 = vsel %vm4380_vm4, %v4374_v18, %v4375_v53  ;;  %v4190_v36 = vadd.f32 %v4189_v19, %v10292_v2 }
 0x510   : > { %v4401_v58 = vadd.f32 %v4385_v1, %v10243_v0  ;;  %v4231_v0 = vadd.f32 %v4230_v60, %v4188_v24 }
 0x511   : > { %v4233_v37 = vadd.f32 %v4232_v28, %v4190_v36 }
 0x512   : > { %v4313_v47 = vpop.f32.mrf.mxu2  ;;  %v4418_v50 = vadd.f32 %v10306_v49, %v4401_v58 }
 0x513   : > { %v4314_v21 = vadd.f32 %v4313_v47, %v4271_v29  ;;  %v4235_v3 = vpop.f32.mrf.mxu0  ;;  %v4273_v41 = vpop.f32.mrf.mxu1 }
 0x514   : > { %v10385_v38 = vmax.f32 %v4418_v50, 0.0  ;;  %v4274_v13 = vadd.f32 %v4273_v41, %v4231_v0  ;;  %v4451_v50 = vld [vmem:[%s10465_s5 + $0x8] sm:$0x1f]  ;;  %v4488_v41 = vmul.f32 %v10358_v44, %v10358_v44 }
 0x515   : > { %v4376_v16 = vrot.slane %v4314_v21, 2  ;;  %v4490_v21 = vmul.f32 %v10376_v55, %v10376_v55 }
 0x516   : > { %4444 = vst [vmem:[%s10320_s23 + $0x38] sm:$0xff] %v10385_v38  ;;  %v4192_v15 = vpop.f32.mrf.mxu3  ;;  %v4491_v24 = vmul.f32 %v10385_v38, %v10385_v38 }
 0x517   : > { %v4384_v52 = vsel %vm4380_vm4, %v4375_v53, %v4376_v16  ;;  %v4193_v2 = vadd.f32 %v4192_v15, %v10294_v34 }
 0x518   : > { %v4402_v42 = vadd.f32 %v4384_v52, %v10256_v46 }
 0x519   : > { %v4236_v40 = vadd.f32 %v4235_v3, %v4193_v2  ;;  %v4489_v3 = vmul.f32 %v10367_v22, %v10367_v22 }
 0x51a   : > { %v4316_v61 = vpop.f32.mrf.mxu2  ;;  %v4419_v39 = vadd.f32 %v10306_v49, %v4402_v42 }
 0x51b   : > { %v4317_v20 = vadd.f32 %v4316_v61, %v4274_v13  ;;  %v4237_v27 = vpop.f32.mrf.mxu0  ;;  %v4275_v62 = vpop.f32.mrf.mxu1 }
 0x51c   : > { %v4432_v54 = vmax.f32 %v4419_v39, 0.0  ;;  %v4276_v5 = vadd.f32 %v4275_v62, %v4233_v37 }
 0x51d   : > { %v4377_v31 = vrot.slane %v4317_v20, 2 }
 0x51e   : > { %4445 = vst [vmem:[%s10320_s23 + $0x40] sm:$0xff] %v4432_v54  ;;  %v4194_v35 = vpop.f32.mrf.mxu3 }
 0x51f   : > { %v4383_v7 = vsel %vm4380_vm4, %v4376_v16, %v4377_v31  ;;  %v4486_v16 = vmul.f32 %v10340_v25, %v10340_v25 }
 0x520   : > { %v4403_v46 = vadd.f32 %v4383_v7, %v10264_v14 }
 0x522   : > { %v4318_v30 = vpop.f32.mrf.mxu2  ;;  %v4420_v60 = vadd.f32 %v10306_v49, %v4403_v46 }
 0x523   : > { %v4319_v33 = vadd.f32 %v4318_v30, %v4276_v5  ;;  %v4278_v18 = vpop.f32.mrf.mxu1 }
 0x524   : > { %v4433_v32 = vmax.f32 %v4420_v60, 0.0  ;;  %v4279_v14 = vadd.f32 %v4278_v18, %v4236_v40 }
 0x525   : > { %v4378_v51 = vrot.slane %v4319_v33, 2 }
 0x526   : > { %4446 = vst [vmem:[%s10320_s23 + $0x48] sm:$0xff] %v4433_v32 }
 0x527   : > { %v4382_v56 = vsel %vm4380_vm4, %v4377_v31, %v4378_v51 }
 0x528   : > { %v4404_v17 = vadd.f32 %v4382_v56, %v10275_v48 }
 0x52a   : > { %v4321_v43 = vpop.f32.mrf.mxu2  ;;  %v4421_v4 = vadd.f32 %v10306_v49, %v4404_v17 }
 0x52b   : > { %v4322_v11 = vadd.f32 %v4321_v43, %v4279_v14  ;;  %v4280_v34 = vpop.f32.mrf.mxu1 }
 0x52c   : > { %v4434_v63 = vmax.f32 %v4421_v4, 0.0 }
 0x52d   : > { %v4379_v28 = vrot.slane %v4322_v11, 2 }
 0x52e   : > { %4447 = vst [vmem:[%s10320_s23 + $0x50] sm:$0xff] %v4434_v63  ;;  %v4494_v23 = vmul.f32 %v4434_v63, %v4434_v63 }
 0x52f   : > { %v4381_v6 = vsel %vm4380_vm4, %v4378_v51, %v4379_v28  ;;  %v4393_v53 = vsel %vm4380_vm4, %v4379_v28, %v4367_v12  ;;  %v4493_v12 = vmul.f32 %v4433_v32, %v4433_v32 }
 0x530   : > { %v4406_v48 = vadd.f32 %v4393_v53, %v10290_v9  ;;  %v4405_v1 = vadd.f32 %v4381_v6, %v10287_v57  ;;  %v4450_v57 = vld [vmem:[%s10465_s5] sm:$0xff] }
 0x532   : > { %v4323_v59 = vpop.f32.mrf.mxu2  ;;  %v4423_v58 = vadd.f32 %v10306_v49, %v4406_v48  ;;  %v4422_v29 = vadd.f32 %v10306_v49, %v4405_v1  ;;  %v4492_v49 = vmul.f32 %v4432_v54, %v4432_v54 }
 0x534   : > { %v4436_v19 = vmax.f32 %v4423_v58, 0.0  ;;  %v4435_v47 = vmax.f32 %v4422_v29, 0.0 }
 0x536   : > { %4449 = vst [vmem:[%s10320_s23 + $0x60] sm:$0xff] %v4436_v19  ;;  %4462 = vmatpush.msrb.mxu3 %v4436_v19  ;;  %v4496_v8 = vmul.f32 %v4436_v19, %v4436_v19  ;;  %v4495_v9 = vmul.f32 %v4435_v47, %v4435_v47 }
 0x537   : > { %4448 = vst [vmem:[%s10320_s23 + $0x58] sm:$0xff] %v4435_v47 }
 0x538   : > { %4463 = vmatpush.msrb.mxu3 %v4435_v47 }
 0x53a   : > { %4464 = vmatpush.msrb.mxu3 %v4434_v63 }
 0x53c   : > { %4465 = vmatpush.msrb.mxu3 %v4433_v32 }
 0x53e   : > { %4466 = vmatpush.msrb.mxu3 %v4432_v54 }
 0x540   : > { %4467 = vmatpush.msrb.mxu3 %v10385_v38  ;;  %v4487_v38 = vmul.f32 %v10349_v26, %v10349_v26 }
 0x542   : > { %4468 = vmatpush.msrb.mxu3 %v10376_v55  ;;  %v4485_v55 = vmul.f32 %v10331_v45, %v10331_v45 }
 0x544   : > { %4469 = vmatpush.msrb.mxu3 %v10367_v22  ;;  %v4484_v22 = vmul.f32 %v10322_v10, %v10322_v10 }
 0x546   : > { %4470 = vmatpush.msrb.mxu3 %v10358_v44 }
 0x548   : > { %4471 = vmatpush.msrb.mxu3 %v10349_v26 }
 0x54a   : > { %4472 = vmatpush.msrb.mxu3 %v10340_v25 }
 0x54c   : > { %4473 = vmatpush.msrb.mxu3 %v10331_v45 }
 0x54e   : > { %4474 = vmatpush.msrb.mxu3 %v10322_v10 }
 0x54f   : > { %5731 = vmatmul.msk.f32.vlgmr.msrb.gmra.mxu3 %vm4452_vm5, %v4450_v57 }
 0x550   : > { %4500 = vmatpush.msra.mxu3 %v4496_v8 }
 0x552   : > { %4501 = vmatpush.msra.mxu3 %v4495_v9 }
 0x554   : > { %4502 = vmatpush.msra.mxu3 %v4494_v23 }
 0x556   : > { %4503 = vmatpush.msra.mxu3 %v4493_v12 }
 0x557   : > { %5732 = vmatmul.msk.f32.gmra.mxu3 %vm4452_vm5, %v4451_v50 }
 0x558   : > { %4504 = vmatpush.msra.mxu3 %v4492_v49 }
 0x55a   : > { %4505 = vmatpush.msra.mxu3 %v4491_v24 }
 0x55c   : > { %4506 = vmatpush.msra.mxu3 %v4490_v21 }
 0x55e   : > { %4507 = vmatpush.msra.mxu3 %v4489_v3 }
 0x560   : > { %4508 = vmatpush.msra.mxu3 %v4488_v41 }
 0x562   : > { %4509 = vmatpush.msra.mxu3 %v4487_v38 }
 0x564   : > { %4510 = vmatpush.msra.mxu3 %v4486_v16 }
 0x566   : > { %4511 = vmatpush.msra.mxu3 %v4485_v55 }
 0x568   : > { %4512 = vmatpush.msra.mxu3 %v4484_v22 }
 0x569   : > { %5733 = vmatmul.msk.f32.vlgmr.msra.gmra.mxu3 %vm4452_vm5, %v4450_v57 }
 0x571   : > { %5734 = vmatmul.msk.f32.gmra.mxu3 %vm4452_vm5, %v4451_v50 }
 0x5d2   : > { %v4476_v25 = vpop.f32.mrf.mxu3 }
 0x5d3   : > { %4482 = vst [vmem:[%s294_s8] sm:$0xff] %v4476_v25 }
 0x5da   : > { %v4479_v26 = vpop.f32.mrf.mxu3 }
 0x5db   : > { %4483 = vst [vmem:[%s294_s8 + $0x8] sm:$0x1f] %v4479_v26 }
 0x5ec   : > { %v4514_v45 = vpop.f32.mrf.mxu3 }
 0x5ed   : > { %4520 = vst [vmem:[%s294_s8 + $0xd] sm:$0xff] %v4514_v45 }
 0x5f4   : > { %v4517_v44 = vpop.f32.mrf.mxu3 }
 0x5f5   : > { %4521 = vst [vmem:[%s294_s8 + $0x15] sm:$0x1f] %v4517_v44 }
 0x5f6 PF: > { %s18_s24 = sadd.s32 1, %s6230_s24  }
 0x5f7   : > { %p15_p5 = scmp.ge.s32.totalorder %s18_s24, 4  }
 0x5f9   :  { %17 = sbr.rel (!%p15_p5) target bundleno = 1 (0x1), region = 86 }

</bundles_post_ra>
